<compile_context>
chip_gen: v5e
topology: v5e:2x2
jax: 0.10.0
libtpu: 0.0.40
codegen_flags: <defaults>
</compile_context>

<pallas_src>
import functools

import jax
import jax.numpy as jnp
from jax.experimental import pallas as pl
from jax.experimental.pallas import tpu as pltpu


# ----------------------------------------------------------------------------
# Pallas kernels
# ----------------------------------------------------------------------------
def _extract_kernel(idx_ref, wts_ref, img_ref, wc_ref, bc_ref, out_ref,
                    imgf_ref, feats_ref, *, H, W, n_pts):
    """Fused per-image extractor:
       - 3x3 conv (stride 1, pad 1) + bias + ReLU, computed as 9 shifted
         flat-window matmuls on the padded image (im2col fused in-kernel),
       - bilinear grid_sample of `n_pts` points as a 4-row VMEM gather with
         scalar-prefetched flat indices (row pitch W+2) and weights.
       The feature map never leaves VMEM."""
    Wp = W + 2                       # padded row pitch
    P = H * Wp                       # rows of the padded-pitch feature map
    Fg = wc_ref.shape[2]
    g = pl.program_id(0)

    # bf16 image -> f32 working copy (one aligned load; bf16 halves the HBM DMA)
    imgf_ref[...] = img_ref[0].astype(jnp.float32)

    # ---- conv: 9 shifted flat windows accumulated on the MXU ---------------
    acc = jnp.zeros((P, Fg), jnp.float32)
    for dy in range(3):
        for dx in range(3):
            k = dy * 3 + dx
            s = dy * Wp + dx
            acc = acc + jnp.dot(imgf_ref[s:s + P, :], wc_ref[k],
                                preferred_element_type=jnp.float32)
    feats_ref[...] = jnp.maximum(acc + bc_ref[...], 0.0)

    # ---- bilinear interpolation: gather 4 rows per point, weighted sum -----
    rows = []
    for p in range(n_pts):
        base = 4 * p
        r = jnp.zeros((1, Fg), jnp.float32)
        for c in range(4):
            fi = idx_ref[g, base + c]        # flat row index (pitch = W + 2)
            fw = wts_ref[g, base + c]        # bilinear weight (0 if OOB corner)
            r = r + fw * feats_ref[pl.ds(fi, 1), :]
        rows.append(r)
    out_ref[0] = jnp.concatenate(rows, axis=0)


def _embed_dist_kernel(x0_ref, x1_ref, w_ref, b_ref, o_ref):
    """Fused embedder (linear over the (sn*rn, fg) group feature, expressed as
    a sum of per-(sn,rn) matmuls so no relayout transpose is needed) plus the
    positive L2 distance.  Embeddings never leave VMEM."""
    srn, M, _ = x0_ref.shape
    Fe = w_ref.shape[2]
    e0 = jnp.zeros((M, Fe), jnp.float32)
    e1 = jnp.zeros((M, Fe), jnp.float32)
    for s in range(srn):
        e0 = e0 + jnp.dot(x0_ref[s], w_ref[s], preferred_element_type=jnp.float32)
        e1 = e1 + jnp.dot(x1_ref[s], w_ref[s], preferred_element_type=jnp.float32)
    e0 = e0 + b_ref[...]
    e1 = e1 + b_ref[...]
    d = e0 - e1
    # TODO(synk): add an eps inside the sqrt (or a custom VJP) before using this
    # for training gradients; the forward value matches torch.norm exactly.
    o_ref[...] = jnp.sqrt(jnp.sum(d * d, axis=-1, keepdims=True))


# ----------------------------------------------------------------------------
# JAX glue (small scalar/layout work only)
# ----------------------------------------------------------------------------
def _bilinear_gather_coeffs(pts, H, W, pitch, pool_num=1):
    """Emulates F.grid_sample('bilinear', zeros padding, align_corners=False):
    per point, the 4 flat corner row indices (row pitch `pitch`) and the 4
    bilinear weights (zeroed for out-of-bounds corners), flattened for SMEM."""
    pts = pts.astype(jnp.float32)
    pts_warp = (pts + 0.5) / pool_num - 0.5
    x = pts_warp[..., 0]
    y = pts_warp[..., 1]
    # normalize_coordinates: maps [0, W-1] -> [-1, 1]
    xn = (x - (W - 1) / 2.0) / ((W - 1) / 2.0)
    yn = (y - (H - 1) / 2.0) / ((H - 1) / 2.0)
    # grid_sample unnormalization, align_corners=False (PyTorch default)
    ix = ((xn + 1.0) * W - 1.0) / 2.0
    iy = ((yn + 1.0) * H - 1.0) / 2.0
    x0 = jnp.floor(ix)
    y0 = jnp.floor(iy)
    x1 = x0 + 1.0
    y1 = y0 + 1.0
    wx1 = ix - x0
    wx0 = 1.0 - wx1
    wy1 = iy - y0
    wy0 = 1.0 - wy1

    def corner(xc, yc, wc):
        inb = (xc >= 0) & (xc <= W - 1) & (yc >= 0) & (yc <= H - 1)
        w_eff = wc * inb.astype(jnp.float32)
        xi = jnp.clip(xc, 0, W - 1).astype(jnp.int32)
        yi = jnp.clip(yc, 0, H - 1).astype(jnp.int32)
        return yi * pitch + xi, w_eff

    i00, w00 = corner(x0, y0, wx0 * wy0)
    i10, w10 = corner(x1, y0, wx1 * wy0)
    i01, w01 = corner(x0, y1, wx0 * wy1)
    i11, w11 = corner(x1, y1, wx1 * wy1)
    idx = jnp.stack([i00, i10, i01, i11], axis=-1)       # [B', n, 4]
    wts = jnp.stack([w00, w10, w01, w11], axis=-1)       # [B', n, 4]
    Bp, npts = idx.shape[0], idx.shape[1]
    return (idx.reshape(Bp, npts * 4).astype(jnp.int32),
            wts.reshape(Bp, npts * 4).astype(jnp.float32))


# ----------------------------------------------------------------------------
# Module re-implementation
# ----------------------------------------------------------------------------
def make_params(key, cin=3, fg=16, sn=2, rn=2, fe=32):
    k0, k1, k2, k3 = jax.random.split(key, 4)
    return {
        # conv weight laid out [k=dy*3+dx, cin, fg] so the kernel slices per tap
        "w_conv": 0.1 * jax.random.normal(k0, (9, cin, fg), jnp.float32),
        "b_conv": 0.01 * jax.random.normal(k1, (fg,), jnp.float32),
        # embedder weight laid out [sn*rn, fg, fe]: group axis kept contiguous
        "w_emb": 0.1 * jax.random.normal(k2, (sn * rn, fg, fe), jnp.float32),
        "b_emb": 0.01 * jax.random.normal(k3, (fe,), jnp.float32),
    }


def extractor_wrapper(params, imgs, pts_list, grid_list=None):
    """imgs: [sn, rn, b, 3, H, W], pts_list: [sn, rn, b, n, 2].
    Returns sampled group features in the [sn*rn*b, n, fg] layout (and, if
    grid_list is given, the negative-grid features [sn*rn*b, hn*wn, fg])."""
    # TODO(synk): the real VanillaLightCNN / VanillaCNN definition was not
    # provided; a deterministic single 3x3 conv + ReLU extractor is used.
    sn, rn, b, C, H, W = imgs.shape
    Bp = sn * rn * b
    Wp = W + 2
    Fg = params["w_conv"].shape[2]

    # NCHW -> padded, flattened NHWC.  Pad (top=1, bottom=2, left=1, right=1):
    # the extra bottom row keeps every shifted flat window of length H*(W+2)
    # in bounds inside the kernel.
    x = imgs.reshape(Bp, C, H, W)
    xp = jnp.pad(x, ((0, 0), (0, 0), (1, 2), (1, 1)))
    Pimg = (H + 3) * Wp
    img_flat = xp.transpose(0, 2, 3, 1).reshape(Bp, Pimg, C).astype(jnp.bfloat16)

    n = pts_list.shape[3]
    pts = pts_list.reshape(Bp, n, 2)
    if grid_list is not None:
        hn, wn = grid_list.shape[3], grid_list.shape[4]
        gpts = grid_list.reshape(Bp, hn * wn, 2)
        all_pts = jnp.concatenate([pts, gpts], axis=1)
    else:
        all_pts = pts
    n_pts = all_pts.shape[1]

    # pool_num = img_w // feats_w == 1 (placeholder extractor preserves the
    # spatial size); the gather indices use the padded row pitch W+2.
    idx, wts = _bilinear_gather_coeffs(all_pts, H, W, pitch=Wp, pool_num=1)

    P = H * Wp
    out = pl.pallas_call(
        functools.partial(_extract_kernel, H=H, W=W, n_pts=n_pts),
        grid_spec=pltpu.PrefetchScalarGridSpec(
            num_scalar_prefetch=2,
            grid=(Bp,),
            in_specs=[
                pl.BlockSpec((1, Pimg, C), lambda i, idx_r, wts_r: (i, 0, 0)),
                pl.BlockSpec((9, C, Fg), lambda i, idx_r, wts_r: (0, 0, 0)),
                pl.BlockSpec((1, Fg), lambda i, idx_r, wts_r: (0, 0)),
            ],
            out_specs=pl.BlockSpec((1, n_pts, Fg),
                                   lambda i, idx_r, wts_r: (i, 0, 0)),
            scratch_shapes=[
                pltpu.VMEM((Pimg, C), jnp.float32),   # f32 working copy of image
                pltpu.VMEM((P, Fg), jnp.float32),     # conv feature map (padded pitch)
            ],
        ),
        out_shape=jax.ShapeDtypeStruct((Bp, n_pts, Fg), jnp.float32),
        compiler_params=pltpu.CompilerParams(dimension_semantics=("parallel",)),
    )(idx, wts, img_flat, params["w_conv"], params["b_conv"].reshape(1, Fg))

    if grid_list is None:
        return out                                   # [Bp, n, Fg]
    return out[:, :n, :], out[:, n:, :]              # [Bp, n, Fg], [Bp, hn*wn, Fg]


def embed_and_distance(params, pfeats0, pfeats1, sn, rn, b, n):
    """Fused embedder + positive L2 distance (one Pallas kernel, no HBM round
    trip for the embeddings)."""
    # TODO(synk): the real BilinearGCNN definition was not provided; a
    # deterministic linear embedding over the (sn*rn, fg) group feature is used.
    srn = sn * rn
    Fg = pfeats0.shape[-1]
    Fe = params["w_emb"].shape[-1]
    x0 = pfeats0.reshape(srn, b * n, Fg)   # pure leading-dim reshape, no relayout
    x1 = pfeats1.reshape(srn, b * n, Fg)
    dis = pl.pallas_call(
        _embed_dist_kernel,
        out_shape=jax.ShapeDtypeStruct((b * n, 1), jnp.float32),
    )(x0, x1, params["w_emb"], params["b_emb"].reshape(1, Fe))
    return dis.reshape(b, n)


def train_wrapper_forward(params, cfg, img_list0, pts_list0, pts0, grid_list0,
                          img_list1, pts_list1, pts1, grid_list1,
                          scale_offset, rotate_offset, hem_thresh,
                          loss_type="gfeats"):
    sn, rn = cfg["sample_scale_num"], cfg["sample_rotate_num"]
    sn_, rn_, b, _, H, W = img_list0.shape
    assert sn_ == sn and rn_ == rn
    n = pts_list0.shape[3]

    # Extractor + grid_sample interpolation, fused per image.
    gfeats0 = extractor_wrapper(params, img_list0, pts_list0)
    gfeats1, gfeats_neg = extractor_wrapper(params, img_list1, pts_list1, grid_list1)

    # Shape bookkeeping for parity with the reference forward; gfeats_neg is
    # kept in its [sn*rn*b, hn*wn, fg] layout (no size-2-trailing-dim
    # transpose) and is not used by the returned results.
    hn, wn = grid_list1.shape[3], grid_list1.shape[4]
    fg = gfeats_neg.shape[-1]
    del hn, wn, fg

    # computed for parity with the reference forward; unused in results
    pts_shem_gt = pts1 / cfg["hem_interval"]
    hem_thresh = hem_thresh / cfg["hem_interval"]
    del pts_shem_gt, hem_thresh

    # Embedder + positive distance, fused in one kernel.
    dis_pos = embed_and_distance(params, gfeats0, gfeats1, sn, rn, b, n)
    return {"triplet_loss": dis_pos, "dis_pos": dis_pos}


# ----------------------------------------------------------------------------
if __name__ == "__main__":
    cfg = dict(
        extractor="VanillaLightCNN", embedder="BilinearGCNN",
        sample_scale_num=2, sample_rotate_num=2,
        loss_margin=1.0, hem_interval=8,
        train_embedder=True, train_extractor=True,
    )
    sn, rn = cfg["sample_scale_num"], cfg["sample_rotate_num"]
    b, C, H, W = 2, 3, 16, 16
    n, hn, wn = 8, 4, 4

    key = jax.random.PRNGKey(0)
    keys = jax.random.split(key, 10)
    params = make_params(jax.random.PRNGKey(42), cin=C, fg=16, sn=sn, rn=rn, fe=32)

    img_list0 = jax.random.uniform(keys[0], (sn, rn, b, C, H, W), jnp.float32)
    img_list1 = jax.random.uniform(keys[1], (sn, rn, b, C, H, W), jnp.float32)
    pts_list0 = jax.random.uniform(keys[2], (sn, rn, b, n, 2), jnp.float32) * (W - 1)
    pts_list1 = jax.random.uniform(keys[3], (sn, rn, b, n, 2), jnp.float32) * (W - 1)
    pts0 = jax.random.uniform(keys[4], (b, n, 2), jnp.float32) * (W - 1)
    pts1 = jax.random.uniform(keys[5], (b, n, 2), jnp.float32) * (W - 1)
    grid_list0 = jax.random.uniform(keys[6], (sn, rn, b, hn, wn, 2), jnp.float32) * (W - 1)
    grid_list1 = jax.random.uniform(keys[7], (sn, rn, b, hn, wn, 2), jnp.float32) * (W - 1)
    scale_offset = jax.random.uniform(keys[8], (b, n), jnp.float32)
    rotate_offset = jax.random.uniform(keys[9], (b, n), jnp.float32)
    hem_thresh = 16.0

    results = train_wrapper_forward(
        params, cfg, img_list0, pts_list0, pts0, grid_list0,
        img_list1, pts_list1, pts1, grid_list1,
        scale_offset, rotate_offset, hem_thresh, loss_type="gfeats")

    dis_pos = jax.block_until_ready(results["dis_pos"])
    assert dis_pos.shape == (b, n)
    assert results["triplet_loss"].shape == (b, n)
    assert bool(jnp.all(jnp.isfinite(dis_pos)))
    print("KERNEL_OK")
</pallas_src>

<mosaic_0001>
module attributes {stable_mosaic.version = 11 : i64} {
  func.func @_extract_kernel(%arg0: i32, %arg1: memref<8x32xi32, #tpu.memory_space<smem>>, %arg2: memref<8x32xf32, #tpu.memory_space<smem>>, %arg3: memref<1x342x3xbf16, #tpu.memory_space<vmem>>, %arg4: memref<9x3x16xf32, #tpu.memory_space<vmem>>, %arg5: memref<1x16xf32, #tpu.memory_space<vmem>>, %arg6: memref<1x8x16xf32, #tpu.memory_space<vmem>>, %arg7: memref<342x3xf32, #tpu.memory_space<vmem>>, %arg8: memref<288x16xf32, #tpu.memory_space<vmem>>) attributes {dimension_semantics = [#tpu.dimension_semantics<parallel>], iteration_bounds = array<i64: 8>, scalar_prefetch = 2 : i64, scratch_operands = 2 : i64, tpu.core_type = #tpu.core_type<tc>, window_params = [{transform_indices = @transform_0, window_bounds = array<i64: 1, 342, 3>}, {pipeline_mode = #tpu.pipeline_mode<synchronous>, transform_indices = @transform_1, window_bounds = array<i64: 9, 3, 16>}, {pipeline_mode = #tpu.pipeline_mode<synchronous>, transform_indices = @transform_2, window_bounds = array<i64: 1, 16>}, {transform_indices = @transform_3, window_bounds = array<i64: 1, 8, 16>}]} {
    %c0 = arith.constant 0 : index
    %c0_0 = arith.constant 0 : index
    %c0_1 = arith.constant 0 : index
    %0 = vector.load %arg3[%c0, %c0_0, %c0_1] : memref<1x342x3xbf16, #tpu.memory_space<vmem>>, vector<1x342x3xbf16>
    %1 = vector.shape_cast %0 : vector<1x342x3xbf16> to vector<342x3xbf16>
    %2 = arith.extf %1 : vector<342x3xbf16> to vector<342x3xf32>
    %c0_2 = arith.constant 0 : index
    %c0_3 = arith.constant 0 : index
    %3 = vector.load %arg7[%c0_2, %c0_3] : memref<342x3xf32, #tpu.memory_space<vmem>>, vector<342x3xf32>
    tpu.vector_store %arg7[%c0_2, %c0_3], %2 {strides = array<i32>} : memref<342x3xf32, #tpu.memory_space<vmem>>, vector<342x3xf32>,
    %cst = arith.constant 0.000000e+00 : f32
    %4 = vector.broadcast %cst : f32 to vector<288x16xf32>
    %c0_4 = arith.constant 0 : index
    %c0_5 = arith.constant 0 : index
    %5 = vector.load %arg7[%c0_4, %c0_5] : memref<342x3xf32, #tpu.memory_space<vmem>>, vector<288x3xf32>
    %c0_6 = arith.constant 0 : index
    %c0_7 = arith.constant 0 : index
    %c0_8 = arith.constant 0 : index
    %6 = vector.load %arg4[%c0_6, %c0_7, %c0_8] : memref<9x3x16xf32, #tpu.memory_space<vmem>>, vector<1x3x16xf32>
    %7 = vector.shape_cast %6 : vector<1x3x16xf32> to vector<3x16xf32>
    %cst_9 = arith.constant dense<0.000000e+00> : vector<288x16xf32>
    %8 = tpu.matmul %5, %7, %cst_9 {dimension_numbers = #tpu.dot_dimension_numbers<[1], [0], [0], [1], [0, 0, 1, 1], [], []>} : vector<288x3xf32>, vector<3x16xf32>, vector<288x16xf32> -> vector<288x16xf32>
    %9 = arith.addf %4, %8 : vector<288x16xf32>
    %c1 = arith.constant 1 : index
    %c0_10 = arith.constant 0 : index
    %10 = vector.load %arg7[%c1, %c0_10] : memref<342x3xf32, #tpu.memory_space<vmem>>, vector<288x3xf32>
    %c1_11 = arith.constant 1 : index
    %c0_12 = arith.constant 0 : index
    %c0_13 = arith.constant 0 : index
    %11 = vector.load %arg4[%c1_11, %c0_12, %c0_13] : memref<9x3x16xf32, #tpu.memory_space<vmem>>, vector<1x3x16xf32>
    %12 = vector.shape_cast %11 : vector<1x3x16xf32> to vector<3x16xf32>
    %cst_14 = arith.constant dense<0.000000e+00> : vector<288x16xf32>
    %13 = tpu.matmul %10, %12, %cst_14 {dimension_numbers = #tpu.dot_dimension_numbers<[1], [0], [0], [1], [0, 0, 1, 1], [], []>} : vector<288x3xf32>, vector<3x16xf32>, vector<288x16xf32> -> vector<288x16xf32>
    %14 = arith.addf %9, %13 : vector<288x16xf32>
    %c2 = arith.constant 2 : index
    %c0_15 = arith.constant 0 : index
    %15 = vector.load %arg7[%c2, %c0_15] : memref<342x3xf32, #tpu.memory_space<vmem>>, vector<288x3xf32>
    %c2_16 = arith.constant 2 : index
    %c0_17 = arith.constant 0 : index
    %c0_18 = arith.constant 0 : index
    %16 = vector.load %arg4[%c2_16, %c0_17, %c0_18] : memref<9x3x16xf32, #tpu.memory_space<vmem>>, vector<1x3x16xf32>
    %17 = vector.shape_cast %16 : vector<1x3x16xf32> to vector<3x16xf32>
    %cst_19 = arith.constant dense<0.000000e+00> : vector<288x16xf32>
    %18 = tpu.matmul %15, %17, %cst_19 {dimension_numbers = #tpu.dot_dimension_numbers<[1], [0], [0], [1], [0, 0, 1, 1], [], []>} : vector<288x3xf32>, vector<3x16xf32>, vector<288x16xf32> -> vector<288x16xf32>
    %19 = arith.addf %14, %18 : vector<288x16xf32>
    %c18 = arith.constant 18 : index
    %c0_20 = arith.constant 0 : index
    %20 = vector.load %arg7[%c18, %c0_20] : memref<342x3xf32, #tpu.memory_space<vmem>>, vector<288x3xf32>
    %c3 = arith.constant 3 : index
    %c0_21 = arith.constant 0 : index
    %c0_22 = arith.constant 0 : index
    %21 = vector.load %arg4[%c3, %c0_21, %c0_22] : memref<9x3x16xf32, #tpu.memory_space<vmem>>, vector<1x3x16xf32>
    %22 = vector.shape_cast %21 : vector<1x3x16xf32> to vector<3x16xf32>
    %cst_23 = arith.constant dense<0.000000e+00> : vector<288x16xf32>
    %23 = tpu.matmul %20, %22, %cst_23 {dimension_numbers = #tpu.dot_dimension_numbers<[1], [0], [0], [1], [0, 0, 1, 1], [], []>} : vector<288x3xf32>, vector<3x16xf32>, vector<288x16xf32> -> vector<288x16xf32>
    %24 = arith.addf %19, %23 : vector<288x16xf32>
    %c19 = arith.constant 19 : index
    %c0_24 = arith.constant 0 : index
    %25 = vector.load %arg7[%c19, %c0_24] : memref<342x3xf32, #tpu.memory_space<vmem>>, vector<288x3xf32>
    %c4 = arith.constant 4 : index
    %c0_25 = arith.constant 0 : index
    %c0_26 = arith.constant 0 : index
    %26 = vector.load %arg4[%c4, %c0_25, %c0_26] : memref<9x3x16xf32, #tpu.memory_space<vmem>>, vector<1x3x16xf32>
    %27 = vector.shape_cast %26 : vector<1x3x16xf32> to vector<3x16xf32>
    %cst_27 = arith.constant dense<0.000000e+00> : vector<288x16xf32>
    %28 = tpu.matmul %25, %27, %cst_27 {dimension_numbers = #tpu.dot_dimension_numbers<[1], [0], [0], [1], [0, 0, 1, 1], [], []>} : vector<288x3xf32>, vector<3x16xf32>, vector<288x16xf32> -> vector<288x16xf32>
    %29 = arith.addf %24, %28 : vector<288x16xf32>
    %c20 = arith.constant 20 : index
    %c0_28 = arith.constant 0 : index
    %30 = vector.load %arg7[%c20, %c0_28] : memref<342x3xf32, #tpu.memory_space<vmem>>, vector<288x3xf32>
    %c5 = arith.constant 5 : index
    %c0_29 = arith.constant 0 : index
    %c0_30 = arith.constant 0 : index
    %31 = vector.load %arg4[%c5, %c0_29, %c0_30] : memref<9x3x16xf32, #tpu.memory_space<vmem>>, vector<1x3x16xf32>
    %32 = vector.shape_cast %31 : vector<1x3x16xf32> to vector<3x16xf32>
    %cst_31 = arith.constant dense<0.000000e+00> : vector<288x16xf32>
    %33 = tpu.matmul %30, %32, %cst_31 {dimension_numbers = #tpu.dot_dimension_numbers<[1], [0], [0], [1], [0, 0, 1, 1], [], []>} : vector<288x3xf32>, vector<3x16xf32>, vector<288x16xf32> -> vector<288x16xf32>
    %34 = arith.addf %29, %33 : vector<288x16xf32>
    %c36 = arith.constant 36 : index
    %c0_32 = arith.constant 0 : index
    %35 = vector.load %arg7[%c36, %c0_32] : memref<342x3xf32, #tpu.memory_space<vmem>>, vector<288x3xf32>
    %c6 = arith.constant 6 : index
    %c0_33 = arith.constant 0 : index
    %c0_34 = arith.constant 0 : index
    %36 = vector.load %arg4[%c6, %c0_33, %c0_34] : memref<9x3x16xf32, #tpu.memory_space<vmem>>, vector<1x3x16xf32>
    %37 = vector.shape_cast %36 : vector<1x3x16xf32> to vector<3x16xf32>
    %cst_35 = arith.constant dense<0.000000e+00> : vector<288x16xf32>
    %38 = tpu.matmul %35, %37, %cst_35 {dimension_numbers = #tpu.dot_dimension_numbers<[1], [0], [0], [1], [0, 0, 1, 1], [], []>} : vector<288x3xf32>, vector<3x16xf32>, vector<288x16xf32> -> vector<288x16xf32>
    %39 = arith.addf %34, %38 : vector<288x16xf32>
    %c37 = arith.constant 37 : index
    %c0_36 = arith.constant 0 : index
    %40 = vector.load %arg7[%c37, %c0_36] : memref<342x3xf32, #tpu.memory_space<vmem>>, vector<288x3xf32>
    %c7 = arith.constant 7 : index
    %c0_37 = arith.constant 0 : index
    %c0_38 = arith.constant 0 : index
    %41 = vector.load %arg4[%c7, %c0_37, %c0_38] : memref<9x3x16xf32, #tpu.memory_space<vmem>>, vector<1x3x16xf32>
    %42 = vector.shape_cast %41 : vector<1x3x16xf32> to vector<3x16xf32>
    %cst_39 = arith.constant dense<0.000000e+00> : vector<288x16xf32>
    %43 = tpu.matmul %40, %42, %cst_39 {dimension_numbers = #tpu.dot_dimension_numbers<[1], [0], [0], [1], [0, 0, 1, 1], [], []>} : vector<288x3xf32>, vector<3x16xf32>, vector<288x16xf32> -> vector<288x16xf32>
    %44 = arith.addf %39, %43 : vector<288x16xf32>
    %c38 = arith.constant 38 : index
    %c0_40 = arith.constant 0 : index
    %45 = vector.load %arg7[%c38, %c0_40] : memref<342x3xf32, #tpu.memory_space<vmem>>, vector<288x3xf32>
    %c8 = arith.constant 8 : index
    %c0_41 = arith.constant 0 : index
    %c0_42 = arith.constant 0 : index
    %46 = vector.load %arg4[%c8, %c0_41, %c0_42] : memref<9x3x16xf32, #tpu.memory_space<vmem>>, vector<1x3x16xf32>
    %47 = vector.shape_cast %46 : vector<1x3x16xf32> to vector<3x16xf32>
    %cst_43 = arith.constant dense<0.000000e+00> : vector<288x16xf32>
    %48 = tpu.matmul %45, %47, %cst_43 {dimension_numbers = #tpu.dot_dimension_numbers<[1], [0], [0], [1], [0, 0, 1, 1], [], []>} : vector<288x3xf32>, vector<3x16xf32>, vector<288x16xf32> -> vector<288x16xf32>
    %49 = arith.addf %44, %48 : vector<288x16xf32>
    %c0_44 = arith.constant 0 : index
    %c0_45 = arith.constant 0 : index
    %50 = vector.load %arg5[%c0_44, %c0_45] : memref<1x16xf32, #tpu.memory_space<vmem>>, vector<1x16xf32>
    %51 = vector.broadcast %50 : vector<1x16xf32> to vector<288x16xf32>
    %52 = arith.addf %49, %51 : vector<288x16xf32>
    %cst_46 = arith.constant 0.000000e+00 : f32
    %53 = vector.broadcast %cst_46 : f32 to vector<288x16xf32>
    %54 = arith.maximumf %52, %53 : vector<288x16xf32>
    %c0_47 = arith.constant 0 : index
    %c0_48 = arith.constant 0 : index
    %55 = vector.load %arg8[%c0_47, %c0_48] : memref<288x16xf32, #tpu.memory_space<vmem>>, vector<288x16xf32>
    tpu.vector_store %arg8[%c0_47, %c0_48], %54 {strides = array<i32>} : memref<288x16xf32, #tpu.memory_space<vmem>>, vector<288x16xf32>,
    %cst_49 = arith.constant 0.000000e+00 : f32
    %56 = vector.broadcast %cst_49 : f32 to vector<1x16xf32>
    %57 = arith.index_cast %arg0 : i32 to index
    %c0_50 = arith.constant 0 : index
    %58 = memref.load %arg1[%57, %c0_50] : memref<8x32xi32, #tpu.memory_space<smem>>
    %59 = arith.index_cast %arg0 : i32 to index
    %c0_51 = arith.constant 0 : index
    %60 = memref.load %arg2[%59, %c0_51] : memref<8x32xf32, #tpu.memory_space<smem>>
    %61 = arith.index_cast %58 : i32 to index
    %c0_52 = arith.constant 0 : index
    %62 = vector.load %arg8[%61, %c0_52] : memref<288x16xf32, #tpu.memory_space<vmem>>, vector<1x16xf32>
    %63 = vector.broadcast %60 : f32 to vector<1x16xf32>
    %64 = arith.mulf %63, %62 : vector<1x16xf32>
    %65 = arith.addf %56, %64 : vector<1x16xf32>
    %66 = arith.index_cast %arg0 : i32 to index
    %c1_53 = arith.constant 1 : index
    %67 = memref.load %arg1[%66, %c1_53] : memref<8x32xi32, #tpu.memory_space<smem>>
    %68 = arith.index_cast %arg0 : i32 to index
    %c1_54 = arith.constant 1 : index
    %69 = memref.load %arg2[%68, %c1_54] : memref<8x32xf32, #tpu.memory_space<smem>>
    %70 = arith.index_cast %67 : i32 to index
    %c0_55 = arith.constant 0 : index
    %71 = vector.load %arg8[%70, %c0_55] : memref<288x16xf32, #tpu.memory_space<vmem>>, vector<1x16xf32>
    %72 = vector.broadcast %69 : f32 to vector<1x16xf32>
    %73 = arith.mulf %72, %71 : vector<1x16xf32>
    %74 = arith.addf %65, %73 : vector<1x16xf32>
    %75 = arith.index_cast %arg0 : i32 to index
    %c2_56 = arith.constant 2 : index
    %76 = memref.load %arg1[%75, %c2_56] : memref<8x32xi32, #tpu.memory_space<smem>>
    %77 = arith.index_cast %arg0 : i32 to index
    %c2_57 = arith.constant 2 : index
    %78 = memref.load %arg2[%77, %c2_57] : memref<8x32xf32, #tpu.memory_space<smem>>
    %79 = arith.index_cast %76 : i32 to index
    %c0_58 = arith.constant 0 : index
    %80 = vector.load %arg8[%79, %c0_58] : memref<288x16xf32, #tpu.memory_space<vmem>>, vector<1x16xf32>
    %81 = vector.broadcast %78 : f32 to vector<1x16xf32>
    %82 = arith.mulf %81, %80 : vector<1x16xf32>
    %83 = arith.addf %74, %82 : vector<1x16xf32>
    %84 = arith.index_cast %arg0 : i32 to index
    %c3_59 = arith.constant 3 : index
    %85 = memref.load %arg1[%84, %c3_59] : memref<8x32xi32, #tpu.memory_space<smem>>
    %86 = arith.index_cast %arg0 : i32 to index
    %c3_60 = arith.constant 3 : index
    %87 = memref.load %arg2[%86, %c3_60] : memref<8x32xf32, #tpu.memory_space<smem>>
    %88 = arith.index_cast %85 : i32 to index
    %c0_61 = arith.constant 0 : index
    %89 = vector.load %arg8[%88, %c0_61] : memref<288x16xf32, #tpu.memory_space<vmem>>, vector<1x16xf32>
    %90 = vector.broadcast %87 : f32 to vector<1x16xf32>
    %91 = arith.mulf %90, %89 : vector<1x16xf32>
    %92 = arith.addf %83, %91 : vector<1x16xf32>
    %cst_62 = arith.constant 0.000000e+00 : f32
    %93 = vector.broadcast %cst_62 : f32 to vector<1x16xf32>
    %94 = arith.index_cast %arg0 : i32 to index
    %c4_63 = arith.constant 4 : index
    %95 = memref.load %arg1[%94, %c4_63] : memref<8x32xi32, #tpu.memory_space<smem>>
    %96 = arith.index_cast %arg0 : i32 to index
    %c4_64 = arith.constant 4 : index
    %97 = memref.load %arg2[%96, %c4_64] : memref<8x32xf32, #tpu.memory_space<smem>>
    %98 = arith.index_cast %95 : i32 to index
    %c0_65 = arith.constant 0 : index
    %99 = vector.load %arg8[%98, %c0_65] : memref<288x16xf32, #tpu.memory_space<vmem>>, vector<1x16xf32>
    %100 = vector.broadcast %97 : f32 to vector<1x16xf32>
    %101 = arith.mulf %100, %99 : vector<1x16xf32>
    %102 = arith.addf %93, %101 : vector<1x16xf32>
    %103 = arith.index_cast %arg0 : i32 to index
    %c5_66 = arith.constant 5 : index
    %104 = memref.load %arg1[%103, %c5_66] : memref<8x32xi32, #tpu.memory_space<smem>>
    %105 = arith.index_cast %arg0 : i32 to index
    %c5_67 = arith.constant 5 : index
    %106 = memref.load %arg2[%105, %c5_67] : memref<8x32xf32, #tpu.memory_space<smem>>
    %107 = arith.index_cast %104 : i32 to index
    %c0_68 = arith.constant 0 : index
    %108 = vector.load %arg8[%107, %c0_68] : memref<288x16xf32, #tpu.memory_space<vmem>>, vector<1x16xf32>
    %109 = vector.broadcast %106 : f32 to vector<1x16xf32>
    %110 = arith.mulf %109, %108 : vector<1x16xf32>
    %111 = arith.addf %102, %110 : vector<1x16xf32>
    %112 = arith.index_cast %arg0 : i32 to index
    %c6_69 = arith.constant 6 : index
    %113 = memref.load %arg1[%112, %c6_69] : memref<8x32xi32, #tpu.memory_space<smem>>
    %114 = arith.index_cast %arg0 : i32 to index
    %c6_70 = arith.constant 6 : index
    %115 = memref.load %arg2[%114, %c6_70] : memref<8x32xf32, #tpu.memory_space<smem>>
    %116 = arith.index_cast %113 : i32 to index
    %c0_71 = arith.constant 0 : index
    %117 = vector.load %arg8[%116, %c0_71] : memref<288x16xf32, #tpu.memory_space<vmem>>, vector<1x16xf32>
    %118 = vector.broadcast %115 : f32 to vector<1x16xf32>
    %119 = arith.mulf %118, %117 : vector<1x16xf32>
    %120 = arith.addf %111, %119 : vector<1x16xf32>
    %121 = arith.index_cast %arg0 : i32 to index
    %c7_72 = arith.constant 7 : index
    %122 = memref.load %arg1[%121, %c7_72] : memref<8x32xi32, #tpu.memory_space<smem>>
    %123 = arith.index_cast %arg0 : i32 to index
    %c7_73 = arith.constant 7 : index
    %124 = memref.load %arg2[%123, %c7_73] : memref<8x32xf32, #tpu.memory_space<smem>>
    %125 = arith.index_cast %122 : i32 to index
    %c0_74 = arith.constant 0 : index
    %126 = vector.load %arg8[%125, %c0_74] : memref<288x16xf32, #tpu.memory_space<vmem>>, vector<1x16xf32>
    %127 = vector.broadcast %124 : f32 to vector<1x16xf32>
    %128 = arith.mulf %127, %126 : vector<1x16xf32>
    %129 = arith.addf %120, %128 : vector<1x16xf32>
    %cst_75 = arith.constant 0.000000e+00 : f32
    %130 = vector.broadcast %cst_75 : f32 to vector<1x16xf32>
    %131 = arith.index_cast %arg0 : i32 to index
    %c8_76 = arith.constant 8 : index
    %132 = memref.load %arg1[%131, %c8_76] : memref<8x32xi32, #tpu.memory_space<smem>>
    %133 = arith.index_cast %arg0 : i32 to index
    %c8_77 = arith.constant 8 : index
    %134 = memref.load %arg2[%133, %c8_77] : memref<8x32xf32, #tpu.memory_space<smem>>
    %135 = arith.index_cast %132 : i32 to index
    %c0_78 = arith.constant 0 : index
    %136 = vector.load %arg8[%135, %c0_78] : memref<288x16xf32, #tpu.memory_space<vmem>>, vector<1x16xf32>
    %137 = vector.broadcast %134 : f32 to vector<1x16xf32>
    %138 = arith.mulf %137, %136 : vector<1x16xf32>
    %139 = arith.addf %130, %138 : vector<1x16xf32>
    %140 = arith.index_cast %arg0 : i32 to index
    %c9 = arith.constant 9 : index
    %141 = memref.load %arg1[%140, %c9] : memref<8x32xi32, #tpu.memory_space<smem>>
    %142 = arith.index_cast %arg0 : i32 to index
    %c9_79 = arith.constant 9 : index
    %143 = memref.load %arg2[%142, %c9_79] : memref<8x32xf32, #tpu.memory_space<smem>>
    %144 = arith.index_cast %141 : i32 to index
    %c0_80 = arith.constant 0 : index
    %145 = vector.load %arg8[%144, %c0_80] : memref<288x16xf32, #tpu.memory_space<vmem>>, vector<1x16xf32>
    %146 = vector.broadcast %143 : f32 to vector<1x16xf32>
    %147 = arith.mulf %146, %145 : vector<1x16xf32>
    %148 = arith.addf %139, %147 : vector<1x16xf32>
    %149 = arith.index_cast %arg0 : i32 to index
    %c10 = arith.constant 10 : index
    %150 = memref.load %arg1[%149, %c10] : memref<8x32xi32, #tpu.memory_space<smem>>
    %151 = arith.index_cast %arg0 : i32 to index
    %c10_81 = arith.constant 10 : index
    %152 = memref.load %arg2[%151, %c10_81] : memref<8x32xf32, #tpu.memory_space<smem>>
    %153 = arith.index_cast %150 : i32 to index
    %c0_82 = arith.constant 0 : index
    %154 = vector.load %arg8[%153, %c0_82] : memref<288x16xf32, #tpu.memory_space<vmem>>, vector<1x16xf32>
    %155 = vector.broadcast %152 : f32 to vector<1x16xf32>
    %156 = arith.mulf %155, %154 : vector<1x16xf32>
    %157 = arith.addf %148, %156 : vector<1x16xf32>
    %158 = arith.index_cast %arg0 : i32 to index
    %c11 = arith.constant 11 : index
    %159 = memref.load %arg1[%158, %c11] : memref<8x32xi32, #tpu.memory_space<smem>>
    %160 = arith.index_cast %arg0 : i32 to index
    %c11_83 = arith.constant 11 : index
    %161 = memref.load %arg2[%160, %c11_83] : memref<8x32xf32, #tpu.memory_space<smem>>
    %162 = arith.index_cast %159 : i32 to index
    %c0_84 = arith.constant 0 : index
    %163 = vector.load %arg8[%162, %c0_84] : memref<288x16xf32, #tpu.memory_space<vmem>>, vector<1x16xf32>
    %164 = vector.broadcast %161 : f32 to vector<1x16xf32>
    %165 = arith.mulf %164, %163 : vector<1x16xf32>
    %166 = arith.addf %157, %165 : vector<1x16xf32>
    %cst_85 = arith.constant 0.000000e+00 : f32
    %167 = vector.broadcast %cst_85 : f32 to vector<1x16xf32>
    %168 = arith.index_cast %arg0 : i32 to index
    %c12 = arith.constant 12 : index
    %169 = memref.load %arg1[%168, %c12] : memref<8x32xi32, #tpu.memory_space<smem>>
    %170 = arith.index_cast %arg0 : i32 to index
    %c12_86 = arith.constant 12 : index
    %171 = memref.load %arg2[%170, %c12_86] : memref<8x32xf32, #tpu.memory_space<smem>>
    %172 = arith.index_cast %169 : i32 to index
    %c0_87 = arith.constant 0 : index
    %173 = vector.load %arg8[%172, %c0_87] : memref<288x16xf32, #tpu.memory_space<vmem>>, vector<1x16xf32>
    %174 = vector.broadcast %171 : f32 to vector<1x16xf32>
    %175 = arith.mulf %174, %173 : vector<1x16xf32>
    %176 = arith.addf %167, %175 : vector<1x16xf32>
    %177 = arith.index_cast %arg0 : i32 to index
    %c13 = arith.constant 13 : index
    %178 = memref.load %arg1[%177, %c13] : memref<8x32xi32, #tpu.memory_space<smem>>
    %179 = arith.index_cast %arg0 : i32 to index
    %c13_88 = arith.constant 13 : index
    %180 = memref.load %arg2[%179, %c13_88] : memref<8x32xf32, #tpu.memory_space<smem>>
    %181 = arith.index_cast %178 : i32 to index
    %c0_89 = arith.constant 0 : index
    %182 = vector.load %arg8[%181, %c0_89] : memref<288x16xf32, #tpu.memory_space<vmem>>, vector<1x16xf32>
    %183 = vector.broadcast %180 : f32 to vector<1x16xf32>
    %184 = arith.mulf %183, %182 : vector<1x16xf32>
    %185 = arith.addf %176, %184 : vector<1x16xf32>
    %186 = arith.index_cast %arg0 : i32 to index
    %c14 = arith.constant 14 : index
    %187 = memref.load %arg1[%186, %c14] : memref<8x32xi32, #tpu.memory_space<smem>>
    %188 = arith.index_cast %arg0 : i32 to index
    %c14_90 = arith.constant 14 : index
    %189 = memref.load %arg2[%188, %c14_90] : memref<8x32xf32, #tpu.memory_space<smem>>
    %190 = arith.index_cast %187 : i32 to index
    %c0_91 = arith.constant 0 : index
    %191 = vector.load %arg8[%190, %c0_91] : memref<288x16xf32, #tpu.memory_space<vmem>>, vector<1x16xf32>
    %192 = vector.broadcast %189 : f32 to vector<1x16xf32>
    %193 = arith.mulf %192, %191 : vector<1x16xf32>
    %194 = arith.addf %185, %193 : vector<1x16xf32>
    %195 = arith.index_cast %arg0 : i32 to index
    %c15 = arith.constant 15 : index
    %196 = memref.load %arg1[%195, %c15] : memref<8x32xi32, #tpu.memory_space<smem>>
    %197 = arith.index_cast %arg0 : i32 to index
    %c15_92 = arith.constant 15 : index
    %198 = memref.load %arg2[%197, %c15_92] : memref<8x32xf32, #tpu.memory_space<smem>>
    %199 = arith.index_cast %196 : i32 to index
    %c0_93 = arith.constant 0 : index
    %200 = vector.load %arg8[%199, %c0_93] : memref<288x16xf32, #tpu.memory_space<vmem>>, vector<1x16xf32>
    %201 = vector.broadcast %198 : f32 to vector<1x16xf32>
    %202 = arith.mulf %201, %200 : vector<1x16xf32>
    %203 = arith.addf %194, %202 : vector<1x16xf32>
    %cst_94 = arith.constant 0.000000e+00 : f32
    %204 = vector.broadcast %cst_94 : f32 to vector<1x16xf32>
    %205 = arith.index_cast %arg0 : i32 to index
    %c16 = arith.constant 16 : index
    %206 = memref.load %arg1[%205, %c16] : memref<8x32xi32, #tpu.memory_space<smem>>
    %207 = arith.index_cast %arg0 : i32 to index
    %c16_95 = arith.constant 16 : index
    %208 = memref.load %arg2[%207, %c16_95] : memref<8x32xf32, #tpu.memory_space<smem>>
    %209 = arith.index_cast %206 : i32 to index
    %c0_96 = arith.constant 0 : index
    %210 = vector.load %arg8[%209, %c0_96] : memref<288x16xf32, #tpu.memory_space<vmem>>, vector<1x16xf32>
    %211 = vector.broadcast %208 : f32 to vector<1x16xf32>
    %212 = arith.mulf %211, %210 : vector<1x16xf32>
    %213 = arith.addf %204, %212 : vector<1x16xf32>
    %214 = arith.index_cast %arg0 : i32 to index
    %c17 = arith.constant 17 : index
    %215 = memref.load %arg1[%214, %c17] : memref<8x32xi32, #tpu.memory_space<smem>>
    %216 = arith.index_cast %arg0 : i32 to index
    %c17_97 = arith.constant 17 : index
    %217 = memref.load %arg2[%216, %c17_97] : memref<8x32xf32, #tpu.memory_space<smem>>
    %218 = arith.index_cast %215 : i32 to index
    %c0_98 = arith.constant 0 : index
    %219 = vector.load %arg8[%218, %c0_98] : memref<288x16xf32, #tpu.memory_space<vmem>>, vector<1x16xf32>
    %220 = vector.broadcast %217 : f32 to vector<1x16xf32>
    %221 = arith.mulf %220, %219 : vector<1x16xf32>
    %222 = arith.addf %213, %221 : vector<1x16xf32>
    %223 = arith.index_cast %arg0 : i32 to index
    %c18_99 = arith.constant 18 : index
    %224 = memref.load %arg1[%223, %c18_99] : memref<8x32xi32, #tpu.memory_space<smem>>
    %225 = arith.index_cast %arg0 : i32 to index
    %c18_100 = arith.constant 18 : index
    %226 = memref.load %arg2[%225, %c18_100] : memref<8x32xf32, #tpu.memory_space<smem>>
    %227 = arith.index_cast %224 : i32 to index
    %c0_101 = arith.constant 0 : index
    %228 = vector.load %arg8[%227, %c0_101] : memref<288x16xf32, #tpu.memory_space<vmem>>, vector<1x16xf32>
    %229 = vector.broadcast %226 : f32 to vector<1x16xf32>
    %230 = arith.mulf %229, %228 : vector<1x16xf32>
    %231 = arith.addf %222, %230 : vector<1x16xf32>
    %232 = arith.index_cast %arg0 : i32 to index
    %c19_102 = arith.constant 19 : index
    %233 = memref.load %arg1[%232, %c19_102] : memref<8x32xi32, #tpu.memory_space<smem>>
    %234 = arith.index_cast %arg0 : i32 to index
    %c19_103 = arith.constant 19 : index
    %235 = memref.load %arg2[%234, %c19_103] : memref<8x32xf32, #tpu.memory_space<smem>>
    %236 = arith.index_cast %233 : i32 to index
    %c0_104 = arith.constant 0 : index
    %237 = vector.load %arg8[%236, %c0_104] : memref<288x16xf32, #tpu.memory_space<vmem>>, vector<1x16xf32>
    %238 = vector.broadcast %235 : f32 to vector<1x16xf32>
    %239 = arith.mulf %238, %237 : vector<1x16xf32>
    %240 = arith.addf %231, %239 : vector<1x16xf32>
    %cst_105 = arith.constant 0.000000e+00 : f32
    %241 = vector.broadcast %cst_105 : f32 to vector<1x16xf32>
    %242 = arith.index_cast %arg0 : i32 to index
    %c20_106 = arith.constant 20 : index
    %243 = memref.load %arg1[%242, %c20_106] : memref<8x32xi32, #tpu.memory_space<smem>>
    %244 = arith.index_cast %arg0 : i32 to index
    %c20_107 = arith.constant 20 : index
    %245 = memref.load %arg2[%244, %c20_107] : memref<8x32xf32, #tpu.memory_space<smem>>
    %246 = arith.index_cast %243 : i32 to index
    %c0_108 = arith.constant 0 : index
    %247 = vector.load %arg8[%246, %c0_108] : memref<288x16xf32, #tpu.memory_space<vmem>>, vector<1x16xf32>
    %248 = vector.broadcast %245 : f32 to vector<1x16xf32>
    %249 = arith.mulf %248, %247 : vector<1x16xf32>
    %250 = arith.addf %241, %249 : vector<1x16xf32>
    %251 = arith.index_cast %arg0 : i32 to index
    %c21 = arith.constant 21 : index
    %252 = memref.load %arg1[%251, %c21] : memref<8x32xi32, #tpu.memory_space<smem>>
    %253 = arith.index_cast %arg0 : i32 to index
    %c21_109 = arith.constant 21 : index
    %254 = memref.load %arg2[%253, %c21_109] : memref<8x32xf32, #tpu.memory_space<smem>>
    %255 = arith.index_cast %252 : i32 to index
    %c0_110 = arith.constant 0 : index
    %256 = vector.load %arg8[%255, %c0_110] : memref<288x16xf32, #tpu.memory_space<vmem>>, vector<1x16xf32>
    %257 = vector.broadcast %254 : f32 to vector<1x16xf32>
    %258 = arith.mulf %257, %256 : vector<1x16xf32>
    %259 = arith.addf %250, %258 : vector<1x16xf32>
    %260 = arith.index_cast %arg0 : i32 to index
    %c22 = arith.constant 22 : index
    %261 = memref.load %arg1[%260, %c22] : memref<8x32xi32, #tpu.memory_space<smem>>
    %262 = arith.index_cast %arg0 : i32 to index
    %c22_111 = arith.constant 22 : index
    %263 = memref.load %arg2[%262, %c22_111] : memref<8x32xf32, #tpu.memory_space<smem>>
    %264 = arith.index_cast %261 : i32 to index
    %c0_112 = arith.constant 0 : index
    %265 = vector.load %arg8[%264, %c0_112] : memref<288x16xf32, #tpu.memory_space<vmem>>, vector<1x16xf32>
    %266 = vector.broadcast %263 : f32 to vector<1x16xf32>
    %267 = arith.mulf %266, %265 : vector<1x16xf32>
    %268 = arith.addf %259, %267 : vector<1x16xf32>
    %269 = arith.index_cast %arg0 : i32 to index
    %c23 = arith.constant 23 : index
    %270 = memref.load %arg1[%269, %c23] : memref<8x32xi32, #tpu.memory_space<smem>>
    %271 = arith.index_cast %arg0 : i32 to index
    %c23_113 = arith.constant 23 : index
    %272 = memref.load %arg2[%271, %c23_113] : memref<8x32xf32, #tpu.memory_space<smem>>
    %273 = arith.index_cast %270 : i32 to index
    %c0_114 = arith.constant 0 : index
    %274 = vector.load %arg8[%273, %c0_114] : memref<288x16xf32, #tpu.memory_space<vmem>>, vector<1x16xf32>
    %275 = vector.broadcast %272 : f32 to vector<1x16xf32>
    %276 = arith.mulf %275, %274 : vector<1x16xf32>
    %277 = arith.addf %268, %276 : vector<1x16xf32>
    %cst_115 = arith.constant 0.000000e+00 : f32
    %278 = vector.broadcast %cst_115 : f32 to vector<1x16xf32>
    %279 = arith.index_cast %arg0 : i32 to index
    %c24 = arith.constant 24 : index
    %280 = memref.load %arg1[%279, %c24] : memref<8x32xi32, #tpu.memory_space<smem>>
    %281 = arith.index_cast %arg0 : i32 to index
    %c24_116 = arith.constant 24 : index
    %282 = memref.load %arg2[%281, %c24_116] : memref<8x32xf32, #tpu.memory_space<smem>>
    %283 = arith.index_cast %280 : i32 to index
    %c0_117 = arith.constant 0 : index
    %284 = vector.load %arg8[%283, %c0_117] : memref<288x16xf32, #tpu.memory_space<vmem>>, vector<1x16xf32>
    %285 = vector.broadcast %282 : f32 to vector<1x16xf32>
    %286 = arith.mulf %285, %284 : vector<1x16xf32>
    %287 = arith.addf %278, %286 : vector<1x16xf32>
    %288 = arith.index_cast %arg0 : i32 to index
    %c25 = arith.constant 25 : index
    %289 = memref.load %arg1[%288, %c25] : memref<8x32xi32, #tpu.memory_space<smem>>
    %290 = arith.index_cast %arg0 : i32 to index
    %c25_118 = arith.constant 25 : index
    %291 = memref.load %arg2[%290, %c25_118] : memref<8x32xf32, #tpu.memory_space<smem>>
    %292 = arith.index_cast %289 : i32 to index
    %c0_119 = arith.constant 0 : index
    %293 = vector.load %arg8[%292, %c0_119] : memref<288x16xf32, #tpu.memory_space<vmem>>, vector<1x16xf32>
    %294 = vector.broadcast %291 : f32 to vector<1x16xf32>
    %295 = arith.mulf %294, %293 : vector<1x16xf32>
    %296 = arith.addf %287, %295 : vector<1x16xf32>
    %297 = arith.index_cast %arg0 : i32 to index
    %c26 = arith.constant 26 : index
    %298 = memref.load %arg1[%297, %c26] : memref<8x32xi32, #tpu.memory_space<smem>>
    %299 = arith.index_cast %arg0 : i32 to index
    %c26_120 = arith.constant 26 : index
    %300 = memref.load %arg2[%299, %c26_120] : memref<8x32xf32, #tpu.memory_space<smem>>
    %301 = arith.index_cast %298 : i32 to index
    %c0_121 = arith.constant 0 : index
    %302 = vector.load %arg8[%301, %c0_121] : memref<288x16xf32, #tpu.memory_space<vmem>>, vector<1x16xf32>
    %303 = vector.broadcast %300 : f32 to vector<1x16xf32>
    %304 = arith.mulf %303, %302 : vector<1x16xf32>
    %305 = arith.addf %296, %304 : vector<1x16xf32>
    %306 = arith.index_cast %arg0 : i32 to index
    %c27 = arith.constant 27 : index
    %307 = memref.load %arg1[%306, %c27] : memref<8x32xi32, #tpu.memory_space<smem>>
    %308 = arith.index_cast %arg0 : i32 to index
    %c27_122 = arith.constant 27 : index
    %309 = memref.load %arg2[%308, %c27_122] : memref<8x32xf32, #tpu.memory_space<smem>>
    %310 = arith.index_cast %307 : i32 to index
    %c0_123 = arith.constant 0 : index
    %311 = vector.load %arg8[%310, %c0_123] : memref<288x16xf32, #tpu.memory_space<vmem>>, vector<1x16xf32>
    %312 = vector.broadcast %309 : f32 to vector<1x16xf32>
    %313 = arith.mulf %312, %311 : vector<1x16xf32>
    %314 = arith.addf %305, %313 : vector<1x16xf32>
    %cst_124 = arith.constant 0.000000e+00 : f32
    %315 = vector.broadcast %cst_124 : f32 to vector<1x16xf32>
    %316 = arith.index_cast %arg0 : i32 to index
    %c28 = arith.constant 28 : index
    %317 = memref.load %arg1[%316, %c28] : memref<8x32xi32, #tpu.memory_space<smem>>
    %318 = arith.index_cast %arg0 : i32 to index
    %c28_125 = arith.constant 28 : index
    %319 = memref.load %arg2[%318, %c28_125] : memref<8x32xf32, #tpu.memory_space<smem>>
    %320 = arith.index_cast %317 : i32 to index
    %c0_126 = arith.constant 0 : index
    %321 = vector.load %arg8[%320, %c0_126] : memref<288x16xf32, #tpu.memory_space<vmem>>, vector<1x16xf32>
    %322 = vector.broadcast %319 : f32 to vector<1x16xf32>
    %323 = arith.mulf %322, %321 : vector<1x16xf32>
    %324 = arith.addf %315, %323 : vector<1x16xf32>
    %325 = arith.index_cast %arg0 : i32 to index
    %c29 = arith.constant 29 : index
    %326 = memref.load %arg1[%325, %c29] : memref<8x32xi32, #tpu.memory_space<smem>>
    %327 = arith.index_cast %arg0 : i32 to index
    %c29_127 = arith.constant 29 : index
    %328 = memref.load %arg2[%327, %c29_127] : memref<8x32xf32, #tpu.memory_space<smem>>
    %329 = arith.index_cast %326 : i32 to index
    %c0_128 = arith.constant 0 : index
    %330 = vector.load %arg8[%329, %c0_128] : memref<288x16xf32, #tpu.memory_space<vmem>>, vector<1x16xf32>
    %331 = vector.broadcast %328 : f32 to vector<1x16xf32>
    %332 = arith.mulf %331, %330 : vector<1x16xf32>
    %333 = arith.addf %324, %332 : vector<1x16xf32>
    %334 = arith.index_cast %arg0 : i32 to index
    %c30 = arith.constant 30 : index
    %335 = memref.load %arg1[%334, %c30] : memref<8x32xi32, #tpu.memory_space<smem>>
    %336 = arith.index_cast %arg0 : i32 to index
    %c30_129 = arith.constant 30 : index
    %337 = memref.load %arg2[%336, %c30_129] : memref<8x32xf32, #tpu.memory_space<smem>>
    %338 = arith.index_cast %335 : i32 to index
    %c0_130 = arith.constant 0 : index
    %339 = vector.load %arg8[%338, %c0_130] : memref<288x16xf32, #tpu.memory_space<vmem>>, vector<1x16xf32>
    %340 = vector.broadcast %337 : f32 to vector<1x16xf32>
    %341 = arith.mulf %340, %339 : vector<1x16xf32>
    %342 = arith.addf %333, %341 : vector<1x16xf32>
    %343 = arith.index_cast %arg0 : i32 to index
    %c31 = arith.constant 31 : index
    %344 = memref.load %arg1[%343, %c31] : memref<8x32xi32, #tpu.memory_space<smem>>
    %345 = arith.index_cast %arg0 : i32 to index
    %c31_131 = arith.constant 31 : index
    %346 = memref.load %arg2[%345, %c31_131] : memref<8x32xf32, #tpu.memory_space<smem>>
    %347 = arith.index_cast %344 : i32 to index
    %c0_132 = arith.constant 0 : index
    %348 = vector.load %arg8[%347, %c0_132] : memref<288x16xf32, #tpu.memory_space<vmem>>, vector<1x16xf32>
    %349 = vector.broadcast %346 : f32 to vector<1x16xf32>
    %350 = arith.mulf %349, %348 : vector<1x16xf32>
    %351 = arith.addf %342, %350 : vector<1x16xf32>
    %352 = tpu.concatenate %92, %129, %166, %203, %240, %277, %314, %351 in 0 : vector<1x16xf32>, vector<1x16xf32>, vector<1x16xf32>, vector<1x16xf32>, vector<1x16xf32>, vector<1x16xf32>, vector<1x16xf32>, vector<1x16xf32> -> vector<8x16xf32>
    %c0_133 = arith.constant 0 : index
    %c0_134 = arith.constant 0 : index
    %c0_135 = arith.constant 0 : index
    %353 = vector.load %arg6[%c0_133, %c0_134, %c0_135] : memref<1x8x16xf32, #tpu.memory_space<vmem>>, vector<1x8x16xf32>
    %354 = vector.shape_cast %353 : vector<1x8x16xf32> to vector<8x16xf32>
    %355 = vector.shape_cast %352 : vector<8x16xf32> to vector<1x8x16xf32>
    tpu.vector_store %arg6[%c0_133, %c0_134, %c0_135], %355 {strides = array<i32>} : memref<1x8x16xf32, #tpu.memory_space<vmem>>, vector<1x8x16xf32>,
    return
  }
  func.func @transform_0(%arg0: i32, %arg1: memref<8x32xi32, #tpu.memory_space<smem>>, %arg2: memref<8x32xf32, #tpu.memory_space<smem>>) -> (i32, i32, i32) {
    %c0_i32 = arith.constant 0 : i32
    %c0_i32_0 = arith.constant 0 : i32
    %c0_i32_1 = arith.constant 0 : i32
    return %arg0, %c0_i32, %c0_i32_0 : i32, i32, i32
  }
  func.func @transform_1(%arg0: i32, %arg1: memref<8x32xi32, #tpu.memory_space<smem>>, %arg2: memref<8x32xf32, #tpu.memory_space<smem>>) -> (i32, i32, i32) {
    %c0_i32 = arith.constant 0 : i32
    %c0_i32_0 = arith.constant 0 : i32
    %c0_i32_1 = arith.constant 0 : i32
    %c0_i32_2 = arith.constant 0 : i32
    return %c0_i32, %c0_i32_0, %c0_i32_1 : i32, i32, i32
  }
  func.func @transform_2(%arg0: i32, %arg1: memref<8x32xi32, #tpu.memory_space<smem>>, %arg2: memref<8x32xf32, #tpu.memory_space<smem>>) -> (i32, i32) {
    %c0_i32 = arith.constant 0 : i32
    %c0_i32_0 = arith.constant 0 : i32
    %c0_i32_1 = arith.constant 0 : i32
    return %c0_i32, %c0_i32_0 : i32, i32
  }
  func.func @transform_3(%arg0: i32, %arg1: memref<8x32xi32, #tpu.memory_space<smem>>, %arg2: memref<8x32xf32, #tpu.memory_space<smem>>) -> (i32, i32, i32) {
    %c0_i32 = arith.constant 0 : i32
    %c0_i32_0 = arith.constant 0 : i32
    %c0_i32_1 = arith.constant 0 : i32
    return %arg0, %c0_i32, %c0_i32_0 : i32, i32, i32
  }
}

</mosaic_0001>

<bundles_post_ra>
// kernel: tpu_custom_call.1
= control target key start
LH: loop header
LB: loop body
LE: loop exit
PB: predicated region body
PF: predicated region fallthrough
CT: control target
= control target key end

     0   :  { %s4138_s24 = smov [#allocation5]   ;;  %s4139_s25 = smov [#allocation6]   ;;  %s5292_s0 = inlined_call_operand.vmem [shape: s32[8,32], index: 0, kind: input, shape index: {}]   ;;  %s5293_s2 = inlined_call_operand.vmem [shape: bf16[8,342,3], index: 2, kind: input, shape index: {}]   ;;  %s5294_s3 = inlined_call_operand.vmem [shape: f32[9,3,16], index: 3, kind: input, shape index: {}]   ;;  %s5295_s4 = inlined_call_operand.vmem [shape: f32[1,16], index: 4, kind: input, shape index: {}]   ;;  %s5296_s5 = inlined_call_operand.hbm [shape: f32[8,8,16], index: 5, kind: output, shape index: {}]   ;;  %s5297_s1 = inlined_call_operand.vmem [shape: f32[8,32], index: 1, kind: input, shape index: {}]  }
   0x1   :  { %5321 = sst [smem:[#allocation60_spill]] %s5293_s2  ;;  %s11_s20 = sshll.u32 %s5292_s0, 4  ;;  %s12_s20 = int_to_ptr.vmem [resolvable:$true] %s11_s20 }
   0x2   :  { %5322 = sst [smem:[#allocation61_spill]] %s5294_s3  ;;  %s16_s23 = sshll.u32 %s5297_s1, 4  ;;  %s17_s23 = int_to_ptr.vmem [resolvable:$true] %s16_s23 }
   0x3   :  { %5323 = sst [smem:[#allocation62_spill]] %s5295_s4 }
   0x4   :  { %5324 = sst [smem:[#allocation63_spill]] %s5296_s5 }
   0x5   :  { %14 = dma.vmem_to_smem %s12_s20, 128, %s4138_s24, [#allocation4] }
   0x6   :  { %19 = dma.vmem_to_smem %s17_s23, 128, %s4139_s25, [#allocation4] }
   0x7   :  { %4116 = dma.done.wait [#allocation4], 256 }
   0x8   :  { %4117 = vsyncadd [#allocation4], 4294967040 }
   0x9   :  { %22 = sfence }
   0xa   :  { %23 = vsyncpa [#allocation8], 0 }
   0xb   :  { %25 = vsyncpa [#allocation8 + $0x1], 0  ;;  %s4176_s26 = smov 0   ;;  %s4178_s27 = smov 0  }
   0xc   :  { %s4180_s0 = smov 0   ;;  %s4182_s28 = smov 0  }
   0xd LB: > { %5325 = sst [smem:[#allocation11_spill]] %s4124_s26  ;;  %s4197_s1 = sadd.s32 4294967295, %s4136_s28   ;;  %s4136_s28 = sphi %s4182_s28, %s5433_s28   ;;  %s4132_s0 = sphi %s4180_s0, %s5436_s0   ;;  %s4128_s27 = sphi %s4178_s27, %s5435_s27   ;;  %s4124_s26 = sphi %s4176_s26, %s5434_s26  }
   0xe   : > { %5326 = sst [smem:[#allocation12_spill]] %s4128_s27  ;;  %s3544_s29 = sadd.s32 4294967294, %s4136_s28  }
   0xf   : > { %5327 = sst [smem:[#allocation13_spill]] %s4132_s0  ;;  %s4201_s30 = sadd.s32 1, %s4136_s28  }
  0x10   : > { %5328 = sst [smem:[#allocation14_spill]] %s4136_s28  ;;  %s106_s6 = sadd.s32 1, %s4132_s0 }
  0x11   : > { %5329 = sst [smem:[#allocation15_spill]] %s4197_s1  ;;  %s103_s7 = ssub.s32 %s4136_s28, %s4201_s30 }
  0x12   : > { %5330 = sst [smem:[#allocation16_spill]] %s4201_s30  ;;  %p116_p0 = scmp.ne.s32.totalorder %s4132_s0, %s4128_s27 }
  0x13   : > { %p104_p1 = scmp.eq.s32.totalorder %s103_s7, 0  ;;  %p117_p2 = scmp.eq.s32.totalorder %s4197_s1, 7 }
  0x14   : > { %p122_p3 = scmp.ne.s32.totalorder %s4128_s27, %s4124_s26  ;;  %p123_p4 = scmp.eq.s32.totalorder %s3544_s29, 7 }
  0x15   : > { %s4212_s8 = scalar_select %p104_p1, %s4132_s0, %s106_s6  }
  0x16   : > { %p4214_p5 = por %p117_p2, %p116_p0  ;;  %p4218_p6 = por %p123_p4, %p122_p3 }
  0x17   : > { %5331 = sst [smem:[#allocation17_spill]] %s4212_s8  ;;  %p3547_p7 = scmp.ge.s32.totalorder %s4136_s28, 1 }
  0x18   : > { %s5332_s9 = scalar_select %p4214_p5, 1, 0 }
  0x19   : > { %s5334_s10 = scalar_select %p4218_p6, 1, 0 }
  0x1a   : > { %5333 = sst [smem:[#allocation18_spill]] %s5332_s9  ;;  %p155_p8 = scmp.lt.s32.totalorder %s4136_s28, 9 }
  0x1b   : > { %5335 = sst [smem:[#allocation19_spill]] %s5334_s10 }
  0x1c   : > { %p156_p9 = pnand %p3547_p7, %p155_p8 }
  0x1e   : > { %159 = sbr.rel (%p156_p9) target bundleno = 889 (0x379), region = 32 }
  0x23   : > { %s5336_s3 = sld [smem:[#allocation61_spill]]  ;;  %vm498_vm0 = vcmask 1042432   ;;  %p179_p10 = scmp.lt.s32.totalorder %s4197_s1, 7  ;;  %vm270_vm1 = vcmask 23552   ;;  %vm3109_vm2 = vcmask 130048   ;;  %vm3423_vm3 = vcmask 1040384  }
  0x24   : > { %s5337_s2 = sld [smem:[#allocation60_spill]]  ;;  %s4940_s18 = sshll.u32 %s4197_s1, 7  ;;  %vm3425_vm4 = vcmask 1041408   ;;  %vm3428_vm5 = vcmask 1043456   ;;  %vm3430_vm6 = vcmask 1044480   ;;  %vm3432_vm7 = vcmask 1045504  }
  0x25   : > { %s180_s19 = scalar_select %p179_p10, %s4197_s1, 7  ;;  %vm3434_vm8 = vcmask 1046528  }
  0x26   : > { %s5338_s4 = sld [smem:[#allocation62_spill]]  ;;  %s3178_s7 = sadd.s32 4, %s4940_s18 }
  0x27   : > { %s4003_s22 = smul.u32 172, %s180_s19  ;;  %s3154_s19 = sadd.s32 1, %s4940_s18 }
  0x28   : > { %s4946_s20 = sld [smem:[#allocation5 + %s4940_s18]]  ;;  %s3186_s13 = sadd.s32 5, %s4940_s18 }
  0x29   : > { %v3550_v0 = vld [vmem:[%s5336_s3 + $0x4] sm:$0x7]  ;;  %v3625_v1 = vld [vmem:[%s5336_s3 + $0x8] sm:$0x7]  ;;  %v3663_v2 = vld [vmem:[%s5336_s3 + $0xc] sm:$0x7] }
  0x2a   : > { %4000 = vmatpush.msk.msra.mxu1 %vm498_vm0, %v3550_v0  ;;  %4001 = vmatpush.msk.msra.mxu2 %vm498_vm0, %v3550_v0  ;;  %v351_v3 = vld [vmem:[%s5336_s3] sm:$0x7]  ;;  %v3701_v4 = vld [vmem:[%s5336_s3 + $0x10] sm:$0x7]  ;;  %s4252_s25 = scalar_lea.vmem %s5337_s2, %s4003_s22  ;;  %s4949_s21 = sld [smem:[#allocation6 + %s4940_s18]] }
  0x2b   : > { %4002 = vmatpush.msk.msra.mxu3 %vm498_vm0, %v3550_v0  ;;  %3551 = vmatpush.msk.msra.mxu0 %vm498_vm0, %v3550_v0  ;;  %v4255_v5 = vld [vmem:[%s4252_s25 + $0x20] sm:$0xff]   ;;  %v3984_v6 = vld [vmem:[%s4252_s25 + $0x28] sm:$0xff]   ;;  %v3993_v12 = vld [vmem:[%s4252_s25 + $0x70] sm:$0xff]   ;;  %s3162_s22 = sadd.s32 2, %s4940_s18  ;;  %s4952_s23 = sld [smem:[#allocation5 + %s3154_s19]] }
  0x2c   : > { %3626 = vmatpush.msk.msrb.mxu2 %vm498_vm0, %v3625_v1  ;;  %3588 = vmatpush.msk.msrb.mxu1 %vm498_vm0, %v351_v3  ;;  %v3915_v7 = vunpack.c.h.bf16 %v4255_v5  ;;  %v3918_v8 = vunpack.c.l.bf16 %v3984_v6  ;;  %v3988_v9 = vld [vmem:[%s4252_s25 + $0x48] sm:$0xff]   ;;  %v3989_v15 = vld [vmem:[%s4252_s25 + $0x50] sm:$0xff]   ;;  %v3954_v16 = vunpack.c.l.bf16 %v3993_v12  ;;  %v3897_v17 = vld [vmem:[%s4252_s25] sm:$0xff]   ;;  %v3919_v18 = vunpack.c.h.bf16 %v3984_v6  ;;  %s4954_s24 = sld [smem:[#allocation6 + %s3154_s19]]  ;;  %s3194_s16 = sadd.s32 6, %s4940_s18 }
  0x2d   : > { %3664 = vmatpush.msk.msrb.mxu3 %vm498_vm0, %v3663_v2  ;;  %3702 = vmatpush.msk.msrb.mxu0 %vm498_vm0, %v3701_v4  ;;  %v4261_v10 = vld [vmem:[%s4252_s25 + $0x68] sm:$0xff]   ;;  %v3934_v11 = vunpack.c.l.bf16 %v3988_v9  ;;  %v3935_v13 = vunpack.c.h.bf16 %v3988_v9  ;;  %v3938_v19 = vunpack.c.l.bf16 %v3989_v15  ;;  %v3898_v20 = vunpack.c.l.bf16 %v3897_v17  ;;  %v3985_v21 = vld [vmem:[%s4252_s25 + $0x30] sm:$0xff]   ;;  %v3994_v27 = vld [vmem:[%s4252_s25 + $0x78] sm:$0xff]   ;;  %s4958_s29 = sld [smem:[#allocation5 + %s3162_s22]]  ;;  %s3218_s0 = sadd.s32 9, %s4940_s18 }
  0x2e   : > { %280 = vst.msk [vmem:[#allocation2 + $0x48] sm:$0xff] %vm270_vm1, %v3915_v7  ;;  %v3951_v14 = vunpack.c.h.bf16 %v4261_v10  ;;  %v3899_v22 = vunpack.c.h.bf16 %v3897_v17  ;;  %v3955_v23 = vunpack.c.h.bf16 %v3993_v12  ;;  %v3980_v24 = vld [vmem:[%s4252_s25 + $0x8] sm:$0xff]   ;;  %v3922_v26 = vunpack.c.l.bf16 %v3985_v21  ;;  %v3990_v30 = vld [vmem:[%s4252_s25 + $0x58] sm:$0xff]   ;;  %v3981_v40 = vld [vmem:[%s4252_s25 + $0x10] sm:$0xff]   ;;  %5339 = sst [smem:[#allocation20_spill]] %s4946_s20  ;;  %s3226_s30 = sadd.s32 10, %s4940_s18 }
  0x2f   : > { %281 = vst.msk [vmem:[#allocation2 + $0x50] sm:$0xff] %vm270_vm1, %v3918_v8  ;;  %v3939_v28 = vunpack.c.h.bf16 %v3989_v15  ;;  %v3902_v29 = vunpack.c.l.bf16 %v3980_v24  ;;  %v3958_v32 = vunpack.c.l.bf16 %v3994_v27  ;;  %v3923_v33 = vunpack.c.h.bf16 %v3985_v21  ;;  %v3986_v36 = vld [vmem:[%s4252_s25 + $0x38] sm:$0xff]   ;;  %v3995_v42 = vld [vmem:[%s4252_s25 + $0x80] sm:$0xff]   ;;  %v3996_v59 = vld [vmem:[%s4252_s25 + $0x88] sm:$0xff]   ;;  %s4960_s6 = sld [smem:[#allocation6 + %s3162_s22]]  ;;  %s3202_s22 = sadd.s32 7, %s4940_s18 }
  0x30   : > { %289 = vst.msk [vmem:[#allocation2 + $0x90] sm:$0xff] %vm270_vm1, %v3934_v11  ;;  %v3942_v35 = vunpack.c.l.bf16 %v3990_v30  ;;  %v3903_v38 = vunpack.c.h.bf16 %v3980_v24  ;;  %v3959_v39 = vunpack.c.h.bf16 %v3994_v27  ;;  %v3926_v41 = vunpack.c.l.bf16 %v3986_v36  ;;  %v3991_v47 = vld [vmem:[%s4252_s25 + $0x60] sm:$0xff]   ;;  %v3982_v57 = vld [vmem:[%s4252_s25 + $0x18] sm:$0xff]   ;;  %s4970_s14 = sld [smem:[#allocation5 + %s3178_s7]]  ;;  %s3234_s28 = sadd.s32 11, %s4940_s18 }
  0x31   : > { %290 = vst.msk [vmem:[#allocation2 + $0x98] sm:$0xff] %vm270_vm1, %v3935_v13  ;;  %v3943_v45 = vunpack.c.h.bf16 %v3990_v30  ;;  %v3906_v46 = vunpack.c.l.bf16 %v3981_v40  ;;  %v3962_v49 = vunpack.c.l.bf16 %v3995_v42  ;;  %v3927_v50 = vunpack.c.h.bf16 %v3986_v36  ;;  %v3987_v52 = vld [vmem:[%s4252_s25 + $0x40] sm:$0xff]   ;;  %5340 = sst [smem:[#allocation21_spill]] %s4952_s23 }
  0x32   : > { %298 = vst.msk [vmem:[#allocation2 + $0xd8] sm:$0xff] %vm270_vm1, %v3951_v14  ;;  %v3946_v51 = vunpack.c.l.bf16 %v3991_v47  ;;  %v3907_v54 = vunpack.c.h.bf16 %v3981_v40  ;;  %v3963_v56 = vunpack.c.h.bf16 %v3995_v42  ;;  %v3930_v58 = vunpack.c.l.bf16 %v3987_v52  ;;  %s4972_s15 = sld [smem:[#allocation6 + %s3178_s7]]  ;;  %s3210_s7 = sadd.s32 8, %s4940_s18 }
  0x33   : > { %299 = vst.msk [vmem:[#allocation2 + $0xe0] sm:$0xff] %vm270_vm1, %v3954_v16  ;;  %v3947_v61 = vunpack.c.h.bf16 %v3991_v47  ;;  %v3910_v62 = vunpack.c.l.bf16 %v3982_v57  ;;  %v3966_v0 = vunpack.c.l.bf16 %v3996_v59  ;;  %v3931_v1 = vunpack.c.h.bf16 %v3987_v52  ;;  %5341 = sst [smem:[#allocation22_spill]] %s4958_s29 }
  0x34   : > { %282 = vst.msk [vmem:[#allocation2 + $0x58] sm:$0xff] %vm270_vm1, %v3919_v18  ;;  %v3950_v2 = vunpack.c.l.bf16 %v4261_v10  ;;  %v3911_v4 = vunpack.c.h.bf16 %v3982_v57  ;;  %v3967_v7 = vunpack.c.h.bf16 %v3996_v59  ;;  %v4328_v10 = vld [vmem:[%s4252_s25 + $0x90] sm:$0xff]   ;;  %v3914_v11 = vunpack.c.l.bf16 %v4255_v5  ;;  %s4975_s17 = sld [smem:[#allocation5 + %s3186_s13]] }
  0x35   : > { %291 = vst.msk [vmem:[#allocation2 + $0xa0] sm:$0xff] %vm270_vm1, %v3938_v19  ;;  %v3970_v12 = vunpack.c.l.bf16 %v4328_v10  ;;  %s4977_s19 = sld [smem:[#allocation6 + %s3186_s13]] }
  0x36   : > { %v361_v25 = vld [vmem:[#allocation2 + $0x49] sm:$0xff]  ;;  %271 = vst.msk [vmem:[#allocation2] sm:$0xff] %vm270_vm1, %v3898_v20  ;;  %v3777_v20 = vld [vmem:[%s5336_s3 + $0x18] sm:$0x7]  ;;  %5343 = sst [smem:[#allocation24_spill]] %s4970_s14 }
  0x37   : > { %3561 = vmatmul.msk.f32.vlgmr.msra.gmra.mxu1 %vm270_vm1, %v361_v25  ;;  %272 = vst.msk [vmem:[#allocation2 + $0x8] sm:$0xff] %vm270_vm1, %v3899_v22  ;;  %v3815_v22 = vld [vmem:[%s5336_s3 + $0x1c] sm:$0x7]  ;;  %s4983_s2 = sld [smem:[#allocation6 + %s3194_s16]] }
  0x38   : > { %v370_v31 = vld [vmem:[#allocation2 + $0x91] sm:$0xff]  ;;  %300 = vst.msk [vmem:[#allocation2 + $0xe8] sm:$0xff] %vm270_vm1, %v3955_v23  ;;  %s4988_s8 = sld [smem:[#allocation6 + %s3202_s22]] }
  0x39   : > { %3570 = vmatmul.msk.f32.vlgmr.msra.gmra.mxu2 %vm270_vm1, %v370_v31  ;;  %283 = vst.msk [vmem:[#allocation2 + $0x60] sm:$0xff] %vm270_vm1, %v3922_v26  ;;  %v3739_v23 = vld [vmem:[%s5336_s3 + $0x14] sm:$0x7]  ;;  %s4993_s13 = sld [smem:[#allocation5 + %s3210_s7]] }
  0x3a   : > { %v379_v34 = vld [vmem:[#allocation2 + $0xd9] sm:$0xff]  ;;  %292 = vst.msk [vmem:[#allocation2 + $0xa8] sm:$0xff] %vm270_vm1, %v3939_v28  ;;  %3778 = vmatpush.msk.msra.mxu2 %vm498_vm0, %v3777_v20  ;;  %3740 = vmatpush.msk.msra.mxu1 %vm498_vm0, %v3739_v23  ;;  %5344 = sst [smem:[#allocation25_spill]] %s4975_s17 }
  0x3b   : > { %3579 = vmatmul.msk.f32.vlgmr.msra.gmra.mxu3 %vm270_vm1, %v379_v34  ;;  %v362_v37 = vld [vmem:[#allocation2 + $0x51] sm:$0xff]  ;;  %273 = vst.msk [vmem:[#allocation2 + $0x10] sm:$0xff] %vm270_vm1, %v3902_v29  ;;  %v3853_v28 = vld [vmem:[%s5336_s3 + $0x20] sm:$0x7]  ;;  %s4986_s3 = sld [smem:[#allocation5 + %s3202_s22]]  ;;  %s3250_s22 = sadd.s32 13, %s4940_s18 }
  0x3c   : > { %301 = vst.msk [vmem:[#allocation2 + $0xf0] sm:$0xff] %vm270_vm1, %v3958_v32  ;;  %v371_v43 = vld [vmem:[#allocation2 + $0x99] sm:$0xff]  ;;  %3816 = vmatpush.msk.msra.mxu3 %vm498_vm0, %v3815_v22  ;;  %s4999_s10 = sld [smem:[#allocation5 + %s3218_s0]] }
  0x3d   : > { %284 = vst.msk [vmem:[#allocation2 + $0x68] sm:$0xff] %vm270_vm1, %v3923_v33  ;;  %v315_v36 = vld [vmem:[#allocation2] sm:$0xff]  ;;  %v326_v22 = vld [vmem:[#allocation2 + $0x58] sm:$0xff]  ;;  %s5001_s26 = sld [smem:[#allocation6 + %s3218_s0]]  ;;  %s3266_s0 = sadd.s32 15, %s4940_s18 }
  0x3e   : > { %v352_v44 = vld [vmem:[#allocation2 + $0x1] sm:$0xff]  ;;  %293 = vst.msk [vmem:[#allocation2 + $0xb0] sm:$0xff] %vm270_vm1, %v3942_v35  ;;  %s5005_s9 = sld [smem:[#allocation5 + %s3226_s30]] }
  0x3f   : > { %3562 = vmatmul.msk.f32.gmra.mxu1 %vm270_vm1, %v362_v37  ;;  %3552 = vmatmul.msk.f32.vlgmr.msra.gmra.mxu0 %vm270_vm1, %v352_v44  ;;  %274 = vst.msk [vmem:[#allocation2 + $0x18] sm:$0xff] %vm270_vm1, %v3903_v38  ;;  %v380_v48 = vld [vmem:[#allocation2 + $0xe1] sm:$0xff]  ;;  %5347 = sst [smem:[#allocation28_spill]] %s4993_s13 }
  0x40   : > { %302 = vst.msk [vmem:[#allocation2 + $0xf8] sm:$0xff] %vm270_vm1, %v3959_v39  ;;  %v363_v53 = vld [vmem:[#allocation2 + $0x59] sm:$0xff]  ;;  %3854 = vmatpush.msk.msra.mxu0 %vm498_vm0, %v3853_v28  ;;  %v863_v38 = vld [vmem:[#allocation2 + $0x2] sm:$0xff]  ;;  %s5007_s5 = sld [smem:[#allocation6 + %s3226_s30]] }
  0x41   : > { %3571 = vmatmul.msk.f32.gmra.mxu2 %vm270_vm1, %v371_v43  ;;  %285 = vst.msk [vmem:[#allocation2 + $0x70] sm:$0xff] %vm270_vm1, %v3926_v41  ;;  %v372_v60 = vld [vmem:[#allocation2 + $0xa1] sm:$0xff]  ;;  %5346 = sst [smem:[#allocation27_spill]] %s4986_s3 }
  0x42   : > { %294 = vst.msk [vmem:[#allocation2 + $0xb8] sm:$0xff] %vm270_vm1, %v3943_v45  ;;  %v353_v55 = vld [vmem:[#allocation2 + $0x9] sm:$0xff]  ;;  %5348 = sst [smem:[#allocation29_spill]] %s4999_s10 }
  0x43   : > { %3580 = vmatmul.msk.f32.gmra.mxu3 %vm270_vm1, %v380_v48  ;;  %275 = vst.msk [vmem:[#allocation2 + $0x20] sm:$0xff] %vm270_vm1, %v3906_v46  ;;  %v381_v63 = vld [vmem:[#allocation2 + $0xe9] sm:$0xff]  ;;  %s5010_s1 = sld [smem:[#allocation5 + %s3234_s28]] }
  0x44   : > { %303 = vst.msk [vmem:[#allocation2 + $0x100] sm:$0xff] %vm270_vm1, %v3962_v49  ;;  %v364_v3 = vld [vmem:[#allocation2 + $0x61] sm:$0xff]  ;;  %v864_v42 = vld [vmem:[#allocation2 + $0xa] sm:$0xff]  ;;  %5349 = sst [smem:[#allocation30_spill]] %s5005_s9 }
  0x45   : > { %286 = vst.msk [vmem:[#allocation2 + $0x78] sm:$0xff] %vm270_vm1, %v3927_v50  ;;  %v373_v8 = vld [vmem:[#allocation2 + $0xa9] sm:$0xff]  ;;  %s5012_s13 = sld [smem:[#allocation6 + %s3234_s28]]  ;;  %s3258_s28 = sadd.s32 14, %s4940_s18 }
  0x46   : > { %295 = vst.msk [vmem:[#allocation2 + $0xc0] sm:$0xff] %vm270_vm1, %v3946_v51  ;;  %v354_v6 = vld [vmem:[#allocation2 + $0x11] sm:$0xff]  ;;  %v316_v40 = vld [vmem:[#allocation2 + $0x8] sm:$0xff]  ;;  %s5027_s9 = sld [smem:[#allocation5 + %s3250_s22]] }
  0x47   : > { %3563 = vmatmul.msk.f32.gmra.mxu1 %vm270_vm1, %v363_v53  ;;  %3553 = vmatmul.msk.f32.gmra.mxu0 %vm270_vm1, %v353_v55  ;;  %276 = vst.msk [vmem:[#allocation2 + $0x28] sm:$0xff] %vm270_vm1, %v3907_v54  ;;  %v382_v9 = vld [vmem:[#allocation2 + $0xf1] sm:$0xff]  ;;  %v1183_v20 = vld [vmem:[#allocation2 + $0x62] sm:$0xff]  ;;  %s5029_s27 = sld [smem:[#allocation6 + %s3250_s22]] }
  0x48   : > { %304 = vst.msk [vmem:[#allocation2 + $0x108] sm:$0xff] %vm270_vm1, %v3963_v56  ;;  %v365_v13 = vld [vmem:[#allocation2 + $0x69] sm:$0xff]  ;;  %v1173_v39 = vld [vmem:[#allocation2 + $0x12] sm:$0xff]  ;;  %s5038_s10 = sld [smem:[#allocation5 + %s3266_s0]] }
  0x49   : > { %3572 = vmatmul.msk.f32.gmra.mxu2 %vm270_vm1, %v372_v60  ;;  %287 = vst.msk [vmem:[#allocation2 + $0x80] sm:$0xff] %vm270_vm1, %v3930_v58  ;;  %v374_v15 = vld [vmem:[#allocation2 + $0xb1] sm:$0xff]  ;;  %5350 = sst [smem:[#allocation31_spill]] %s5010_s1 }
  0x4a   : > { %296 = vst.msk [vmem:[#allocation2 + $0xc8] sm:$0xff] %vm270_vm1, %v3947_v61  ;;  %v355_v14 = vld [vmem:[#allocation2 + $0x19] sm:$0xff]  ;;  %v317_v44 = vld [vmem:[#allocation2 + $0x10] sm:$0xff]  ;;  %s5040_s3 = sld [smem:[#allocation6 + %s3266_s0]] }
  0x4b   : > { %3581 = vmatmul.msk.f32.gmra.mxu3 %vm270_vm1, %v381_v63  ;;  %277 = vst.msk [vmem:[#allocation2 + $0x30] sm:$0xff] %vm270_vm1, %v3910_v62  ;;  %v383_v16 = vld [vmem:[#allocation2 + $0xf9] sm:$0xff]  ;;  %v1180_v62 = vld [vmem:[#allocation2 + $0x4a] sm:$0xff] }
  0x4c   : > { %305 = vst.msk [vmem:[#allocation2 + $0x110] sm:$0xff] %vm270_vm1, %v3966_v0  ;;  %v366_v5 = vld [vmem:[#allocation2 + $0x71] sm:$0xff]  ;;  %v1174_v43 = vld [vmem:[#allocation2 + $0x1a] sm:$0xff]  ;;  %5352 = sst [smem:[#allocation33_spill]] %s5027_s9  ;;  %s3282_s9 = sadd.s32 17, %s4940_s18 }
  0x4d   : > { %288 = vst.msk [vmem:[#allocation2 + $0x88] sm:$0xff] %vm270_vm1, %v3931_v1  ;;  %v375_v18 = vld [vmem:[#allocation2 + $0xb9] sm:$0xff]  ;;  %s5052_s0 = sld [smem:[#allocation6 + %s3282_s9]] }
  0x4e   : > { %297 = vst.msk [vmem:[#allocation2 + $0xd0] sm:$0xff] %vm270_vm1, %v3950_v2  ;;  %v356_v17 = vld [vmem:[#allocation2 + $0x21] sm:$0xff]  ;;  %v1483_v41 = vld [vmem:[#allocation2 + $0x13] sm:$0xff]  ;;  %5354 = sst [smem:[#allocation35_spill]] %s5038_s10 }
  0x4f   : > { %3564 = vmatmul.msk.f32.gmra.mxu1 %vm270_vm1, %v364_v3  ;;  %3554 = vmatmul.msk.f32.gmra.mxu0 %vm270_vm1, %v354_v6  ;;  %278 = vst.msk [vmem:[#allocation2 + $0x38] sm:$0xff] %vm270_vm1, %v3911_v4  ;;  %v384_v19 = vld [vmem:[#allocation2 + $0x101] sm:$0xff]  ;;  %v318_v47 = vld [vmem:[#allocation2 + $0x18] sm:$0xff]  ;;  %v1490_v3 = vld [vmem:[#allocation2 + $0x4b] sm:$0xff]  ;;  %s5050_s10 = sld [smem:[#allocation5 + %s3282_s9]] }
  0x50   : > { %306 = vst.msk [vmem:[#allocation2 + $0x118] sm:$0xff] %vm270_vm1, %v3967_v7  ;;  %v367_v21 = vld [vmem:[#allocation2 + $0x79] sm:$0xff]  ;;  %v1175_v46 = vld [vmem:[#allocation2 + $0x22] sm:$0xff] }
  0x51   : > { %3573 = vmatmul.msk.f32.gmra.mxu2 %vm270_vm1, %v373_v8  ;;  %279 = vst.msk [vmem:[#allocation2 + $0x40] sm:$0xff] %vm270_vm1, %v3914_v11  ;;  %v376_v25 = vld [vmem:[#allocation2 + $0xc1] sm:$0xff]  ;;  %v1181_v6 = vld [vmem:[#allocation2 + $0x52] sm:$0xff] }
  0x52   : > { %307 = vst.msk [vmem:[#allocation2 + $0x120] sm:$0xff] %vm270_vm1, %v3970_v12  ;;  %v357_v24 = vld [vmem:[#allocation2 + $0x29] sm:$0xff]  ;;  %v1484_v45 = vld [vmem:[#allocation2 + $0x1b] sm:$0xff]  ;;  %v1491_v12 = vld [vmem:[#allocation2 + $0x53] sm:$0xff] }
  0x53   : > { %3582 = vmatmul.msk.f32.gmra.mxu3 %vm270_vm1, %v382_v9  ;;  %v385_v26 = vld [vmem:[#allocation2 + $0x109] sm:$0xff]  ;;  %v319_v50 = vld [vmem:[#allocation2 + $0x20] sm:$0xff] }
  0x54   : > { %v368_v27 = vld [vmem:[#allocation2 + $0x81] sm:$0xff]  ;;  %v369_v32 = vld [vmem:[#allocation2 + $0x89] sm:$0xff] }
  0x55   : > { %v377_v30 = vld [vmem:[#allocation2 + $0xc9] sm:$0xff]  ;;  %v378_v34 = vld [vmem:[#allocation2 + $0xd1] sm:$0xff]  ;;  %5356 = sst [smem:[#allocation37_spill]] %s5050_s10  ;;  %s3314_s10 = sadd.s32 21, %s4940_s18 }
  0x56   : > { %v358_v29 = vld [vmem:[#allocation2 + $0x31] sm:$0xff]  ;;  %v1485_v48 = vld [vmem:[#allocation2 + $0x23] sm:$0xff]  ;;  %s5073_s29 = sld [smem:[#allocation5 + %s3314_s10]] }
  0x57   : > { %3565 = vmatmul.msk.f32.gmra.mxu1 %vm270_vm1, %v365_v13  ;;  %3555 = vmatmul.msk.f32.gmra.mxu0 %vm270_vm1, %v355_v14  ;;  %v386_v31 = vld [vmem:[#allocation2 + $0x111] sm:$0xff]  ;;  %v320_v53 = vld [vmem:[#allocation2 + $0x28] sm:$0xff]  ;;  %v1182_v14 = vld [vmem:[#allocation2 + $0x5a] sm:$0xff] }
  0x58   : > { %v359_v33 = vld [vmem:[#allocation2 + $0x39] sm:$0xff]  ;;  %v360_v37 = vld [vmem:[#allocation2 + $0x41] sm:$0xff]  ;;  %v1176_v49 = vld [vmem:[#allocation2 + $0x2a] sm:$0xff] }
  0x59   : > { %3574 = vmatmul.msk.f32.gmra.mxu2 %vm270_vm1, %v374_v15  ;;  %v387_v35 = vld [vmem:[#allocation2 + $0x119] sm:$0xff]  ;;  %v1486_v51 = vld [vmem:[#allocation2 + $0x2b] sm:$0xff]  ;;  %v1179_v58 = vld [vmem:[#allocation2 + $0x42] sm:$0xff] }
  0x5a   : > { %v1177_v52 = vld [vmem:[#allocation2 + $0x32] sm:$0xff]  ;;  %v1178_v55 = vld [vmem:[#allocation2 + $0x3a] sm:$0xff]  ;;  %v1489_v61 = vld [vmem:[#allocation2 + $0x43] sm:$0xff] }
  0x5b   : > { %3583 = vmatmul.msk.f32.gmra.mxu3 %vm270_vm1, %v383_v16  ;;  %v1487_v54 = vld [vmem:[#allocation2 + $0x33] sm:$0xff]  ;;  %v1488_v57 = vld [vmem:[#allocation2 + $0x3b] sm:$0xff]  ;;  %v324_v8 = vld [vmem:[#allocation2 + $0x48] sm:$0xff] }
  0x5c   : > { %v321_v56 = vld [vmem:[#allocation2 + $0x30] sm:$0xff]  ;;  %v322_v60 = vld [vmem:[#allocation2 + $0x38] sm:$0xff]  ;;  %v323_v0 = vld [vmem:[#allocation2 + $0x40] sm:$0xff]  ;;  %5363 = sst [smem:[#allocation44_spill]] %s5073_s29  ;;  %s3346_s29 = sadd.s32 25, %s4940_s18 }
  0x5d   : > { %v325_v16 = vld [vmem:[#allocation2 + $0x50] sm:$0xff] }
  0x5f   : > { %3566 = vmatmul.msk.f32.gmra.mxu1 %vm270_vm1, %v366_v5  ;;  %3556 = vmatmul.msk.f32.gmra.mxu0 %vm270_vm1, %v356_v17 }
  0x61   : > { %3575 = vmatmul.msk.f32.gmra.mxu2 %vm270_vm1, %v375_v18  ;;  %v1492_v18 = vld [vmem:[#allocation2 + $0x5b] sm:$0xff] }
  0x63   : > { %3584 = vmatmul.msk.f32.gmra.mxu3 %vm270_vm1, %v384_v19 }
  0x67   : > { %3567 = vmatmul.msk.f32.gmra.mxu1 %vm270_vm1, %v367_v21  ;;  %3557 = vmatmul.msk.f32.gmra.mxu0 %vm270_vm1, %v357_v24 }
  0x69   : > { %3576 = vmatmul.msk.f32.gmra.mxu2 %vm270_vm1, %v376_v25  ;;  %v1493_v25 = vld [vmem:[#allocation2 + $0x63] sm:$0xff] }
  0x6b   : > { %3585 = vmatmul.msk.f32.gmra.mxu3 %vm270_vm1, %v385_v26 }
  0x6f   : > { %3568 = vmatmul.msk.f32.gmra.mxu1 %vm270_vm1, %v368_v27  ;;  %3558 = vmatmul.msk.f32.gmra.mxu0 %vm270_vm1, %v358_v29  ;;  %v1184_v27 = vld [vmem:[#allocation2 + $0x6a] sm:$0xff]  ;;  %v327_v29 = vld [vmem:[#allocation2 + $0x60] sm:$0xff] }
  0x71   : > { %3577 = vmatmul.msk.f32.gmra.mxu2 %vm270_vm1, %v377_v30 }
  0x73   : > { %3586 = vmatmul.msk.f32.gmra.mxu3 %vm270_vm1, %v386_v31 }
  0x77   : > { %3569 = vmatmul.msk.f32.gmra.mxu1 %vm270_vm1, %v369_v32  ;;  %3559 = vmatmul.msk.f32.gmra.mxu0 %vm270_vm1, %v359_v33  ;;  %v1494_v32 = vld [vmem:[#allocation2 + $0x6b] sm:$0xff] }
  0x79   : > { %3578 = vmatmul.msk.f32.gmra.mxu2 %vm270_vm1, %v378_v34  ;;  %v1185_v34 = vld [vmem:[#allocation2 + $0x72] sm:$0xff] }
  0x7b   : > { %3587 = vmatmul.msk.f32.gmra.mxu3 %vm270_vm1, %v387_v35 }
  0x7f   : > { %3589 = vmatmul.msk.f32.vlgmr.msrb.gmra.mxu1 %vm270_vm1, %v315_v36  ;;  %3560 = vmatmul.msk.f32.gmra.mxu0 %vm270_vm1, %v360_v37  ;;  %v328_v36 = vld [vmem:[#allocation2 + $0x68] sm:$0xff] }
  0x81   : > { %3627 = vmatmul.msk.f32.vlgmr.msrb.gmra.mxu2 %vm270_vm1, %v863_v38 }
  0x83   : > { %3665 = vmatmul.msk.f32.vlgmr.msrb.gmra.mxu3 %vm270_vm1, %v1173_v39 }
  0x87   : > { %3590 = vmatmul.msk.f32.gmra.mxu1 %vm270_vm1, %v316_v40  ;;  %3703 = vmatmul.msk.f32.vlgmr.msrb.gmra.mxu0 %vm270_vm1, %v1483_v41  ;;  %v1186_v41 = vld [vmem:[#allocation2 + $0x7a] sm:$0xff] }
  0x89   : > { %3628 = vmatmul.msk.f32.gmra.mxu2 %vm270_vm1, %v864_v42 }
  0x8b   : > { %3666 = vmatmul.msk.f32.gmra.mxu3 %vm270_vm1, %v1174_v43 }
  0x8f   : > { %3591 = vmatmul.msk.f32.gmra.mxu1 %vm270_vm1, %v317_v44  ;;  %3704 = vmatmul.msk.f32.gmra.mxu0 %vm270_vm1, %v1484_v45 }
  0x91   : > { %3629 = vmatmul.msk.f32.gmra.mxu2 %vm270_vm1, %v1173_v39  ;;  %v1495_v39 = vld [vmem:[#allocation2 + $0x73] sm:$0xff] }
  0x93   : > { %3667 = vmatmul.msk.f32.gmra.mxu3 %vm270_vm1, %v1175_v46 }
  0x97   : > { %3592 = vmatmul.msk.f32.gmra.mxu1 %vm270_vm1, %v318_v47  ;;  %3705 = vmatmul.msk.f32.gmra.mxu0 %vm270_vm1, %v1485_v48  ;;  %v1187_v48 = vld [vmem:[#allocation2 + $0x82] sm:$0xff] }
  0x99   : > { %3630 = vmatmul.msk.f32.gmra.mxu2 %vm270_vm1, %v1174_v43  ;;  %v329_v43 = vld [vmem:[#allocation2 + $0x70] sm:$0xff] }
  0x9b   : > { %3668 = vmatmul.msk.f32.gmra.mxu3 %vm270_vm1, %v1176_v49 }
  0x9f   : > { %3593 = vmatmul.msk.f32.gmra.mxu1 %vm270_vm1, %v319_v50  ;;  %3706 = vmatmul.msk.f32.gmra.mxu0 %vm270_vm1, %v1486_v51  ;;  %v330_v50 = vld [vmem:[#allocation2 + $0x78] sm:$0xff] }
  0xa1   : > { %3631 = vmatmul.msk.f32.gmra.mxu2 %vm270_vm1, %v1175_v46  ;;  %v1496_v46 = vld [vmem:[#allocation2 + $0x7b] sm:$0xff] }
  0xa3   : > { %3669 = vmatmul.msk.f32.gmra.mxu3 %vm270_vm1, %v1177_v52 }
  0xa7   : > { %3594 = vmatmul.msk.f32.gmra.mxu1 %vm270_vm1, %v320_v53  ;;  %3707 = vmatmul.msk.f32.gmra.mxu0 %vm270_vm1, %v1487_v54  ;;  %v1497_v53 = vld [vmem:[#allocation2 + $0x83] sm:$0xff] }
  0xa9   : > { %3632 = vmatmul.msk.f32.gmra.mxu2 %vm270_vm1, %v1176_v49 }
  0xab   : > { %3670 = vmatmul.msk.f32.gmra.mxu3 %vm270_vm1, %v1178_v55 }
  0xaf   : > { %3595 = vmatmul.msk.f32.gmra.mxu1 %vm270_vm1, %v321_v56  ;;  %3708 = vmatmul.msk.f32.gmra.mxu0 %vm270_vm1, %v1488_v57  ;;  %v331_v57 = vld [vmem:[#allocation2 + $0x80] sm:$0xff] }
  0xb1   : > { %3633 = vmatmul.msk.f32.gmra.mxu2 %vm270_vm1, %v1177_v52 }
  0xb3   : > { %3671 = vmatmul.msk.f32.gmra.mxu3 %vm270_vm1, %v1179_v58 }
  0xb4   : > { %v4400_v59 = vpop.f32.mrf.mxu1 }
  0xb7   : > { %3596 = vmatmul.msk.f32.gmra.mxu1 %vm270_vm1, %v322_v60  ;;  %3709 = vmatmul.msk.f32.gmra.mxu0 %vm270_vm1, %v1489_v61  ;;  %v1498_v61 = vld [vmem:[#allocation2 + $0x8b] sm:$0xff] }
  0xb9   : > { %3634 = vmatmul.msk.f32.gmra.mxu2 %vm270_vm1, %v1178_v55  ;;  %v1188_v55 = vld [vmem:[#allocation2 + $0x8a] sm:$0xff] }
  0xbb   : > { %3672 = vmatmul.msk.f32.gmra.mxu3 %vm270_vm1, %v1180_v62 }
  0xbc   : > { %v4406_v63 = vpop.f32.mrf.mxu1  ;;  %v4408_v1 = vpop.f32.mrf.mxu2 }
  0xbd   : > { %v4410_v2 = vpop.f32.mrf.mxu0 }
  0xbe   : > { %v4412_v4 = vpop.f32.mrf.mxu3 }
  0xbf   : > { %3597 = vmatmul.msk.f32.gmra.mxu1 %vm270_vm1, %v323_v0  ;;  %3710 = vmatmul.msk.f32.gmra.mxu0 %vm270_vm1, %v1490_v3  ;;  %v1189_v0 = vld [vmem:[#allocation2 + $0x92] sm:$0xff] }
  0xc1   : > { %3635 = vmatmul.msk.f32.gmra.mxu2 %vm270_vm1, %v1179_v58 }
  0xc3   : > { %3673 = vmatmul.msk.f32.gmra.mxu3 %vm270_vm1, %v1181_v6 }
  0xc4   : > { %v4418_v7 = vpop.f32.mrf.mxu1  ;;  %v4420_v9 = vpop.f32.mrf.mxu2 }
  0xc5   : > { %v4422_v11 = vpop.f32.mrf.mxu0 }
  0xc6   : > { %v4424_v13 = vpop.f32.mrf.mxu3 }
  0xc7   : > { %3598 = vmatmul.msk.f32.gmra.mxu1 %vm270_vm1, %v324_v8  ;;  %3711 = vmatmul.msk.f32.gmra.mxu0 %vm270_vm1, %v1491_v12  ;;  %v332_v8 = vld [vmem:[#allocation2 + $0x88] sm:$0xff] }
  0xc9   : > { %3636 = vmatmul.msk.f32.gmra.mxu2 %vm270_vm1, %v1180_v62 }
  0xcb   : > { %3674 = vmatmul.msk.f32.gmra.mxu3 %vm270_vm1, %v1182_v14 }
  0xcc   : > { %v4430_v15 = vpop.f32.mrf.mxu1  ;;  %v4432_v5 = vpop.f32.mrf.mxu2 }
  0xcd   : > { %v4434_v17 = vpop.f32.mrf.mxu0 }
  0xce   : > { %v4436_v19 = vpop.f32.mrf.mxu3 }
  0xcf   : > { %3599 = vmatmul.msk.f32.gmra.mxu1 %vm270_vm1, %v325_v16  ;;  %3712 = vmatmul.msk.f32.gmra.mxu0 %vm270_vm1, %v1492_v18  ;;  %v1499_v16 = vld [vmem:[#allocation2 + $0x93] sm:$0xff] }
  0xd1   : > { %3637 = vmatmul.msk.f32.gmra.mxu2 %vm270_vm1, %v1181_v6 }
  0xd3   : > { %3675 = vmatmul.msk.f32.gmra.mxu3 %vm270_vm1, %v1183_v20 }
  0xd4   : > { %v4442_v21 = vpop.f32.mrf.mxu1  ;;  %v4444_v23 = vpop.f32.mrf.mxu2 }
  0xd5   : > { %v4446_v24 = vpop.f32.mrf.mxu0 }
  0xd6   : > { %v4448_v26 = vpop.f32.mrf.mxu3 }
  0xd7   : > { %3600 = vmatmul.msk.f32.gmra.mxu1 %vm270_vm1, %v326_v22  ;;  %3713 = vmatmul.msk.f32.gmra.mxu0 %vm270_vm1, %v1493_v25  ;;  %v1190_v25 = vld [vmem:[#allocation2 + $0x9a] sm:$0xff] }
  0xd9   : > { %3638 = vmatmul.msk.f32.gmra.mxu2 %vm270_vm1, %v1182_v14 }
  0xdb   : > { %3676 = vmatmul.msk.f32.gmra.mxu3 %vm270_vm1, %v1184_v27 }
  0xdc   : > { %v4454_v28 = vpop.f32.mrf.mxu1  ;;  %v4456_v30 = vpop.f32.mrf.mxu2 }
  0xdd   : > { %v4458_v31 = vpop.f32.mrf.mxu0 }
  0xde   : > { %v4460_v33 = vpop.f32.mrf.mxu3 }
  0xdf   : > { %3601 = vmatmul.msk.f32.gmra.mxu1 %vm270_vm1, %v327_v29  ;;  %3714 = vmatmul.msk.f32.gmra.mxu0 %vm270_vm1, %v1494_v32  ;;  %v333_v32 = vld [vmem:[#allocation2 + $0x90] sm:$0xff] }
  0xe1   : > { %3639 = vmatmul.msk.f32.gmra.mxu2 %vm270_vm1, %v1183_v20 }
  0xe3   : > { %3677 = vmatmul.msk.f32.gmra.mxu3 %vm270_vm1, %v1185_v34 }
  0xe4   : > { %v4466_v35 = vpop.f32.mrf.mxu1  ;;  %v4468_v37 = vpop.f32.mrf.mxu2 }
  0xe5   : > { %v4470_v38 = vpop.f32.mrf.mxu0 }
  0xe6   : > { %v4472_v40 = vpop.f32.mrf.mxu3 }
  0xe7   : > { %3602 = vmatmul.msk.f32.gmra.mxu1 %vm270_vm1, %v328_v36  ;;  %3715 = vmatmul.msk.f32.gmra.mxu0 %vm270_vm1, %v1495_v39  ;;  %v1500_v39 = vld [vmem:[#allocation2 + $0x9b] sm:$0xff] }
  0xe9   : > { %3640 = vmatmul.msk.f32.gmra.mxu2 %vm270_vm1, %v1184_v27 }
  0xeb   : > { %3678 = vmatmul.msk.f32.gmra.mxu3 %vm270_vm1, %v1186_v41 }
  0xec   : > { %v4478_v42 = vpop.f32.mrf.mxu1  ;;  %v4480_v44 = vpop.f32.mrf.mxu2 }
  0xed   : > { %v4482_v45 = vpop.f32.mrf.mxu0 }
  0xee   : > { %v4484_v47 = vpop.f32.mrf.mxu3 }
  0xef   : > { %3603 = vmatmul.msk.f32.gmra.mxu1 %vm270_vm1, %v329_v43  ;;  %3716 = vmatmul.msk.f32.gmra.mxu0 %vm270_vm1, %v1496_v46 }
  0xf1   : > { %3641 = vmatmul.msk.f32.gmra.mxu2 %vm270_vm1, %v1185_v34 }
  0xf3   : > { %3679 = vmatmul.msk.f32.gmra.mxu3 %vm270_vm1, %v1187_v48 }
  0xf4   : > { %v4490_v49 = vpop.f32.mrf.mxu1  ;;  %v4492_v51 = vpop.f32.mrf.mxu2 }
  0xf5   : > { %v4494_v52 = vpop.f32.mrf.mxu0 }
  0xf6   : > { %v4496_v54 = vpop.f32.mrf.mxu3 }
  0xf7   : > { %3604 = vmatmul.msk.f32.gmra.mxu1 %vm270_vm1, %v330_v50  ;;  %3717 = vmatmul.msk.f32.gmra.mxu0 %vm270_vm1, %v1497_v53 }
  0xf9   : > { %3642 = vmatmul.msk.f32.gmra.mxu2 %vm270_vm1, %v1186_v41 }
  0xfb   : > { %3680 = vmatmul.msk.f32.gmra.mxu3 %vm270_vm1, %v1188_v55 }
  0xfc   : > { %v755_v56 = vpop.f32.mrf.mxu1  ;;  %v4502_v58 = vpop.f32.mrf.mxu2 }
  0xfd   : > { %v4504_v60 = vpop.f32.mrf.mxu0  ;;  %v756_v3 = vadd.f32 %v755_v56, %v4410_v2 }
  0xfe   : > { %v4506_v62 = vpop.f32.mrf.mxu3 }
  0xff   : > { %3605 = vmatmul.msk.f32.gmra.mxu1 %vm270_vm1, %v331_v57  ;;  %3718 = vmatmul.msk.f32.gmra.mxu0 %vm270_vm1, %v1498_v61  ;;  %v1501_v61 = vld [vmem:[#allocation2 + $0xa3] sm:$0xff] }
 0x101   : > { %3643 = vmatmul.msk.f32.gmra.mxu2 %vm270_vm1, %v1187_v48  ;;  %v1191_v48 = vld [vmem:[#allocation2 + $0xa2] sm:$0xff] }
 0x103   : > { %3681 = vmatmul.msk.f32.gmra.mxu3 %vm270_vm1, %v1189_v0 }
 0x104   : > { %v758_v6 = vpop.f32.mrf.mxu1  ;;  %v1029_v12 = vpop.f32.mrf.mxu2 }
 0x105   : > { %v1649_v14 = vpop.f32.mrf.mxu0  ;;  %v1137_v18 = vadd.f32 %v1029_v12, %v756_v3  ;;  %v759_v2 = vadd.f32 %v758_v6, %v4422_v11  ;;  %v1192_v12 = vld [vmem:[#allocation2 + $0xaa] sm:$0xff] }
 0x106   : > { %v1339_v20 = vpop.f32.mrf.mxu3 }
 0x107   : > { %3606 = vmatmul.msk.f32.gmra.mxu1 %vm270_vm1, %v332_v8  ;;  %v1447_v22 = vadd.f32 %v1339_v20, %v1137_v18  ;;  %3719 = vmatmul.msk.f32.gmra.mxu0 %vm270_vm1, %v1499_v16  ;;  %v335_v16 = vld [vmem:[#allocation2 + $0xa0] sm:$0xff] }
 0x109   : > { %v4515_v27 = vadd.f32 %v1649_v14, %v1447_v22  ;;  %3644 = vmatmul.msk.f32.gmra.mxu2 %vm270_vm1, %v1188_v55  ;;  %v334_v55 = vld [vmem:[#allocation2 + $0x98] sm:$0xff]  ;;  %v1502_v22 = vld [vmem:[#allocation2 + $0xab] sm:$0xff] }
 0x10b   : > { %3682 = vmatmul.msk.f32.gmra.mxu3 %vm270_vm1, %v1190_v25 }
 0x10c   : > { %v761_v29 = vpop.f32.mrf.mxu1  ;;  %v1032_v34 = vpop.f32.mrf.mxu2 }
 0x10d   : > { %v1652_v36 = vpop.f32.mrf.mxu0  ;;  %v1138_v41 = vadd.f32 %v1032_v34, %v759_v2  ;;  %v762_v11 = vadd.f32 %v761_v29, %v4434_v17  ;;  %v1193_v34 = vld [vmem:[#allocation2 + $0xb2] sm:$0xff] }
 0x10e   : > { %v1342_v43 = vpop.f32.mrf.mxu3 }
 0x10f   : > { %3607 = vmatmul.msk.f32.gmra.mxu1 %vm270_vm1, %v333_v32  ;;  %v1448_v46 = vadd.f32 %v1342_v43, %v1138_v41  ;;  %3720 = vmatmul.msk.f32.gmra.mxu0 %vm270_vm1, %v1500_v39  ;;  %v336_v39 = vld [vmem:[#allocation2 + $0xa8] sm:$0xff] }
 0x111   : > { %v4522_v50 = vadd.f32 %v1652_v36, %v1448_v46  ;;  %3645 = vmatmul.msk.f32.gmra.mxu2 %vm270_vm1, %v1189_v0  ;;  %v1503_v46 = vld [vmem:[#allocation2 + $0xb3] sm:$0xff] }
 0x113   : > { %3683 = vmatmul.msk.f32.gmra.mxu3 %vm270_vm1, %v1191_v48 }
 0x114   : > { %v764_v53 = vpop.f32.mrf.mxu1  ;;  %v1035_v56 = vpop.f32.mrf.mxu2 }
 0x115   : > { %v1655_v57 = vpop.f32.mrf.mxu0  ;;  %v1139_v3 = vadd.f32 %v1035_v56, %v762_v11  ;;  %v765_v17 = vadd.f32 %v764_v53, %v4446_v24  ;;  %v1194_v56 = vld [vmem:[#allocation2 + $0xba] sm:$0xff] }
 0x116   : > { %v1345_v6 = vpop.f32.mrf.mxu3 }
 0x117   : > { %3608 = vmatmul.msk.f32.gmra.mxu1 %vm270_vm1, %v334_v55  ;;  %v1449_v8 = vadd.f32 %v1345_v6, %v1139_v3  ;;  %3721 = vmatmul.msk.f32.gmra.mxu0 %vm270_vm1, %v1501_v61  ;;  %v337_v61 = vld [vmem:[#allocation2 + $0xb0] sm:$0xff] }
 0x119   : > { %v4529_v14 = vadd.f32 %v1655_v57, %v1449_v8  ;;  %3646 = vmatmul.msk.f32.gmra.mxu2 %vm270_vm1, %v1190_v25  ;;  %v1504_v8 = vld [vmem:[#allocation2 + $0xbb] sm:$0xff] }
 0x11b   : > { %3684 = vmatmul.msk.f32.gmra.mxu3 %vm270_vm1, %v1192_v12 }
 0x11c   : > { %v767_v0 = vpop.f32.mrf.mxu1  ;;  %v1038_v18 = vpop.f32.mrf.mxu2 }
 0x11d   : > { %v1658_v20 = vpop.f32.mrf.mxu0  ;;  %v1140_v2 = vadd.f32 %v1038_v18, %v765_v17  ;;  %v768_v24 = vadd.f32 %v767_v0, %v4458_v31  ;;  %v1195_v18 = vld [vmem:[#allocation2 + $0xc2] sm:$0xff] }
 0x11e   : > { %v1348_v29 = vpop.f32.mrf.mxu3 }
 0x11f   : > { %3609 = vmatmul.msk.f32.gmra.mxu1 %vm270_vm1, %v335_v16  ;;  %v1450_v32 = vadd.f32 %v1348_v29, %v1140_v2  ;;  %3722 = vmatmul.msk.f32.gmra.mxu0 %vm270_vm1, %v1502_v22  ;;  %v338_v22 = vld [vmem:[#allocation2 + $0xb8] sm:$0xff] }
 0x121   : > { %v4536_v36 = vadd.f32 %v1658_v20, %v1450_v32  ;;  %3647 = vmatmul.msk.f32.gmra.mxu2 %vm270_vm1, %v1191_v48  ;;  %v1505_v32 = vld [vmem:[#allocation2 + $0xc3] sm:$0xff] }
 0x123   : > { %3685 = vmatmul.msk.f32.gmra.mxu3 %vm270_vm1, %v1193_v34 }
 0x124   : > { %v770_v25 = vpop.f32.mrf.mxu1  ;;  %v1041_v41 = vpop.f32.mrf.mxu2 }
 0x125   : > { %v1661_v43 = vpop.f32.mrf.mxu0  ;;  %v1141_v11 = vadd.f32 %v1041_v41, %v768_v24  ;;  %v771_v31 = vadd.f32 %v770_v25, %v4470_v38  ;;  %v1196_v41 = vld [vmem:[#allocation2 + $0xca] sm:$0xff] }
 0x126   : > { %v1351_v53 = vpop.f32.mrf.mxu3 }
 0x127   : > { %3610 = vmatmul.msk.f32.gmra.mxu1 %vm270_vm1, %v336_v39  ;;  %v1451_v55 = vadd.f32 %v1351_v53, %v1141_v11  ;;  %3723 = vmatmul.msk.f32.gmra.mxu0 %vm270_vm1, %v1503_v46  ;;  %v339_v46 = vld [vmem:[#allocation2 + $0xc0] sm:$0xff] }
 0x129   : > { %v4543_v57 = vadd.f32 %v1661_v43, %v1451_v55  ;;  %3648 = vmatmul.msk.f32.gmra.mxu2 %vm270_vm1, %v1192_v12  ;;  %v1506_v55 = vld [vmem:[#allocation2 + $0xcb] sm:$0xff] }
 0x12b   : > { %3686 = vmatmul.msk.f32.gmra.mxu3 %vm270_vm1, %v1194_v56 }
 0x12c   : > { %v773_v48 = vpop.f32.mrf.mxu1  ;;  %v1044_v3 = vpop.f32.mrf.mxu2 }
 0x12d   : > { %v1664_v6 = vpop.f32.mrf.mxu0  ;;  %v1142_v17 = vadd.f32 %v1044_v3, %v771_v31  ;;  %v774_v38 = vadd.f32 %v773_v48, %v4482_v45  ;;  %v1197_v3 = vld [vmem:[#allocation2 + $0xd2] sm:$0xff] }
 0x12e   : > { %v1354_v0 = vpop.f32.mrf.mxu3 }
 0x12f   : > { %3611 = vmatmul.msk.f32.gmra.mxu1 %vm270_vm1, %v337_v61  ;;  %v1452_v16 = vadd.f32 %v1354_v0, %v1142_v17  ;;  %3724 = vmatmul.msk.f32.gmra.mxu0 %vm270_vm1, %v1504_v8  ;;  %v340_v8 = vld [vmem:[#allocation2 + $0xc8] sm:$0xff] }
 0x131   : > { %v4550_v20 = vadd.f32 %v1664_v6, %v1452_v16  ;;  %3649 = vmatmul.msk.f32.gmra.mxu2 %vm270_vm1, %v1193_v34  ;;  %v1507_v16 = vld [vmem:[#allocation2 + $0xd3] sm:$0xff] }
 0x133   : > { %3687 = vmatmul.msk.f32.gmra.mxu3 %vm270_vm1, %v1195_v18 }
 0x134   : > { %v776_v12 = vpop.f32.mrf.mxu1  ;;  %v1047_v2 = vpop.f32.mrf.mxu2 }
 0x135   : > { %v1667_v29 = vpop.f32.mrf.mxu0  ;;  %v1143_v24 = vadd.f32 %v1047_v2, %v774_v38  ;;  %v777_v45 = vadd.f32 %v776_v12, %v4494_v52  ;;  %v1198_v2 = vld [vmem:[#allocation2 + $0xda] sm:$0xff] }
 0x136   : > { %v1357_v25 = vpop.f32.mrf.mxu3 }
 0x137   : > { %3612 = vmatmul.msk.f32.gmra.mxu1 %vm270_vm1, %v338_v22  ;;  %v1453_v39 = vadd.f32 %v1357_v25, %v1143_v24  ;;  %3725 = vmatmul.msk.f32.gmra.mxu0 %vm270_vm1, %v1505_v32  ;;  %v341_v32 = vld [vmem:[#allocation2 + $0xd0] sm:$0xff] }
 0x139   : > { %v4557_v43 = vadd.f32 %v1667_v29, %v1453_v39  ;;  %3650 = vmatmul.msk.f32.gmra.mxu2 %vm270_vm1, %v1194_v56  ;;  %v1508_v39 = vld [vmem:[#allocation2 + $0xdb] sm:$0xff] }
 0x13b   : > { %3688 = vmatmul.msk.f32.gmra.mxu3 %vm270_vm1, %v1196_v41 }
 0x13c   : > { %v779_v34 = vpop.f32.mrf.mxu1  ;;  %v1050_v11 = vpop.f32.mrf.mxu2 }
 0x13d   : > { %v1670_v53 = vpop.f32.mrf.mxu0  ;;  %v1144_v31 = vadd.f32 %v1050_v11, %v777_v45  ;;  %v780_v52 = vadd.f32 %v779_v34, %v4504_v60  ;;  %v1199_v11 = vld [vmem:[#allocation2 + $0xe2] sm:$0xff] }
 0x13e   : > { %v1360_v48 = vpop.f32.mrf.mxu3 }
 0x13f   : > { %3613 = vmatmul.msk.f32.gmra.mxu1 %vm270_vm1, %v339_v46  ;;  %v1454_v61 = vadd.f32 %v1360_v48, %v1144_v31  ;;  %3726 = vmatmul.msk.f32.gmra.mxu0 %vm270_vm1, %v1506_v55  ;;  %v342_v55 = vld [vmem:[#allocation2 + $0xd8] sm:$0xff] }
 0x141   : > { %v4564_v6 = vadd.f32 %v1670_v53, %v1454_v61  ;;  %3651 = vmatmul.msk.f32.gmra.mxu2 %vm270_vm1, %v1195_v18  ;;  %v1509_v61 = vld [vmem:[#allocation2 + $0xe3] sm:$0xff] }
 0x143   : > { %3689 = vmatmul.msk.f32.gmra.mxu3 %vm270_vm1, %v1197_v3 }
 0x144   : > { %v782_v56 = vpop.f32.mrf.mxu1  ;;  %v1053_v17 = vpop.f32.mrf.mxu2 }
 0x145   : > { %v1673_v0 = vpop.f32.mrf.mxu0  ;;  %v1145_v38 = vadd.f32 %v1053_v17, %v780_v52  ;;  %v783_v60 = vadd.f32 %v782_v56, %v4400_v59  ;;  %v1200_v17 = vld [vmem:[#allocation2 + $0xea] sm:$0xff] }
 0x146   : > { %v1363_v12 = vpop.f32.mrf.mxu3 }
 0x147   : > { %3614 = vmatmul.msk.f32.gmra.mxu1 %vm270_vm1, %v340_v8  ;;  %v1455_v22 = vadd.f32 %v1363_v12, %v1145_v38  ;;  %3727 = vmatmul.msk.f32.gmra.mxu0 %vm270_vm1, %v1507_v16  ;;  %v343_v16 = vld [vmem:[#allocation2 + $0xe0] sm:$0xff] }
 0x149   : > { %v4571_v29 = vadd.f32 %v1673_v0, %v1455_v22  ;;  %3652 = vmatmul.msk.f32.gmra.mxu2 %vm270_vm1, %v1196_v41  ;;  %v1510_v22 = vld [vmem:[#allocation2 + $0xeb] sm:$0xff] }
 0x14b   : > { %3690 = vmatmul.msk.f32.gmra.mxu3 %vm270_vm1, %v1198_v2 }
 0x14c   : > { %v785_v18 = vpop.f32.mrf.mxu1  ;;  %v1056_v24 = vpop.f32.mrf.mxu2 }
 0x14d   : > { %v1676_v25 = vpop.f32.mrf.mxu0  ;;  %v1146_v45 = vadd.f32 %v1056_v24, %v783_v60  ;;  %v786_v59 = vadd.f32 %v785_v18, %v4406_v63  ;;  %v1201_v24 = vld [vmem:[#allocation2 + $0xf2] sm:$0xff] }
 0x14e   : > { %v1366_v34 = vpop.f32.mrf.mxu3 }
 0x14f   : > { %3615 = vmatmul.msk.f32.gmra.mxu1 %vm270_vm1, %v341_v32  ;;  %v1456_v46 = vadd.f32 %v1366_v34, %v1146_v45  ;;  %3728 = vmatmul.msk.f32.gmra.mxu0 %vm270_vm1, %v1508_v39  ;;  %v344_v39 = vld [vmem:[#allocation2 + $0xe8] sm:$0xff] }
 0x151   : > { %v4578_v53 = vadd.f32 %v1676_v25, %v1456_v46  ;;  %3653 = vmatmul.msk.f32.gmra.mxu2 %vm270_vm1, %v1197_v3  ;;  %v1511_v46 = vld [vmem:[#allocation2 + $0xf3] sm:$0xff] }
 0x153   : > { %3691 = vmatmul.msk.f32.gmra.mxu3 %vm270_vm1, %v1199_v11 }
 0x154   : > { %v788_v41 = vpop.f32.mrf.mxu1  ;;  %v1059_v31 = vpop.f32.mrf.mxu2 }
 0x155   : > { %v1679_v48 = vpop.f32.mrf.mxu0  ;;  %v1147_v52 = vadd.f32 %v1059_v31, %v786_v59  ;;  %v789_v63 = vadd.f32 %v788_v41, %v4418_v7  ;;  %v1202_v31 = vld [vmem:[#allocation2 + $0xfa] sm:$0xff] }
 0x156   : > { %v1369_v56 = vpop.f32.mrf.mxu3 }
 0x157   : > { %3616 = vmatmul.msk.f32.gmra.mxu1 %vm270_vm1, %v342_v55  ;;  %v1457_v8 = vadd.f32 %v1369_v56, %v1147_v52  ;;  %3729 = vmatmul.msk.f32.gmra.mxu0 %vm270_vm1, %v1509_v61  ;;  %v345_v52 = vld [vmem:[#allocation2 + $0xf0] sm:$0xff] }
 0x159   : > { %v4585_v0 = vadd.f32 %v1679_v48, %v1457_v8  ;;  %3654 = vmatmul.msk.f32.gmra.mxu2 %vm270_vm1, %v1198_v2 }
 0x15b   : > { %3692 = vmatmul.msk.f32.gmra.mxu3 %vm270_vm1, %v1200_v17 }
 0x15c   : > { %v791_v3 = vpop.f32.mrf.mxu1  ;;  %v1062_v38 = vpop.f32.mrf.mxu2 }
 0x15d   : > { %v1682_v12 = vpop.f32.mrf.mxu0  ;;  %v1148_v60 = vadd.f32 %v1062_v38, %v789_v63  ;;  %v792_v7 = vadd.f32 %v791_v3, %v4430_v15  ;;  %v3971_v15 = vunpack.c.h.bf16 %v4328_v10  ;;  %v1512_v63 = vld [vmem:[#allocation2 + $0xfb] sm:$0xff] }
 0x15e   : > { %v1372_v18 = vpop.f32.mrf.mxu3  ;;  %v3998_v10 = vld [vmem:[%s4252_s25 + $0x98] sm:$0xff]  }
 0x15f   : > { %3617 = vmatmul.msk.f32.gmra.mxu1 %vm270_vm1, %v343_v16  ;;  %v1458_v32 = vadd.f32 %v1372_v18, %v1148_v60  ;;  %3730 = vmatmul.msk.f32.gmra.mxu0 %vm270_vm1, %v1510_v22  ;;  %308 = vst.msk [vmem:[#allocation2 + $0x128] sm:$0xff] %vm270_vm1, %v3971_v15  ;;  %v346_v18 = vld [vmem:[#allocation2 + $0xf8] sm:$0xff] }
 0x161   : > { %v4592_v25 = vadd.f32 %v1682_v12, %v1458_v32  ;;  %3655 = vmatmul.msk.f32.gmra.mxu2 %vm270_vm1, %v1199_v11 }
 0x163   : > { %3693 = vmatmul.msk.f32.gmra.mxu3 %vm270_vm1, %v1201_v24 }
 0x164   : > { %v794_v2 = vpop.f32.mrf.mxu1  ;;  %v1065_v45 = vpop.f32.mrf.mxu2 }
 0x165   : > { %v1685_v34 = vpop.f32.mrf.mxu0  ;;  %v1149_v59 = vadd.f32 %v1065_v45, %v792_v7  ;;  %v795_v11 = vadd.f32 %v794_v2, %v4442_v21  ;;  %v3974_v21 = vunpack.c.l.bf16 %v3998_v10  ;;  %v1513_v2 = vld [vmem:[#allocation2 + $0x103] sm:$0xff]  ;;  %v1515_v10 = vld [vmem:[#allocation2 + $0x113] sm:$0xff] }
 0x166   : > { %v1375_v41 = vpop.f32.mrf.mxu3 }
 0x167   : > { %3618 = vmatmul.msk.f32.gmra.mxu1 %vm270_vm1, %v344_v39  ;;  %v1459_v55 = vadd.f32 %v1375_v41, %v1149_v59  ;;  %3731 = vmatmul.msk.f32.gmra.mxu0 %vm270_vm1, %v1511_v46  ;;  %309 = vst.msk [vmem:[#allocation2 + $0x130] sm:$0xff] %vm270_vm1, %v3974_v21  ;;  %v347_v41 = vld [vmem:[#allocation2 + $0x100] sm:$0xff] }
 0x169   : > { %v4599_v48 = vadd.f32 %v1685_v34, %v1459_v55  ;;  %3656 = vmatmul.msk.f32.gmra.mxu2 %vm270_vm1, %v1200_v17  ;;  %v1203_v17 = vld [vmem:[#allocation2 + $0x102] sm:$0xff] }
 0x16b   : > { %3694 = vmatmul.msk.f32.gmra.mxu3 %vm270_vm1, %v1202_v31 }
 0x16c   : > { %v797_v61 = vpop.f32.mrf.mxu1  ;;  %v1068_v56 = vpop.f32.mrf.mxu2 }
 0x16d   : > { %v1688_v8 = vpop.f32.mrf.mxu0  ;;  %v1150_v3 = vadd.f32 %v1068_v56, %v795_v11  ;;  %v798_v22 = vadd.f32 %v797_v61, %v4454_v28  ;;  %v1514_v11 = vld [vmem:[#allocation2 + $0x10b] sm:$0xff] }
 0x16e   : > { %v1378_v16 = vpop.f32.mrf.mxu3 }
 0x16f   : > { %3619 = vmatmul.msk.f32.gmra.mxu1 %vm270_vm1, %v345_v52  ;;  %v1460_v38 = vadd.f32 %v1378_v16, %v1150_v3  ;;  %3732 = vmatmul.msk.f32.gmra.mxu0 %vm270_vm1, %v1512_v63  ;;  %v348_v3 = vld [vmem:[#allocation2 + $0x108] sm:$0xff] }
 0x171   : > { %v4609_v12 = vadd.f32 %v1688_v8, %v1460_v38  ;;  %3657 = vmatmul.msk.f32.gmra.mxu2 %vm270_vm1, %v1201_v24  ;;  %v1204_v24 = vld [vmem:[#allocation2 + $0x10a] sm:$0xff]  ;;  %v1205_v8 = vld [vmem:[#allocation2 + $0x112] sm:$0xff] }
 0x173   : > { %3695 = vmatmul.msk.f32.gmra.mxu3 %vm270_vm1, %v1203_v17 }
 0x174   : > { %v800_v60 = vpop.f32.mrf.mxu1  ;;  %v1071_v32 = vpop.f32.mrf.mxu2 }
 0x175   : > { %v1691_v7 = vpop.f32.mrf.mxu0  ;;  %v1151_v39 = vadd.f32 %v1071_v32, %v798_v22  ;;  %v801_v28 = vadd.f32 %v800_v60, %v4466_v35 }
 0x176   : > { %v1381_v45 = vpop.f32.mrf.mxu3 }
 0x177   : > { %3620 = vmatmul.msk.f32.gmra.mxu1 %vm270_vm1, %v346_v18  ;;  %v1461_v34 = vadd.f32 %v1381_v45, %v1151_v39  ;;  %3733 = vmatmul.msk.f32.gmra.mxu0 %vm270_vm1, %v1513_v2  ;;  %v1206_v18 = vld [vmem:[#allocation2 + $0x11a] sm:$0xff] }
 0x178   : > { %v1516_v45 = vld [vmem:[#allocation2 + $0x11b] sm:$0xff] }
 0x179   : > { %v4617_v46 = vadd.f32 %v1691_v7, %v1461_v34  ;;  %3658 = vmatmul.msk.f32.gmra.mxu2 %vm270_vm1, %v1202_v31  ;;  %v349_v7 = vld [vmem:[#allocation2 + $0x110] sm:$0xff] }
 0x17b   : > { %3696 = vmatmul.msk.f32.gmra.mxu3 %vm270_vm1, %v1204_v24 }
 0x17c   : > { %v803_v59 = vpop.f32.mrf.mxu1  ;;  %v1074_v55 = vpop.f32.mrf.mxu2 }
 0x17d   : > { %v1694_v15 = vpop.f32.mrf.mxu0  ;;  %v1152_v61 = vadd.f32 %v1074_v55, %v801_v28  ;;  %v804_v35 = vadd.f32 %v803_v59, %v4478_v42 }
 0x17e   : > { %v1384_v52 = vpop.f32.mrf.mxu3 }
 0x17f   : > { %3621 = vmatmul.msk.f32.gmra.mxu1 %vm270_vm1, %v347_v41  ;;  %v1462_v56 = vadd.f32 %v1384_v52, %v1152_v61  ;;  %3734 = vmatmul.msk.f32.gmra.mxu0 %vm270_vm1, %v1514_v11  ;;  %v1207_v41 = vld [vmem:[#allocation2 + $0x122] sm:$0xff] }
 0x180   : > { %v1517_v52 = vld [vmem:[#allocation2 + $0x123] sm:$0xff] }
 0x181   : > { %v4624_v63 = vadd.f32 %v1694_v15, %v1462_v56  ;;  %3659 = vmatmul.msk.f32.gmra.mxu2 %vm270_vm1, %v1203_v17  ;;  %v350_v15 = vld [vmem:[#allocation2 + $0x118] sm:$0xff] }
 0x183   : > { %3697 = vmatmul.msk.f32.gmra.mxu3 %vm270_vm1, %v1205_v8 }
 0x184   : > { %v806_v31 = vpop.f32.mrf.mxu1  ;;  %v1077_v16 = vpop.f32.mrf.mxu2 }
 0x185   : > { %v1697_v38 = vpop.f32.mrf.mxu0  ;;  %v1153_v21 = vadd.f32 %v1077_v16, %v804_v35  ;;  %v807_v42 = vadd.f32 %v806_v31, %v4490_v49 }
 0x186   : > { %v1387_v22 = vpop.f32.mrf.mxu3 }
 0x187   : > { %3622 = vmatmul.msk.f32.gmra.mxu1 %vm270_vm1, %v348_v3  ;;  %v1463_v60 = vadd.f32 %v1387_v22, %v1153_v21  ;;  %3735 = vmatmul.msk.f32.gmra.mxu0 %vm270_vm1, %v1515_v10  ;;  %v1208_v3 = vld [vmem:[#allocation2 + $0x12a] sm:$0xff] }
 0x188   : > { %v1518_v22 = vld [vmem:[#allocation2 + $0x12b] sm:$0xff] }
 0x189   : > { %v4631_v32 = vadd.f32 %v1697_v38, %v1463_v60  ;;  %3660 = vmatmul.msk.f32.gmra.mxu2 %vm270_vm1, %v1204_v24  ;;  %v1793_v38 = vld [vmem:[#allocation2 + $0x14] sm:$0xff] }
 0x18b   : > { %3698 = vmatmul.msk.f32.gmra.mxu3 %vm270_vm1, %v1206_v18 }
 0x18c   : > { %v809_v17 = vpop.f32.mrf.mxu1  ;;  %v1080_v2 = vpop.f32.mrf.mxu2 }
 0x18d   : > { %v1700_v39 = vpop.f32.mrf.mxu0  ;;  %v1154_v34 = vadd.f32 %v1080_v2, %v807_v42  ;;  %v810_v49 = vadd.f32 %v809_v17, %v4408_v1  ;;  %v2103_v17 = vld [vmem:[#allocation2 + $0x24] sm:$0xff] }
 0x18e   : > { %v1390_v28 = vpop.f32.mrf.mxu3  ;;  %v2413_v2 = vld [vmem:[#allocation2 + $0x25] sm:$0xff] }
 0x18f   : > { %3623 = vmatmul.msk.f32.gmra.mxu1 %vm270_vm1, %v349_v7  ;;  %v1464_v59 = vadd.f32 %v1390_v28, %v1154_v34  ;;  %3736 = vmatmul.msk.f32.gmra.mxu0 %vm270_vm1, %v1516_v45  ;;  %v1794_v45 = vld [vmem:[#allocation2 + $0x1c] sm:$0xff] }
 0x191   : > { %v4638_v55 = vadd.f32 %v1700_v39, %v1464_v59  ;;  %3661 = vmatmul.msk.f32.gmra.mxu2 %vm270_vm1, %v1205_v8  ;;  %v2723_v59 = vld [vmem:[#allocation2 + $0x26] sm:$0xff] }
 0x193   : > { %3699 = vmatmul.msk.f32.gmra.mxu3 %vm270_vm1, %v1207_v41 }
 0x194   : > { %v812_v24 = vpop.f32.mrf.mxu1  ;;  %v1083_v11 = vpop.f32.mrf.mxu2 }
 0x195   : > { %v1703_v61 = vpop.f32.mrf.mxu0  ;;  %v1155_v56 = vadd.f32 %v1083_v11, %v810_v49  ;;  %v813_v1 = vadd.f32 %v812_v24, %v4420_v9  ;;  %v2104_v24 = vld [vmem:[#allocation2 + $0x2c] sm:$0xff] }
 0x196   : > { %v1393_v35 = vpop.f32.mrf.mxu3  ;;  %v2414_v11 = vld [vmem:[#allocation2 + $0x2d] sm:$0xff] }
 0x197   : > { %3624 = vmatmul.msk.f32.gmra.mxu1 %vm270_vm1, %v350_v15  ;;  %v1465_v31 = vadd.f32 %v1393_v35, %v1155_v56  ;;  %3737 = vmatmul.msk.f32.gmra.mxu0 %vm270_vm1, %v1517_v52 }
 0x199   : > { %v4645_v16 = vadd.f32 %v1703_v61, %v1465_v31  ;;  %3662 = vmatmul.msk.f32.gmra.mxu2 %vm270_vm1, %v1206_v18  ;;  %v2724_v31 = vld [vmem:[#allocation2 + $0x2e] sm:$0xff] }
 0x19b   : > { %3700 = vmatmul.msk.f32.gmra.mxu3 %vm270_vm1, %v1208_v3 }
 0x19c   : > { %v815_v8 = vpop.f32.mrf.mxu1  ;;  %v1086_v10 = vpop.f32.mrf.mxu2 }
 0x19d   : > { %v1706_v21 = vpop.f32.mrf.mxu0  ;;  %v1156_v60 = vadd.f32 %v1086_v10, %v813_v1  ;;  %v816_v9 = vadd.f32 %v815_v8, %v4432_v5  ;;  %v2105_v8 = vld [vmem:[#allocation2 + $0x34] sm:$0xff] }
 0x19e   : > { %v1396_v42 = vpop.f32.mrf.mxu3  ;;  %v2415_v10 = vld [vmem:[#allocation2 + $0x35] sm:$0xff] }
 0x19f   : > { %3741 = vmatmul.msk.f32.vlgmr.msra.gmra.mxu1 %vm270_vm1, %v1793_v38  ;;  %v1466_v7 = vadd.f32 %v1396_v42, %v1156_v60  ;;  %3738 = vmatmul.msk.f32.gmra.mxu0 %vm270_vm1, %v1518_v22 }
 0x1a1   : > { %v4652_v39 = vadd.f32 %v1706_v21, %v1466_v7  ;;  %3779 = vmatmul.msk.f32.vlgmr.msra.gmra.mxu2 %vm270_vm1, %v2103_v17  ;;  %v2725_v7 = vld [vmem:[#allocation2 + $0x36] sm:$0xff] }
 0x1a3   : > { %3817 = vmatmul.msk.f32.vlgmr.msra.gmra.mxu3 %vm270_vm1, %v2413_v2 }
 0x1a4   : > { %v818_v18 = vpop.f32.mrf.mxu1  ;;  %v1089_v34 = vpop.f32.mrf.mxu2 }
 0x1a5   : > { %v1709_v28 = vpop.f32.mrf.mxu0  ;;  %v1157_v41 = vadd.f32 %v1089_v34, %v816_v9  ;;  %v819_v5 = vadd.f32 %v818_v18, %v4444_v23 }
 0x1a6   : > { %v1399_v49 = vpop.f32.mrf.mxu3 }
 0x1a7   : > { %3742 = vmatmul.msk.f32.gmra.mxu1 %vm270_vm1, %v1794_v45  ;;  %v1467_v15 = vadd.f32 %v1399_v49, %v1157_v41  ;;  %3855 = vmatmul.msk.f32.vlgmr.msra.gmra.mxu0 %vm270_vm1, %v2723_v59  ;;  %v2416_v45 = vld [vmem:[#allocation2 + $0x3d] sm:$0xff] }
 0x1a8   : > { %v2726_v49 = vld [vmem:[#allocation2 + $0x3e] sm:$0xff] }
 0x1a9   : > { %v4659_v61 = vadd.f32 %v1709_v28, %v1467_v15  ;;  %3780 = vmatmul.msk.f32.gmra.mxu2 %vm270_vm1, %v2104_v24 }
 0x1ab   : > { %3818 = vmatmul.msk.f32.gmra.mxu3 %vm270_vm1, %v2414_v11 }
 0x1ac   : > { %v821_v52 = vpop.f32.mrf.mxu1  ;;  %v1092_v56 = vpop.f32.mrf.mxu2 }
 0x1ad   : > { %v1712_v35 = vpop.f32.mrf.mxu0  ;;  %v1158_v3 = vadd.f32 %v1092_v56, %v819_v5  ;;  %v822_v23 = vadd.f32 %v821_v52, %v4456_v30  ;;  %v2417_v52 = vld [vmem:[#allocation2 + $0x45] sm:$0xff] }
 0x1ae   : > { %v1402_v1 = vpop.f32.mrf.mxu3 }
 0x1af   : > { %3743 = vmatmul.msk.f32.gmra.mxu1 %vm270_vm1, %v2103_v17  ;;  %v1468_v38 = vadd.f32 %v1402_v1, %v1158_v3  ;;  %3856 = vmatmul.msk.f32.gmra.mxu0 %vm270_vm1, %v2724_v31  ;;  %v2106_v17 = vld [vmem:[#allocation2 + $0x3c] sm:$0xff]  ;;  %v2727_v1 = vld [vmem:[#allocation2 + $0x46] sm:$0xff] }
 0x1b1   : > { %v4666_v21 = vadd.f32 %v1712_v35, %v1468_v38  ;;  %3781 = vmatmul.msk.f32.gmra.mxu2 %vm270_vm1, %v2105_v8 }
 0x1b3   : > { %3819 = vmatmul.msk.f32.gmra.mxu3 %vm270_vm1, %v2415_v10 }
 0x1b4   : > { %v824_v22 = vpop.f32.mrf.mxu1  ;;  %v1095_v60 = vpop.f32.mrf.mxu2 }
 0x1b5   : > { %v1715_v42 = vpop.f32.mrf.mxu0  ;;  %v1159_v2 = vadd.f32 %v1095_v60, %v822_v23  ;;  %v825_v30 = vadd.f32 %v824_v22, %v4468_v37  ;;  %v2418_v22 = vld [vmem:[#allocation2 + $0x4d] sm:$0xff] }
 0x1b6   : > { %v1405_v9 = vpop.f32.mrf.mxu3 }
 0x1b7   : > { %3744 = vmatmul.msk.f32.gmra.mxu1 %vm270_vm1, %v2104_v24  ;;  %v1469_v18 = vadd.f32 %v1405_v9, %v1159_v2  ;;  %3857 = vmatmul.msk.f32.gmra.mxu0 %vm270_vm1, %v2725_v7  ;;  %v2107_v24 = vld [vmem:[#allocation2 + $0x44] sm:$0xff]  ;;  %v2728_v9 = vld [vmem:[#allocation2 + $0x4e] sm:$0xff] }
 0x1b9   : > { %v4673_v34 = vadd.f32 %v1715_v42, %v1469_v18  ;;  %3782 = vmatmul.msk.f32.gmra.mxu2 %vm270_vm1, %v2106_v17 }
 0x1bb   : > { %3820 = vmatmul.msk.f32.gmra.mxu3 %vm270_vm1, %v2416_v45 }
 0x1bc   : > { %v827_v28 = vpop.f32.mrf.mxu1  ;;  %v1098_v59 = vpop.f32.mrf.mxu2 }
 0x1bd   : > { %v1718_v41 = vpop.f32.mrf.mxu0  ;;  %v1160_v15 = vadd.f32 %v1098_v59, %v825_v30  ;;  %v828_v37 = vadd.f32 %v827_v28, %v4480_v44  ;;  %v2419_v28 = vld [vmem:[#allocation2 + $0x55] sm:$0xff] }
 0x1be   : > { %v1408_v11 = vpop.f32.mrf.mxu3 }
 0x1bf   : > { %3745 = vmatmul.msk.f32.gmra.mxu1 %vm270_vm1, %v2105_v8  ;;  %v1470_v5 = vadd.f32 %v1408_v11, %v1160_v15  ;;  %3858 = vmatmul.msk.f32.gmra.mxu0 %vm270_vm1, %v2726_v49  ;;  %v2108_v8 = vld [vmem:[#allocation2 + $0x4c] sm:$0xff]  ;;  %v2729_v11 = vld [vmem:[#allocation2 + $0x56] sm:$0xff] }
 0x1c1   : > { %v4680_v56 = vadd.f32 %v1718_v41, %v1470_v5  ;;  %3783 = vmatmul.msk.f32.gmra.mxu2 %vm270_vm1, %v2107_v24 }
 0x1c3   : > { %3821 = vmatmul.msk.f32.gmra.mxu3 %vm270_vm1, %v2417_v52 }
 0x1c4   : > { %v830_v35 = vpop.f32.mrf.mxu1  ;;  %v1101_v31 = vpop.f32.mrf.mxu2 }
 0x1c5   : > { %v1721_v3 = vpop.f32.mrf.mxu0  ;;  %v1161_v38 = vadd.f32 %v1101_v31, %v828_v37  ;;  %v831_v44 = vadd.f32 %v830_v35, %v4492_v51  ;;  %v2420_v35 = vld [vmem:[#allocation2 + $0x5d] sm:$0xff] }
 0x1c6   : > { %v1411_v10 = vpop.f32.mrf.mxu3 }
 0x1c7   : > { %3746 = vmatmul.msk.f32.gmra.mxu1 %vm270_vm1, %v2106_v17  ;;  %v1471_v23 = vadd.f32 %v1411_v10, %v1161_v38  ;;  %3859 = vmatmul.msk.f32.gmra.mxu0 %vm270_vm1, %v2727_v1  ;;  %v2109_v17 = vld [vmem:[#allocation2 + $0x54] sm:$0xff]  ;;  %v2730_v10 = vld [vmem:[#allocation2 + $0x5e] sm:$0xff] }
 0x1c9   : > { %v4687_v60 = vadd.f32 %v1721_v3, %v1471_v23  ;;  %3784 = vmatmul.msk.f32.gmra.mxu2 %vm270_vm1, %v2108_v8 }
 0x1cb   : > { %3822 = vmatmul.msk.f32.gmra.mxu3 %vm270_vm1, %v2418_v22 }
 0x1cc   : > { %v833_v42 = vpop.f32.mrf.mxu1  ;;  %v1104_v7 = vpop.f32.mrf.mxu2 }
 0x1cd   : > { %v1724_v2 = vpop.f32.mrf.mxu0  ;;  %v1162_v18 = vadd.f32 %v1104_v7, %v831_v44  ;;  %v834_v51 = vadd.f32 %v833_v42, %v4502_v58  ;;  %v2421_v42 = vld [vmem:[#allocation2 + $0x65] sm:$0xff] }
 0x1ce   : > { %v1414_v45 = vpop.f32.mrf.mxu3 }
 0x1cf   : > { %3747 = vmatmul.msk.f32.gmra.mxu1 %vm270_vm1, %v2107_v24  ;;  %v1472_v30 = vadd.f32 %v1414_v45, %v1162_v18  ;;  %3860 = vmatmul.msk.f32.gmra.mxu0 %vm270_vm1, %v2728_v9  ;;  %v2110_v24 = vld [vmem:[#allocation2 + $0x5c] sm:$0xff]  ;;  %v2731_v45 = vld [vmem:[#allocation2 + $0x66] sm:$0xff] }
 0x1d1   : > { %v4694_v59 = vadd.f32 %v1724_v2, %v1472_v30  ;;  %3785 = vmatmul.msk.f32.gmra.mxu2 %vm270_vm1, %v2109_v17 }
 0x1d3   : > { %3823 = vmatmul.msk.f32.gmra.mxu3 %vm270_vm1, %v2419_v28 }
 0x1d4   : > { %v836_v41 = vpop.f32.mrf.mxu1  ;;  %v1107_v49 = vpop.f32.mrf.mxu2 }
 0x1d5   : > { %v1727_v15 = vpop.f32.mrf.mxu0  ;;  %v1163_v5 = vadd.f32 %v1107_v49, %v834_v51  ;;  %v837_v58 = vadd.f32 %v836_v41, %v4412_v4  ;;  %v2422_v41 = vld [vmem:[#allocation2 + $0x6d] sm:$0xff] }
 0x1d6   : > { %v1417_v52 = vpop.f32.mrf.mxu3 }
 0x1d7   : > { %3748 = vmatmul.msk.f32.gmra.mxu1 %vm270_vm1, %v2108_v8  ;;  %v1473_v37 = vadd.f32 %v1417_v52, %v1163_v5  ;;  %3861 = vmatmul.msk.f32.gmra.mxu0 %vm270_vm1, %v2729_v11  ;;  %v2111_v8 = vld [vmem:[#allocation2 + $0x64] sm:$0xff]  ;;  %v2732_v52 = vld [vmem:[#allocation2 + $0x6e] sm:$0xff] }
 0x1d9   : > { %v4701_v31 = vadd.f32 %v1727_v15, %v1473_v37  ;;  %3786 = vmatmul.msk.f32.gmra.mxu2 %vm270_vm1, %v2110_v24 }
 0x1db   : > { %3824 = vmatmul.msk.f32.gmra.mxu3 %vm270_vm1, %v2420_v35 }
 0x1dc   : > { %v839_v3 = vpop.f32.mrf.mxu1  ;;  %v1110_v1 = vpop.f32.mrf.mxu2 }
 0x1dd   : > { %v1730_v38 = vpop.f32.mrf.mxu0  ;;  %v1164_v23 = vadd.f32 %v1110_v1, %v837_v58  ;;  %v840_v4 = vadd.f32 %v839_v3, %v4424_v13  ;;  %v2423_v3 = vld [vmem:[#allocation2 + $0x75] sm:$0xff] }
 0x1de   : > { %v1420_v22 = vpop.f32.mrf.mxu3 }
 0x1df   : > { %3749 = vmatmul.msk.f32.gmra.mxu1 %vm270_vm1, %v2109_v17  ;;  %v1474_v44 = vadd.f32 %v1420_v22, %v1164_v23  ;;  %3862 = vmatmul.msk.f32.gmra.mxu0 %vm270_vm1, %v2730_v10  ;;  %v2112_v17 = vld [vmem:[#allocation2 + $0x6c] sm:$0xff]  ;;  %v2733_v22 = vld [vmem:[#allocation2 + $0x76] sm:$0xff] }
 0x1e1   : > { %v4708_v7 = vadd.f32 %v1730_v38, %v1474_v44  ;;  %3787 = vmatmul.msk.f32.gmra.mxu2 %vm270_vm1, %v2111_v8 }
 0x1e3   : > { %3825 = vmatmul.msk.f32.gmra.mxu3 %vm270_vm1, %v2421_v42 }
 0x1e4   : > { %v842_v2 = vpop.f32.mrf.mxu1  ;;  %v1113_v9 = vpop.f32.mrf.mxu2 }
 0x1e5   : > { %v1733_v18 = vpop.f32.mrf.mxu0  ;;  %v1165_v30 = vadd.f32 %v1113_v9, %v840_v4  ;;  %v843_v13 = vadd.f32 %v842_v2, %v4436_v19  ;;  %v2424_v2 = vld [vmem:[#allocation2 + $0x7d] sm:$0xff] }
 0x1e6   : > { %v1423_v28 = vpop.f32.mrf.mxu3 }
 0x1e7   : > { %3750 = vmatmul.msk.f32.gmra.mxu1 %vm270_vm1, %v2110_v24  ;;  %v1475_v51 = vadd.f32 %v1423_v28, %v1165_v30  ;;  %3863 = vmatmul.msk.f32.gmra.mxu0 %vm270_vm1, %v2731_v45  ;;  %v2113_v24 = vld [vmem:[#allocation2 + $0x74] sm:$0xff]  ;;  %v2734_v28 = vld [vmem:[#allocation2 + $0x7e] sm:$0xff] }
 0x1e9   : > { %v4715_v49 = vadd.f32 %v1733_v18, %v1475_v51  ;;  %3788 = vmatmul.msk.f32.gmra.mxu2 %vm270_vm1, %v2112_v17 }
 0x1eb   : > { %3826 = vmatmul.msk.f32.gmra.mxu3 %vm270_vm1, %v2422_v41 }
 0x1ec   : > { %v845_v15 = vpop.f32.mrf.mxu1  ;;  %v1116_v11 = vpop.f32.mrf.mxu2 }
 0x1ed   : > { %v1736_v5 = vpop.f32.mrf.mxu0  ;;  %v1166_v37 = vadd.f32 %v1116_v11, %v843_v13  ;;  %v846_v19 = vadd.f32 %v845_v15, %v4448_v26  ;;  %v2425_v15 = vld [vmem:[#allocation2 + $0x85] sm:$0xff] }
 0x1ee   : > { %v1426_v35 = vpop.f32.mrf.mxu3 }
 0x1ef   : > { %3751 = vmatmul.msk.f32.gmra.mxu1 %vm270_vm1, %v2111_v8  ;;  %v1476_v58 = vadd.f32 %v1426_v35, %v1166_v37  ;;  %3864 = vmatmul.msk.f32.gmra.mxu0 %vm270_vm1, %v2732_v52  ;;  %v2114_v8 = vld [vmem:[#allocation2 + $0x7c] sm:$0xff]  ;;  %v2735_v35 = vld [vmem:[#allocation2 + $0x86] sm:$0xff] }
 0x1f1   : > { %v4722_v1 = vadd.f32 %v1736_v5, %v1476_v58  ;;  %3789 = vmatmul.msk.f32.gmra.mxu2 %vm270_vm1, %v2113_v24 }
 0x1f3   : > { %3827 = vmatmul.msk.f32.gmra.mxu3 %vm270_vm1, %v2423_v3 }
 0x1f4   : > { %v848_v38 = vpop.f32.mrf.mxu1  ;;  %v1119_v10 = vpop.f32.mrf.mxu2 }
 0x1f5   : > { %v1739_v23 = vpop.f32.mrf.mxu0  ;;  %v1167_v44 = vadd.f32 %v1119_v10, %v846_v19  ;;  %v849_v26 = vadd.f32 %v848_v38, %v4460_v33  ;;  %v2426_v38 = vld [vmem:[#allocation2 + $0x8d] sm:$0xff] }
 0x1f6   : > { %v1429_v42 = vpop.f32.mrf.mxu3 }
 0x1f7   : > { %3752 = vmatmul.msk.f32.gmra.mxu1 %vm270_vm1, %v2112_v17  ;;  %v1477_v4 = vadd.f32 %v1429_v42, %v1167_v44  ;;  %3865 = vmatmul.msk.f32.gmra.mxu0 %vm270_vm1, %v2733_v22  ;;  %v2115_v17 = vld [vmem:[#allocation2 + $0x84] sm:$0xff]  ;;  %v2736_v42 = vld [vmem:[#allocation2 + $0x8e] sm:$0xff] }
 0x1f9   : > { %v4729_v9 = vadd.f32 %v1739_v23, %v1477_v4  ;;  %3790 = vmatmul.msk.f32.gmra.mxu2 %vm270_vm1, %v2114_v8 }
 0x1fb   : > { %3828 = vmatmul.msk.f32.gmra.mxu3 %vm270_vm1, %v2424_v2 }
 0x1fc   : > { %v851_v18 = vpop.f32.mrf.mxu1  ;;  %v1122_v45 = vpop.f32.mrf.mxu2 }
 0x1fd   : > { %v1742_v30 = vpop.f32.mrf.mxu0  ;;  %v1168_v51 = vadd.f32 %v1122_v45, %v849_v26  ;;  %v852_v33 = vadd.f32 %v851_v18, %v4472_v40  ;;  %v2427_v18 = vld [vmem:[#allocation2 + $0x95] sm:$0xff] }
 0x1fe   : > { %v1432_v41 = vpop.f32.mrf.mxu3 }
 0x1ff   : > { %3753 = vmatmul.msk.f32.gmra.mxu1 %vm270_vm1, %v2113_v24  ;;  %v1478_v13 = vadd.f32 %v1432_v41, %v1168_v51  ;;  %3866 = vmatmul.msk.f32.gmra.mxu0 %vm270_vm1, %v2734_v28  ;;  %v2116_v24 = vld [vmem:[#allocation2 + $0x8c] sm:$0xff]  ;;  %v2737_v41 = vld [vmem:[#allocation2 + $0x96] sm:$0xff] }
 0x201   : > { %v4736_v11 = vadd.f32 %v1742_v30, %v1478_v13  ;;  %3791 = vmatmul.msk.f32.gmra.mxu2 %vm270_vm1, %v2115_v17 }
 0x203   : > { %3829 = vmatmul.msk.f32.gmra.mxu3 %vm270_vm1, %v2425_v15 }
 0x204   : > { %v854_v5 = vpop.f32.mrf.mxu1  ;;  %v1125_v52 = vpop.f32.mrf.mxu2 }
 0x205   : > { %v1745_v37 = vpop.f32.mrf.mxu0  ;;  %v1169_v58 = vadd.f32 %v1125_v52, %v852_v33  ;;  %v855_v40 = vadd.f32 %v854_v5, %v4484_v47  ;;  %v2428_v5 = vld [vmem:[#allocation2 + $0x9d] sm:$0xff] }
 0x206   : > { %v1435_v3 = vpop.f32.mrf.mxu3 }
 0x207   : > { %3754 = vmatmul.msk.f32.gmra.mxu1 %vm270_vm1, %v2114_v8  ;;  %v1479_v19 = vadd.f32 %v1435_v3, %v1169_v58  ;;  %3867 = vmatmul.msk.f32.gmra.mxu0 %vm270_vm1, %v2735_v35  ;;  %v2117_v8 = vld [vmem:[#allocation2 + $0x94] sm:$0xff]  ;;  %v2738_v3 = vld [vmem:[#allocation2 + $0x9e] sm:$0xff] }
 0x209   : > { %v4743_v10 = vadd.f32 %v1745_v37, %v1479_v19  ;;  %3792 = vmatmul.msk.f32.gmra.mxu2 %vm270_vm1, %v2116_v24 }
 0x20b   : > { %3830 = vmatmul.msk.f32.gmra.mxu3 %vm270_vm1, %v2426_v38 }
 0x20c   : > { %v857_v23 = vpop.f32.mrf.mxu1  ;;  %v1128_v22 = vpop.f32.mrf.mxu2 }
 0x20d   : > { %v1748_v44 = vpop.f32.mrf.mxu0  ;;  %v1170_v4 = vadd.f32 %v1128_v22, %v855_v40  ;;  %v858_v47 = vadd.f32 %v857_v23, %v4496_v54  ;;  %v2429_v23 = vld [vmem:[#allocation2 + $0xa5] sm:$0xff] }
 0x20e   : > { %v1438_v2 = vpop.f32.mrf.mxu3 }
 0x20f   : > { %3755 = vmatmul.msk.f32.gmra.mxu1 %vm270_vm1, %v2115_v17  ;;  %v1480_v26 = vadd.f32 %v1438_v2, %v1170_v4  ;;  %3868 = vmatmul.msk.f32.gmra.mxu0 %vm270_vm1, %v2736_v42  ;;  %v2118_v17 = vld [vmem:[#allocation2 + $0x9c] sm:$0xff]  ;;  %v2739_v2 = vld [vmem:[#allocation2 + $0xa6] sm:$0xff] }
 0x211   : > { %v4750_v45 = vadd.f32 %v1748_v44, %v1480_v26  ;;  %3793 = vmatmul.msk.f32.gmra.mxu2 %vm270_vm1, %v2117_v8 }
 0x213   : > { %3831 = vmatmul.msk.f32.gmra.mxu3 %vm270_vm1, %v2427_v18 }
 0x214   : > { %v860_v30 = vpop.f32.mrf.mxu1  ;;  %v1131_v28 = vpop.f32.mrf.mxu2 }
 0x215   : > { %v1751_v51 = vpop.f32.mrf.mxu0  ;;  %v1171_v13 = vadd.f32 %v1131_v28, %v858_v47  ;;  %v861_v54 = vadd.f32 %v860_v30, %v4506_v62  ;;  %v4773_v30 = vld [vmem:[%s5338_s4] ss:$0 sm:$0xff] }
 0x216   : > { %v1441_v15 = vpop.f32.mrf.mxu3 }
 0x217   : > { %3756 = vmatmul.msk.f32.gmra.mxu1 %vm270_vm1, %v2116_v24  ;;  %v1481_v33 = vadd.f32 %v1441_v15, %v1171_v13  ;;  %3869 = vmatmul.msk.f32.gmra.mxu0 %vm270_vm1, %v2737_v41  ;;  %v2119_v24 = vld [vmem:[#allocation2 + $0xa4] sm:$0xff] }
 0x219   : > { %v4757_v52 = vadd.f32 %v1751_v51, %v1481_v33  ;;  %3794 = vmatmul.msk.f32.gmra.mxu2 %vm270_vm1, %v2118_v17  ;;  %v2740_v33 = vld [vmem:[#allocation2 + $0xae] sm:$0xff] }
 0x21b   : > { %3832 = vmatmul.msk.f32.gmra.mxu3 %vm270_vm1, %v2428_v5 }
 0x21c   : > { %v1959_v37 = vpop.f32.mrf.mxu1  ;;  %v1134_v35 = vpop.f32.mrf.mxu2 }
 0x21d   : > { %v1754_v58 = vpop.f32.mrf.mxu0  ;;  %v1172_v19 = vadd.f32 %v1134_v35, %v861_v54  ;;  %v2067_v62 = vadd.f32 %v1959_v37, %v4515_v27  ;;  %v2430_v27 = vld [vmem:[#allocation2 + $0xad] sm:$0xff] }
 0x21e   : > { %v1444_v38 = vpop.f32.mrf.mxu3  ;;  %v2121_v35 = vld [vmem:[#allocation2 + $0xb4] sm:$0xff] }
 0x21f   : > { %3757 = vmatmul.msk.f32.gmra.mxu1 %vm270_vm1, %v2117_v8  ;;  %v1482_v40 = vadd.f32 %v1444_v38, %v1172_v19  ;;  %3870 = vmatmul.msk.f32.gmra.mxu0 %vm270_vm1, %v2738_v3  ;;  %v2120_v8 = vld [vmem:[#allocation2 + $0xac] sm:$0xff] }
 0x221   : > { %v4764_v22 = vadd.f32 %v1754_v58, %v1482_v40  ;;  %3795 = vmatmul.msk.f32.gmra.mxu2 %vm270_vm1, %v2119_v24 }
 0x223   : > { %3833 = vmatmul.msk.f32.gmra.mxu3 %vm270_vm1, %v2429_v23 }
 0x224   : > { %v1962_v44 = vpop.f32.mrf.mxu1  ;;  %v2269_v42 = vpop.f32.mrf.mxu2 }
 0x225   : > { %v2889_v4 = vpop.f32.mrf.mxu0  ;;  %v2377_v26 = vadd.f32 %v2269_v42, %v2067_v62  ;;  %v2068_v51 = vadd.f32 %v1962_v44, %v4522_v50  ;;  %v2431_v50 = vld [vmem:[#allocation2 + $0xb5] sm:$0xff] }
 0x226   : > { %v2579_v18 = vpop.f32.mrf.mxu3 }
 0x227   : > { %3758 = vmatmul.msk.f32.gmra.mxu1 %vm270_vm1, %v2118_v17  ;;  %v2687_v47 = vadd.f32 %v2579_v18, %v2377_v26  ;;  %3871 = vmatmul.msk.f32.gmra.mxu0 %vm270_vm1, %v2739_v2  ;;  %v2122_v2 = vld [vmem:[#allocation2 + $0xbc] sm:$0xff] }
 0x229   : > { %v2997_v28 = vadd.f32 %v2889_v4, %v2687_v47  ;;  %3796 = vmatmul.msk.f32.gmra.mxu2 %vm270_vm1, %v2120_v8 }
 0x22b   : > { %v3037_v41 = vadd.f32 %v4773_v30, %v2997_v28  ;;  %3834 = vmatmul.msk.f32.gmra.mxu3 %vm270_vm1, %v2430_v27 }
 0x22c   : > { %v1965_v13 = vpop.f32.mrf.mxu1  ;;  %v2272_v15 = vpop.f32.mrf.mxu2 }
 0x22d   : > { %v2892_v17 = vpop.f32.mrf.mxu0  ;;  %v3073_v5 = vmax.f32 %v3037_v41, 0.0  ;;  %v2378_v54 = vadd.f32 %v2272_v15, %v2068_v51  ;;  %v2069_v19 = vadd.f32 %v1965_v13, %v4529_v14  ;;  %v2432_v14 = vld [vmem:[#allocation2 + $0xbd] sm:$0xff] }
 0x22e   : > { %v2582_v37 = vpop.f32.mrf.mxu3 }
 0x22f   : > { %3759 = vmatmul.msk.f32.gmra.mxu1 %vm270_vm1, %v2119_v24  ;;  %3110 = vst.msk [vmem:[#allocation3] sm:$0xff] %vm3109_vm2, %v3073_v5  ;;  %v2688_v58 = vadd.f32 %v2582_v37, %v2378_v54  ;;  %3872 = vmatmul.msk.f32.gmra.mxu0 %vm270_vm1, %v2740_v33  ;;  %v2741_v24 = vld [vmem:[#allocation2 + $0xb6] sm:$0xff]  ;;  %v2123_v33 = vld [vmem:[#allocation2 + $0xc4] sm:$0xff] }
 0x231   : > { %v2998_v3 = vadd.f32 %v2892_v17, %v2688_v58  ;;  %3797 = vmatmul.msk.f32.gmra.mxu2 %vm270_vm1, %v2121_v35 }
 0x233   : > { %v3038_v38 = vadd.f32 %v4773_v30, %v2998_v3  ;;  %3835 = vmatmul.msk.f32.gmra.mxu3 %vm270_vm1, %v2431_v50 }
 0x234   : > { %v1968_v40 = vpop.f32.mrf.mxu1  ;;  %v2275_v23 = vpop.f32.mrf.mxu2 }
 0x235   : > { %v2895_v62 = vpop.f32.mrf.mxu0  ;;  %v3074_v44 = vmax.f32 %v3038_v38, 0.0  ;;  %v2379_v42 = vadd.f32 %v2275_v23, %v2069_v19  ;;  %v2070_v47 = vadd.f32 %v1968_v40, %v4536_v36  ;;  %v2433_v36 = vld [vmem:[#allocation2 + $0xc5] sm:$0xff] }
 0x236   : > { %v2585_v4 = vpop.f32.mrf.mxu3 }
 0x237   : > { %3760 = vmatmul.msk.f32.gmra.mxu1 %vm270_vm1, %v2120_v8  ;;  %3111 = vst.msk [vmem:[#allocation3 + $0x8] sm:$0xff] %vm3109_vm2, %v3074_v44  ;;  %v2689_v26 = vadd.f32 %v2585_v4, %v2379_v42  ;;  %3873 = vmatmul.msk.f32.gmra.mxu0 %vm270_vm1, %v2741_v24  ;;  %v2742_v8 = vld [vmem:[#allocation2 + $0xbe] sm:$0xff] }
 0x239   : > { %v2999_v18 = vadd.f32 %v2895_v62, %v2689_v26  ;;  %3798 = vmatmul.msk.f32.gmra.mxu2 %vm270_vm1, %v2122_v2  ;;  %v2124_v62 = vld [vmem:[#allocation2 + $0xcc] sm:$0xff] }
 0x23b   : > { %v3039_v27 = vadd.f32 %v4773_v30, %v2999_v18  ;;  %3836 = vmatmul.msk.f32.gmra.mxu3 %vm270_vm1, %v2432_v14 }
 0x23c   : > { %v1971_v28 = vpop.f32.mrf.mxu1  ;;  %v2278_v51 = vpop.f32.mrf.mxu2 }
 0x23d   : > { %v2898_v41 = vpop.f32.mrf.mxu0  ;;  %v3075_v13 = vmax.f32 %v3039_v27, 0.0  ;;  %v2380_v15 = vadd.f32 %v2278_v51, %v2070_v47  ;;  %v2071_v37 = vadd.f32 %v1971_v28, %v4543_v57  ;;  %v2434_v57 = vld [vmem:[#allocation2 + $0xcd] sm:$0xff] }
 0x23e   : > { %v2588_v17 = vpop.f32.mrf.mxu3  ;;  %v2125_v51 = vld [vmem:[#allocation2 + $0xd4] sm:$0xff] }
 0x23f   : > { %3761 = vmatmul.msk.f32.gmra.mxu1 %vm270_vm1, %v2121_v35  ;;  %3112 = vst.msk [vmem:[#allocation3 + $0x10] sm:$0xff] %vm3109_vm2, %v3075_v13  ;;  %v2690_v5 = vadd.f32 %v2588_v17, %v2380_v15  ;;  %3874 = vmatmul.msk.f32.gmra.mxu0 %vm270_vm1, %v2742_v8  ;;  %v2743_v35 = vld [vmem:[#allocation2 + $0xc6] sm:$0xff] }
 0x241   : > { %v3000_v54 = vadd.f32 %v2898_v41, %v2690_v5  ;;  %3799 = vmatmul.msk.f32.gmra.mxu2 %vm270_vm1, %v2123_v33 }
 0x243   : > { %v3040_v58 = vadd.f32 %v4773_v30, %v3000_v54  ;;  %3837 = vmatmul.msk.f32.gmra.mxu3 %vm270_vm1, %v2433_v36 }
 0x244   : > { %v1974_v50 = vpop.f32.mrf.mxu1  ;;  %v2281_v3 = vpop.f32.mrf.mxu2 }
 0x245   : > { %v2901_v19 = vpop.f32.mrf.mxu0  ;;  %v3076_v38 = vmax.f32 %v3040_v58, 0.0  ;;  %v2381_v40 = vadd.f32 %v2281_v3, %v2071_v37  ;;  %v2072_v42 = vadd.f32 %v1974_v50, %v4550_v20  ;;  %v2435_v20 = vld [vmem:[#allocation2 + $0xd5] sm:$0xff] }
 0x246   : > { %v2591_v23 = vpop.f32.mrf.mxu3  ;;  %v2126_v50 = vld [vmem:[#allocation2 + $0xdc] sm:$0xff] }
 0x247   : > { %3762 = vmatmul.msk.f32.gmra.mxu1 %vm270_vm1, %v2122_v2  ;;  %3113 = vst.msk [vmem:[#allocation3 + $0x18] sm:$0xff] %vm3109_vm2, %v3076_v38  ;;  %v2691_v24 = vadd.f32 %v2591_v23, %v2381_v40  ;;  %3875 = vmatmul.msk.f32.gmra.mxu0 %vm270_vm1, %v2743_v35  ;;  %v2744_v2 = vld [vmem:[#allocation2 + $0xce] sm:$0xff] }
 0x249   : > { %v3001_v44 = vadd.f32 %v2901_v19, %v2691_v24  ;;  %3800 = vmatmul.msk.f32.gmra.mxu2 %vm270_vm1, %v2124_v62 }
 0x24b   : > { %v3041_v4 = vadd.f32 %v4773_v30, %v3001_v44  ;;  %3838 = vmatmul.msk.f32.gmra.mxu3 %vm270_vm1, %v2434_v57 }
 0x24c   : > { %v1977_v26 = vpop.f32.mrf.mxu1  ;;  %v2284_v14 = vpop.f32.mrf.mxu2 }
 0x24d   : > { %v2904_v18 = vpop.f32.mrf.mxu0  ;;  %v3077_v47 = vmax.f32 %v3041_v4, 0.0  ;;  %v2382_v27 = vadd.f32 %v2284_v14, %v2072_v42  ;;  %v2073_v13 = vadd.f32 %v1977_v26, %v4557_v43  ;;  %v2436_v43 = vld [vmem:[#allocation2 + $0xdd] sm:$0xff] }
 0x24e   : > { %v2594_v28 = vpop.f32.mrf.mxu3  ;;  %v2127_v4 = vld [vmem:[#allocation2 + $0xe4] sm:$0xff] }
 0x24f   : > { %3763 = vmatmul.msk.f32.gmra.mxu1 %vm270_vm1, %v2123_v33  ;;  %3114 = vst.msk [vmem:[#allocation3 + $0x20] sm:$0xff] %vm3109_vm2, %v3077_v47  ;;  %v2692_v41 = vadd.f32 %v2594_v28, %v2382_v27  ;;  %3876 = vmatmul.msk.f32.gmra.mxu0 %vm270_vm1, %v2744_v2  ;;  %v2745_v33 = vld [vmem:[#allocation2 + $0xd6] sm:$0xff] }
 0x251   : > { %v3002_v8 = vadd.f32 %v2904_v18, %v2692_v41  ;;  %3801 = vmatmul.msk.f32.gmra.mxu2 %vm270_vm1, %v2125_v51 }
 0x253   : > { %v3042_v15 = vadd.f32 %v4773_v30, %v3002_v8  ;;  %3839 = vmatmul.msk.f32.gmra.mxu3 %vm270_vm1, %v2435_v20 }
 0x254   : > { %v1980_v17 = vpop.f32.mrf.mxu1  ;;  %v2287_v5 = vpop.f32.mrf.mxu2 }
 0x255   : > { %v2907_v36 = vpop.f32.mrf.mxu0  ;;  %v3078_v54 = vmax.f32 %v3042_v15, 0.0  ;;  %v2383_v37 = vadd.f32 %v2287_v5, %v2073_v13  ;;  %v2074_v35 = vadd.f32 %v1980_v17, %v4564_v6  ;;  %v2437_v6 = vld [vmem:[#allocation2 + $0xe5] sm:$0xff] }
 0x256   : > { %v2597_v58 = vpop.f32.mrf.mxu3  ;;  %v2128_v13 = vld [vmem:[#allocation2 + $0xec] sm:$0xff] }
 0x257   : > { %3764 = vmatmul.msk.f32.gmra.mxu1 %vm270_vm1, %v2124_v62  ;;  %3115 = vst.msk [vmem:[#allocation3 + $0x28] sm:$0xff] %vm3109_vm2, %v3078_v54  ;;  %v2693_v3 = vadd.f32 %v2597_v58, %v2383_v37  ;;  %3877 = vmatmul.msk.f32.gmra.mxu0 %vm270_vm1, %v2745_v33  ;;  %v2746_v62 = vld [vmem:[#allocation2 + $0xde] sm:$0xff]  ;;  %v2748_v58 = vld [vmem:[#allocation2 + $0xee] sm:$0xff] }
 0x259   : > { %v3003_v19 = vadd.f32 %v2907_v36, %v2693_v3  ;;  %3802 = vmatmul.msk.f32.gmra.mxu2 %vm270_vm1, %v2126_v50 }
 0x25b   : > { %v3043_v38 = vadd.f32 %v4773_v30, %v3003_v19  ;;  %3840 = vmatmul.msk.f32.gmra.mxu3 %vm270_vm1, %v2436_v43  ;;  %v2129_v19 = vld [vmem:[#allocation2 + $0xf4] sm:$0xff] }
 0x25c   : > { %v1983_v40 = vpop.f32.mrf.mxu1  ;;  %v2290_v23 = vpop.f32.mrf.mxu2 }
 0x25d   : > { %v2910_v24 = vpop.f32.mrf.mxu0  ;;  %v3079_v57 = vmax.f32 %v3043_v38, 0.0  ;;  %v2384_v44 = vadd.f32 %v2290_v23, %v2074_v35  ;;  %v2075_v18 = vadd.f32 %v1983_v40, %v4571_v29  ;;  %v2438_v29 = vld [vmem:[#allocation2 + $0xed] sm:$0xff] }
 0x25e   : > { %v2600_v42 = vpop.f32.mrf.mxu3 }
 0x25f   : > { %3765 = vmatmul.msk.f32.gmra.mxu1 %vm270_vm1, %v2125_v51  ;;  %3116 = vst.msk [vmem:[#allocation3 + $0x30] sm:$0xff] %vm3109_vm2, %v3079_v57  ;;  %v2694_v26 = vadd.f32 %v2600_v42, %v2384_v44  ;;  %3878 = vmatmul.msk.f32.gmra.mxu0 %vm270_vm1, %v2746_v62  ;;  %v2747_v51 = vld [vmem:[#allocation2 + $0xe6] sm:$0xff]  ;;  %v2749_v44 = vld [vmem:[#allocation2 + $0xf6] sm:$0xff] }
 0x261   : > { %v3004_v14 = vadd.f32 %v2910_v24, %v2694_v26  ;;  %3803 = vmatmul.msk.f32.gmra.mxu2 %vm270_vm1, %v2127_v4 }
 0x263   : > { %v3044_v2 = vadd.f32 %v4773_v30, %v3004_v14  ;;  %3841 = vmatmul.msk.f32.gmra.mxu3 %vm270_vm1, %v2437_v6  ;;  %v2130_v6 = vld [vmem:[#allocation2 + $0xfc] sm:$0xff] }
 0x264   : > { %v1986_v47 = vpop.f32.mrf.mxu1  ;;  %v2293_v27 = vpop.f32.mrf.mxu2 }
 0x265   : > { %v2913_v28 = vpop.f32.mrf.mxu0  ;;  %v3080_v41 = vmax.f32 %v3044_v2, 0.0  ;;  %v2385_v20 = vadd.f32 %v2293_v27, %v2075_v18  ;;  %v2076_v5 = vadd.f32 %v1986_v47, %v4578_v53  ;;  %v2439_v53 = vld [vmem:[#allocation2 + $0xf5] sm:$0xff] }
 0x266   : > { %v2603_v8 = vpop.f32.mrf.mxu3 }
 0x267   : > { %3766 = vmatmul.msk.f32.gmra.mxu1 %vm270_vm1, %v2126_v50  ;;  %3117 = vst.msk [vmem:[#allocation3 + $0x38] sm:$0xff] %vm3109_vm2, %v3080_v41  ;;  %v2695_v15 = vadd.f32 %v2603_v8, %v2385_v20  ;;  %3879 = vmatmul.msk.f32.gmra.mxu0 %vm270_vm1, %v2747_v51  ;;  %v2750_v41 = vld [vmem:[#allocation2 + $0xfe] sm:$0xff] }
 0x269   : > { %v3005_v17 = vadd.f32 %v2913_v28, %v2695_v15  ;;  %3804 = vmatmul.msk.f32.gmra.mxu2 %vm270_vm1, %v2128_v13  ;;  %v2131_v15 = vld [vmem:[#allocation2 + $0x104] sm:$0xff] }
 0x26b   : > { %v3045_v36 = vadd.f32 %v4773_v30, %v3005_v17  ;;  %3842 = vmatmul.msk.f32.gmra.mxu3 %vm270_vm1, %v2438_v29 }
 0x26c   : > { %v1989_v33 = vpop.f32.mrf.mxu1  ;;  %v2296_v54 = vpop.f32.mrf.mxu2 }
 0x26d   : > { %v2916_v37 = vpop.f32.mrf.mxu0  ;;  %v3081_v50 = vmax.f32 %v3045_v36, 0.0  ;;  %v2386_v3 = vadd.f32 %v2296_v54, %v2076_v5  ;;  %v2077_v40 = vadd.f32 %v1989_v33, %v4585_v0  ;;  %v2440_v0 = vld [vmem:[#allocation2 + $0xfd] sm:$0xff] }
 0x26e   : > { %v2606_v43 = vpop.f32.mrf.mxu3 }
 0x26f   : > { %3767 = vmatmul.msk.f32.gmra.mxu1 %vm270_vm1, %v2127_v4  ;;  %3118 = vst.msk [vmem:[#allocation3 + $0x40] sm:$0xff] %vm3109_vm2, %v3081_v50  ;;  %v2696_v35 = vadd.f32 %v2606_v43, %v2386_v3  ;;  %3880 = vmatmul.msk.f32.gmra.mxu0 %vm270_vm1, %v2748_v58  ;;  %v2751_v58 = vld [vmem:[#allocation2 + $0x106] sm:$0xff] }
 0x271   : > { %v3006_v38 = vadd.f32 %v2916_v37, %v2696_v35  ;;  %3805 = vmatmul.msk.f32.gmra.mxu2 %vm270_vm1, %v2129_v19 }
 0x273   : > { %v3046_v23 = vadd.f32 %v4773_v30, %v3006_v38  ;;  %3843 = vmatmul.msk.f32.gmra.mxu3 %vm270_vm1, %v2439_v53  ;;  %v2442_v38 = vld [vmem:[#allocation2 + $0x10d] sm:$0xff] }
 0x274   : > { %v1992_v24 = vpop.f32.mrf.mxu1  ;;  %v2299_v62 = vpop.f32.mrf.mxu2 }
 0x275   : > { %v2919_v57 = vpop.f32.mrf.mxu0  ;;  %v3082_v42 = vmax.f32 %v3046_v23, 0.0  ;;  %v2387_v4 = vadd.f32 %v2299_v62, %v2077_v40  ;;  %v2078_v2 = vadd.f32 %v1992_v24, %v4592_v25  ;;  %v2441_v25 = vld [vmem:[#allocation2 + $0x105] sm:$0xff] }
 0x276   : > { %v2609_v26 = vpop.f32.mrf.mxu3 }
 0x277   : > { %3768 = vmatmul.msk.f32.gmra.mxu1 %vm270_vm1, %v2128_v13  ;;  %3119 = vst.msk [vmem:[#allocation3 + $0x48] sm:$0xff] %vm3109_vm2, %v3082_v42  ;;  %v2697_v14 = vadd.f32 %v2609_v26, %v2387_v4  ;;  %3881 = vmatmul.msk.f32.gmra.mxu0 %vm270_vm1, %v2749_v44  ;;  %v2752_v42 = vld [vmem:[#allocation2 + $0x10e] sm:$0xff] }
 0x279   : > { %v3007_v18 = vadd.f32 %v2919_v57, %v2697_v14  ;;  %3806 = vmatmul.msk.f32.gmra.mxu2 %vm270_vm1, %v2130_v6  ;;  %v2133_v14 = vld [vmem:[#allocation2 + $0x114] sm:$0xff] }
 0x27b   : > { %v3047_v47 = vadd.f32 %v4773_v30, %v3007_v18  ;;  %3844 = vmatmul.msk.f32.gmra.mxu3 %vm270_vm1, %v2440_v0  ;;  %v3999_v0 = vld [vmem:[%s4252_s25 + $0xa0] sm:$0xff]  }
 0x27c   : > { %v1995_v27 = vpop.f32.mrf.mxu1  ;;  %v2302_v28 = vpop.f32.mrf.mxu2 }
 0x27d   : > { %v2922_v51 = vpop.f32.mrf.mxu0  ;;  %v3083_v20 = vmax.f32 %v3047_v47, 0.0  ;;  %v2388_v8 = vadd.f32 %v2302_v28, %v2078_v2  ;;  %v2079_v5 = vadd.f32 %v1995_v27, %v4599_v48  ;;  %v4046_v48 = vld [vmem:[%s4252_s25 + $0x98] sm:$0xff]   ;;  %s3170_s25 = sadd.s32 3, %s4940_s18 }
 0x27e   : > { %v2612_v13 = vpop.f32.mrf.mxu3  ;;  %v3975_v53 = vunpack.c.h.bf16 %v4046_v48  ;;  %v2443_v2 = vld [vmem:[#allocation2 + $0x115] sm:$0xff]  ;;  %s4963_s11 = sld [smem:[#allocation5 + %s3170_s25]] }
 0x27f   : > { %3769 = vmatmul.msk.f32.gmra.mxu1 %vm270_vm1, %v2129_v19  ;;  %3120 = vst.msk [vmem:[#allocation3 + $0x50] sm:$0xff] %vm3109_vm2, %v3083_v20  ;;  %v2698_v29 = vadd.f32 %v2612_v13, %v2388_v8  ;;  %3882 = vmatmul.msk.f32.gmra.mxu0 %vm270_vm1, %v2750_v41  ;;  %v2132_v19 = vld [vmem:[#allocation2 + $0x10c] sm:$0xff]  ;;  %v2753_v8 = vld [vmem:[#allocation2 + $0x116] sm:$0xff]  ;;  %s4965_s12 = sld [smem:[#allocation6 + %s3170_s25]] }
 0x280   : > { %310 = vst.msk [vmem:[#allocation2 + $0x138] sm:$0xff] %vm270_vm1, %v3975_v53  ;;  %s4981_s25 = sld [smem:[#allocation5 + %s3194_s16]] }
 0x281   : > { %v3008_v17 = vadd.f32 %v2922_v51, %v2698_v29  ;;  %3807 = vmatmul.msk.f32.gmra.mxu2 %vm270_vm1, %v2131_v15  ;;  %s4995_s16 = sld [smem:[#allocation6 + %s3210_s7]]  ;;  %s3242_s7 = sadd.s32 12, %s4940_s18 }
 0x282   : > { %s5022_s30 = sld [smem:[#allocation5 + %s3242_s7]] }
 0x283   : > { %v3048_v36 = vadd.f32 %v4773_v30, %v3008_v17  ;;  %3845 = vmatmul.msk.f32.gmra.mxu3 %vm270_vm1, %v2441_v25  ;;  %v2134_v25 = vld [vmem:[#allocation2 + $0x11c] sm:$0xff]  ;;  %s5024_s1 = sld [smem:[#allocation6 + %s3242_s7]]  ;;  %s3274_s7 = sadd.s32 16, %s4940_s18 }
 0x284   : > { %v1998_v33 = vpop.f32.mrf.mxu1  ;;  %v2305_v54 = vpop.f32.mrf.mxu2  ;;  %5342 = sst [smem:[#allocation23_spill]] %s4963_s11 }
 0x285   : > { %v2925_v37 = vpop.f32.mrf.mxu0  ;;  %v3084_v50 = vmax.f32 %v3048_v36, 0.0  ;;  %v2389_v3 = vadd.f32 %v2305_v54, %v2079_v5  ;;  %v2080_v23 = vadd.f32 %v1998_v33, %v4609_v12  ;;  %v3978_v12 = vunpack.c.l.bf16 %v3999_v0  ;;  %s5045_s22 = sld [smem:[#allocation5 + %s3274_s7]] }
 0x286   : > { %v2615_v43 = vpop.f32.mrf.mxu3  ;;  %5345 = sst [smem:[#allocation26_spill]] %s4981_s25  ;;  %s3298_s25 = sadd.s32 19, %s4940_s18 }
 0x287   : > { %3770 = vmatmul.msk.f32.gmra.mxu1 %vm270_vm1, %v2130_v6  ;;  %3121 = vst.msk [vmem:[#allocation3 + $0x58] sm:$0xff] %vm3109_vm2, %v3084_v50  ;;  %v2699_v35 = vadd.f32 %v2615_v43, %v2389_v3  ;;  %3883 = vmatmul.msk.f32.gmra.mxu0 %vm270_vm1, %v2751_v58  ;;  %v2754_v50 = vld [vmem:[#allocation2 + $0x11e] sm:$0xff]  ;;  %s5061_s14 = sld [smem:[#allocation5 + %s3298_s25]] }
 0x288   : > { %311 = vst.msk [vmem:[#allocation2 + $0x140] sm:$0xff] %vm270_vm1, %v3978_v12  ;;  %5351 = sst [smem:[#allocation32_spill]] %s5022_s30 }
 0x289   : > { %v3009_v40 = vadd.f32 %v2925_v37, %v2699_v35  ;;  %3808 = vmatmul.msk.f32.gmra.mxu2 %vm270_vm1, %v2132_v19  ;;  %v2135_v35 = vld [vmem:[#allocation2 + $0x124] sm:$0xff]  ;;  %s5035_s30 = sld [smem:[#allocation6 + %s3258_s28]] }
 0x28a   : > { %s5063_s11 = sld [smem:[#allocation6 + %s3298_s25]] }
 0x28b   : > { %v3049_v24 = vadd.f32 %v4773_v30, %v3009_v40  ;;  %3846 = vmatmul.msk.f32.gmra.mxu3 %vm270_vm1, %v2442_v38  ;;  %5355 = sst [smem:[#allocation36_spill]] %s5045_s22 }
 0x28c   : > { %v2001_v62 = vpop.f32.mrf.mxu1  ;;  %v2308_v57 = vpop.f32.mrf.mxu2  ;;  %s5075_s25 = sld [smem:[#allocation6 + %s3314_s10]] }
 0x28d   : > { %v2928_v44 = vpop.f32.mrf.mxu0  ;;  %v3085_v4 = vmax.f32 %v3049_v24, 0.0  ;;  %v2390_v26 = vadd.f32 %v2308_v57, %v2080_v23  ;;  %v2081_v27 = vadd.f32 %v2001_v62, %v4617_v46  ;;  %v2444_v46 = vld [vmem:[#allocation2 + $0x11d] sm:$0xff]  ;;  %v2755_v57 = vld [vmem:[#allocation2 + $0x126] sm:$0xff]  ;;  %5359 = sst [smem:[#allocation40_spill]] %s5061_s14  ;;  %s3330_s14 = sadd.s32 23, %s4940_s18 }
 0x28e   : > { %v2618_v6 = vpop.f32.mrf.mxu3  ;;  %s5084_s20 = sld [smem:[#allocation5 + %s3330_s14]] }
 0x28f   : > { %3771 = vmatmul.msk.f32.gmra.mxu1 %vm270_vm1, %v2131_v15  ;;  %3122 = vst.msk [vmem:[#allocation3 + $0x60] sm:$0xff] %vm3109_vm2, %v3085_v4  ;;  %v2700_v18 = vadd.f32 %v2618_v6, %v2390_v26  ;;  %3884 = vmatmul.msk.f32.gmra.mxu0 %vm270_vm1, %v2752_v42  ;;  %v2136_v26 = vld [vmem:[#allocation2 + $0x12c] sm:$0xff] }
 0x290   : > { %5360 = sst [smem:[#allocation41_spill]] %s5063_s11 }
 0x291   : > { %v3010_v47 = vadd.f32 %v2928_v44, %v2700_v18  ;;  %3809 = vmatmul.msk.f32.gmra.mxu2 %vm270_vm1, %v2133_v14 }
 0x292   : > { %5364 = sst [smem:[#allocation45_spill]] %s5075_s25 }
 0x293   : > { %v3050_v28 = vadd.f32 %v4773_v30, %v3010_v47  ;;  %3847 = vmatmul.msk.f32.gmra.mxu3 %vm270_vm1, %v2443_v2 }
 0x294   : > { %v2004_v51 = vpop.f32.mrf.mxu1  ;;  %v2311_v41 = vpop.f32.mrf.mxu2  ;;  %5367 = sst [smem:[#allocation48_spill]] %s5084_s20  ;;  %s3362_s20 = sadd.s32 27, %s4940_s18 }
 0x295   : > { %v2931_v20 = vpop.f32.mrf.mxu0  ;;  %v3086_v13 = vmax.f32 %v3050_v28, 0.0  ;;  %v2391_v15 = vadd.f32 %v2311_v41, %v2081_v27  ;;  %v2082_v36 = vadd.f32 %v2004_v51, %v4624_v63  ;;  %v2445_v63 = vld [vmem:[#allocation2 + $0x125] sm:$0xff]  ;;  %v2756_v27 = vld [vmem:[#allocation2 + $0x12e] sm:$0xff] }
 0x296   : > { %v2621_v29 = vpop.f32.mrf.mxu3 }
 0x297   : > { %3772 = vmatmul.msk.f32.gmra.mxu1 %vm270_vm1, %v2132_v19  ;;  %3123 = vst.msk [vmem:[#allocation3 + $0x68] sm:$0xff] %vm3109_vm2, %v3086_v13  ;;  %v2701_v17 = vadd.f32 %v2621_v29, %v2391_v15  ;;  %3885 = vmatmul.msk.f32.gmra.mxu0 %vm270_vm1, %v2753_v8 }
 0x299   : > { %v3011_v5 = vadd.f32 %v2931_v20, %v2701_v17  ;;  %3810 = vmatmul.msk.f32.gmra.mxu2 %vm270_vm1, %v2134_v25  ;;  %v2137_v20 = vld [vmem:[#allocation2 + $0x134] sm:$0xff] }
 0x29b   : > { %v3051_v33 = vadd.f32 %v4773_v30, %v3011_v5  ;;  %3848 = vmatmul.msk.f32.gmra.mxu3 %vm270_vm1, %v2444_v46  ;;  %v2757_v5 = vld [vmem:[#allocation2 + $0x136] sm:$0xff] }
 0x29c   : > { %v2007_v54 = vpop.f32.mrf.mxu1  ;;  %v2314_v37 = vpop.f32.mrf.mxu2 }
 0x29d   : > { %v2934_v58 = vpop.f32.mrf.mxu0  ;;  %v3087_v3 = vmax.f32 %v3051_v33, 0.0  ;;  %v2392_v43 = vadd.f32 %v2314_v37, %v2082_v36  ;;  %v2083_v38 = vadd.f32 %v2007_v54, %v4631_v32  ;;  %v2446_v32 = vld [vmem:[#allocation2 + $0x12d] sm:$0xff]  ;;  %v2138_v37 = vld [vmem:[#allocation2 + $0x13c] sm:$0xff] }
 0x29e   : > { %v2624_v19 = vpop.f32.mrf.mxu3 }
 0x29f   : > { %3773 = vmatmul.msk.f32.gmra.mxu1 %vm270_vm1, %v2133_v14  ;;  %3124 = vst.msk [vmem:[#allocation3 + $0x70] sm:$0xff] %vm3109_vm2, %v3087_v3  ;;  %v2702_v48 = vadd.f32 %v2624_v19, %v2392_v43  ;;  %3886 = vmatmul.msk.f32.gmra.mxu0 %vm270_vm1, %v2754_v50 }
 0x2a1   : > { %v3012_v53 = vadd.f32 %v2934_v58, %v2702_v48  ;;  %3811 = vmatmul.msk.f32.gmra.mxu2 %vm270_vm1, %v2135_v35 }
 0x2a3   : > { %v3052_v40 = vadd.f32 %v4773_v30, %v3012_v53  ;;  %3849 = vmatmul.msk.f32.gmra.mxu3 %vm270_vm1, %v2445_v63  ;;  %v2758_v63 = vld [vmem:[#allocation2 + $0x13e] sm:$0xff] }
 0x2a4   : > { %v2010_v23 = vpop.f32.mrf.mxu1  ;;  %v2317_v24 = vpop.f32.mrf.mxu2 }
 0x2a5   : > { %v2937_v62 = vpop.f32.mrf.mxu0  ;;  %v3088_v44 = vmax.f32 %v3052_v40, 0.0  ;;  %v2393_v42 = vadd.f32 %v2317_v24, %v2083_v38  ;;  %v2084_v0 = vadd.f32 %v2010_v23, %v4638_v55  ;;  %v2447_v55 = vld [vmem:[#allocation2 + $0x135] sm:$0xff] }
 0x2a6   : > { %v2627_v4 = vpop.f32.mrf.mxu3 }
 0x2a7   : > { %3774 = vmatmul.msk.f32.gmra.mxu1 %vm270_vm1, %v2134_v25  ;;  %3125 = vst.msk [vmem:[#allocation3 + $0x78] sm:$0xff] %vm3109_vm2, %v3088_v44  ;;  %v2703_v6 = vadd.f32 %v2627_v4, %v2393_v42  ;;  %3887 = vmatmul.msk.f32.gmra.mxu0 %vm270_vm1, %v2755_v57 }
 0x2a9   : > { %v3013_v14 = vadd.f32 %v2937_v62, %v2703_v6  ;;  %3812 = vmatmul.msk.f32.gmra.mxu2 %vm270_vm1, %v2136_v26 }
 0x2ab   : > { %v3053_v18 = vadd.f32 %v4773_v30, %v3013_v14  ;;  %3850 = vmatmul.msk.f32.gmra.mxu3 %vm270_vm1, %v2446_v32 }
 0x2ac   : > { %v2013_v12 = vpop.f32.mrf.mxu1  ;;  %v2320_v2 = vpop.f32.mrf.mxu2 }
 0x2ad   : > { %v2940_v47 = vpop.f32.mrf.mxu0  ;;  %v3089_v28 = vmax.f32 %v3053_v18, 0.0  ;;  %v2394_v51 = vadd.f32 %v2320_v2, %v2084_v0  ;;  %v2085_v15 = vadd.f32 %v2013_v12, %v4645_v16  ;;  %v2448_v16 = vld [vmem:[#allocation2 + $0x13d] sm:$0xff] }
 0x2ae   : > { %v2630_v41 = vpop.f32.mrf.mxu3 }
 0x2af   : > { %3775 = vmatmul.msk.f32.gmra.mxu1 %vm270_vm1, %v2135_v35  ;;  %3126 = vst.msk [vmem:[#allocation3 + $0x80] sm:$0xff] %vm3109_vm2, %v3089_v28  ;;  %v2704_v8 = vadd.f32 %v2630_v41, %v2394_v51  ;;  %3888 = vmatmul.msk.f32.gmra.mxu0 %vm270_vm1, %v2756_v27 }
 0x2b1   : > { %v3014_v13 = vadd.f32 %v2940_v47, %v2704_v8  ;;  %3813 = vmatmul.msk.f32.gmra.mxu2 %vm270_vm1, %v2137_v20 }
 0x2b3   : > { %v3054_v29 = vadd.f32 %v4773_v30, %v3014_v13  ;;  %3851 = vmatmul.msk.f32.gmra.mxu3 %vm270_vm1, %v2447_v55 }
 0x2b4   : > { %v2016_v25 = vpop.f32.mrf.mxu1  ;;  %v2323_v17 = vpop.f32.mrf.mxu2 }
 0x2b5   : > { %v2943_v46 = vpop.f32.mrf.mxu0  ;;  %v3090_v36 = vmax.f32 %v3054_v29, 0.0  ;;  %v2395_v33 = vadd.f32 %v2323_v17, %v2085_v15  ;;  %v2086_v3 = vadd.f32 %v2016_v25, %v4652_v39 }
 0x2b6   : > { %v2633_v54 = vpop.f32.mrf.mxu3 }
 0x2b7   : > { %3776 = vmatmul.msk.f32.gmra.mxu1 %vm270_vm1, %v2136_v26  ;;  %3127 = vst.msk [vmem:[#allocation3 + $0x88] sm:$0xff] %vm3109_vm2, %v3090_v36  ;;  %v2705_v58 = vadd.f32 %v2633_v54, %v2395_v33  ;;  %3889 = vmatmul.msk.f32.gmra.mxu0 %vm270_vm1, %v2757_v5 }
 0x2b9   : > { %v3015_v50 = vadd.f32 %v2943_v46, %v2705_v58  ;;  %3814 = vmatmul.msk.f32.gmra.mxu2 %vm270_vm1, %v2138_v37 }
 0x2bb   : > { %v3055_v43 = vadd.f32 %v4773_v30, %v3015_v50  ;;  %3852 = vmatmul.msk.f32.gmra.mxu3 %vm270_vm1, %v2448_v16 }
 0x2bc   : > { %v2019_v19 = vpop.f32.mrf.mxu1  ;;  %v2326_v35 = vpop.f32.mrf.mxu2 }
 0x2bd   : > { %v2946_v48 = vpop.f32.mrf.mxu0  ;;  %v3091_v53 = vmax.f32 %v3055_v43, 0.0  ;;  %v2396_v38 = vadd.f32 %v2326_v35, %v2086_v3  ;;  %v2087_v62 = vadd.f32 %v2019_v19, %v4659_v61 }
 0x2be   : > { %v2636_v40 = vpop.f32.mrf.mxu3 }
 0x2bf   : > { %3128 = vst.msk [vmem:[#allocation3 + $0x90] sm:$0xff] %vm3109_vm2, %v3091_v53  ;;  %v2706_v23 = vadd.f32 %v2636_v40, %v2396_v38  ;;  %3890 = vmatmul.msk.f32.gmra.mxu0 %vm270_vm1, %v2758_v63 }
 0x2c1   : > { %v3016_v24 = vadd.f32 %v2946_v48, %v2706_v23 }
 0x2c3   : > { %v3056_v39 = vadd.f32 %v4773_v30, %v3016_v24 }
 0x2c4   : > { %v2022_v57 = vpop.f32.mrf.mxu1  ;;  %v2329_v44 = vpop.f32.mrf.mxu2 }
 0x2c5   : > { %v2949_v42 = vpop.f32.mrf.mxu0  ;;  %v3092_v4 = vmax.f32 %v3056_v39, 0.0  ;;  %v2397_v26 = vadd.f32 %v2329_v44, %v2087_v62  ;;  %v2088_v0 = vadd.f32 %v2022_v57, %v4666_v21 }
 0x2c6   : > { %v2639_v6 = vpop.f32.mrf.mxu3 }
 0x2c7   : > { %3129 = vst.msk [vmem:[#allocation3 + $0x98] sm:$0xff] %vm3109_vm2, %v3092_v4  ;;  %v2707_v32 = vadd.f32 %v2639_v6, %v2397_v26 }
 0x2c9   : > { %v3017_v14 = vadd.f32 %v2949_v42, %v2707_v32 }
 0x2cb   : > { %v3057_v18 = vadd.f32 %v4773_v30, %v3017_v14 }
 0x2cc   : > { %v2025_v12 = vpop.f32.mrf.mxu1  ;;  %v2332_v2 = vpop.f32.mrf.mxu2 }
 0x2cd   : > { %v2952_v47 = vpop.f32.mrf.mxu0  ;;  %v3093_v61 = vmax.f32 %v3057_v18, 0.0  ;;  %v2398_v27 = vadd.f32 %v2332_v2, %v2088_v0  ;;  %v2089_v20 = vadd.f32 %v2025_v12, %v4673_v34 }
 0x2ce   : > { %v2642_v28 = vpop.f32.mrf.mxu3 }
 0x2cf   : > { %3130 = vst.msk [vmem:[#allocation3 + $0xa0] sm:$0xff] %vm3109_vm2, %v3093_v61  ;;  %v2708_v51 = vadd.f32 %v2642_v28, %v2398_v27 }
 0x2d1   : > { %v3018_v41 = vadd.f32 %v2952_v47, %v2708_v51 }
 0x2d3   : > { %v3058_v8 = vadd.f32 %v4773_v30, %v3018_v41 }
 0x2d4   : > { %v2028_v55 = vpop.f32.mrf.mxu1  ;;  %v2335_v13 = vpop.f32.mrf.mxu2 }
 0x2d5   : > { %v2955_v15 = vpop.f32.mrf.mxu0  ;;  %v3094_v21 = vmax.f32 %v3058_v8, 0.0  ;;  %v2399_v29 = vadd.f32 %v2335_v13, %v2089_v20  ;;  %v2090_v5 = vadd.f32 %v2028_v55, %v4680_v56 }
 0x2d6   : > { %v2645_v25 = vpop.f32.mrf.mxu3 }
 0x2d7   : > { %3131 = vst.msk [vmem:[#allocation3 + $0xa8] sm:$0xff] %vm3109_vm2, %v3094_v21  ;;  %v2709_v17 = vadd.f32 %v2645_v25, %v2399_v29 }
 0x2d9   : > { %v3019_v46 = vadd.f32 %v2955_v15, %v2709_v17 }
 0x2db   : > { %v3059_v36 = vadd.f32 %v4773_v30, %v3019_v46 }
 0x2dc   : > { %v2031_v33 = vpop.f32.mrf.mxu1  ;;  %v2338_v54 = vpop.f32.mrf.mxu2 }
 0x2dd   : > { %v2958_v37 = vpop.f32.mrf.mxu0  ;;  %v3095_v34 = vmax.f32 %v3059_v36, 0.0  ;;  %v2400_v58 = vadd.f32 %v2338_v54, %v2090_v5  ;;  %v2091_v43 = vadd.f32 %v2031_v33, %v4687_v60 }
 0x2de   : > { %v2648_v16 = vpop.f32.mrf.mxu3 }
 0x2df   : > { %3132 = vst.msk [vmem:[#allocation3 + $0xb0] sm:$0xff] %vm3109_vm2, %v3095_v34  ;;  %v2710_v50 = vadd.f32 %v2648_v16, %v2400_v58 }
 0x2e1   : > { %v3020_v3 = vadd.f32 %v2958_v37, %v2710_v50 }
 0x2e3   : > { %v3060_v19 = vadd.f32 %v4773_v30, %v3020_v3 }
 0x2e4   : > { %v2034_v35 = vpop.f32.mrf.mxu1  ;;  %v2341_v48 = vpop.f32.mrf.mxu2 }
 0x2e5   : > { %v2961_v63 = vpop.f32.mrf.mxu0  ;;  %v3096_v56 = vmax.f32 %v3060_v19, 0.0  ;;  %v2401_v53 = vadd.f32 %v2341_v48, %v2091_v43  ;;  %v2092_v24 = vadd.f32 %v2034_v35, %v4694_v59 }
 0x2e6   : > { %v2651_v38 = vpop.f32.mrf.mxu3 }
 0x2e7   : > { %3133 = vst.msk [vmem:[#allocation3 + $0xb8] sm:$0xff] %vm3109_vm2, %v3096_v56  ;;  %v2711_v40 = vadd.f32 %v2651_v38, %v2401_v53 }
 0x2e9   : > { %v3021_v23 = vadd.f32 %v2961_v63, %v2711_v40 }
 0x2eb   : > { %v3061_v62 = vadd.f32 %v4773_v30, %v3021_v23 }
 0x2ec   : > { %v2037_v39 = vpop.f32.mrf.mxu1  ;;  %v2344_v57 = vpop.f32.mrf.mxu2 }
 0x2ed   : > { %v2964_v44 = vpop.f32.mrf.mxu0  ;;  %v3097_v60 = vmax.f32 %v3061_v62, 0.0  ;;  %v2402_v42 = vadd.f32 %v2344_v57, %v2092_v24  ;;  %v2093_v32 = vadd.f32 %v2037_v39, %v4701_v31 }
 0x2ee   : > { %v2654_v4 = vpop.f32.mrf.mxu3 }
 0x2ef   : > { %3134 = vst.msk [vmem:[#allocation3 + $0xc0] sm:$0xff] %vm3109_vm2, %v3097_v60  ;;  %v2712_v26 = vadd.f32 %v2654_v4, %v2402_v42 }
 0x2f1   : > { %v3022_v6 = vadd.f32 %v2964_v44, %v2712_v26 }
 0x2f3   : > { %v3062_v14 = vadd.f32 %v4773_v30, %v3022_v6 }
 0x2f4   : > { %v2040_v0 = vpop.f32.mrf.mxu1  ;;  %v2347_v18 = vpop.f32.mrf.mxu2 }
 0x2f5   : > { %v2967_v12 = vpop.f32.mrf.mxu0  ;;  %v3098_v59 = vmax.f32 %v3062_v14, 0.0  ;;  %v2403_v2 = vadd.f32 %v2347_v18, %v2093_v32  ;;  %v2094_v28 = vadd.f32 %v2040_v0, %v4708_v7  ;;  %v5019_v14 = vld [vmem:[%s5338_s4] ss:$0 sm:$0xff]  ;;  %s5033_s4 = sld [smem:[#allocation5 + %s3258_s28]]  ;;  %s3290_s28 = sadd.s32 18, %s4940_s18 }
 0x2f6   : > { %v2657_v47 = vpop.f32.mrf.mxu3  ;;  %s5056_s22 = sld [smem:[#allocation5 + %s3290_s28]] }
 0x2f7   : > { %3135 = vst.msk [vmem:[#allocation3 + $0xc8] sm:$0xff] %vm3109_vm2, %v3098_v59  ;;  %v2713_v61 = vadd.f32 %v2657_v47, %v2403_v2  ;;  %s5058_s17 = sld [smem:[#allocation6 + %s3290_s28]]  ;;  %s3322_s28 = sadd.s32 22, %s4940_s18 }
 0x2f8   : > { %s5081_s23 = sld [smem:[#allocation6 + %s3322_s28]] }
 0x2f9   : > { %v3023_v27 = vadd.f32 %v2967_v12, %v2713_v61 }
 0x2fb   : > { %v3063_v51 = vadd.f32 %v4773_v30, %v3023_v27  ;;  %5353 = sst [smem:[#allocation34_spill]] %s5033_s4 }
 0x2fc   : > { %v2043_v41 = vpop.f32.mrf.mxu1  ;;  %v2350_v20 = vpop.f32.mrf.mxu2  ;;  %s5047_s4 = sld [smem:[#allocation6 + %s3274_s7]]  ;;  %s3306_s7 = sadd.s32 20, %s4940_s18 }
 0x2fd   : > { %v2970_v8 = vpop.f32.mrf.mxu0  ;;  %v3099_v31 = vmax.f32 %v3063_v51, 0.0  ;;  %v2404_v55 = vadd.f32 %v2350_v20, %v2094_v28  ;;  %v2095_v29 = vadd.f32 %v2043_v41, %v4715_v49  ;;  %5357 = sst [smem:[#allocation38_spill]] %s5056_s22 }
 0x2fe   : > { %v2660_v13 = vpop.f32.mrf.mxu3  ;;  %5358 = sst [smem:[#allocation39_spill]] %s5058_s17 }
 0x2ff   : > { %3136 = vst.msk [vmem:[#allocation3 + $0xd0] sm:$0xff] %vm3109_vm2, %v3099_v31  ;;  %v2714_v15 = vadd.f32 %v2660_v13, %v2404_v55  ;;  %s5068_s9 = sld [smem:[#allocation5 + %s3306_s7]] }
 0x300   : > { %s5070_s22 = sld [smem:[#allocation6 + %s3306_s7]]  ;;  %s3338_s7 = sadd.s32 24, %s4940_s18 }
 0x301   : > { %v3024_v21 = vadd.f32 %v2970_v8, %v2714_v15  ;;  %5366 = sst [smem:[#allocation47_spill]] %s5081_s23 }
 0x302   : > { %s5091_s10 = sld [smem:[#allocation5 + %s3338_s7]] }
 0x303   : > { %v3064_v25 = vadd.f32 %v4773_v30, %v3024_v21  ;;  %s5096_s23 = sld [smem:[#allocation5 + %s3346_s29]] }
 0x304   : > { %v2046_v17 = vpop.f32.mrf.mxu1  ;;  %v2353_v46 = vpop.f32.mrf.mxu2 }
 0x305   : > { %v2973_v7 = vpop.f32.mrf.mxu0  ;;  %v3100_v5 = vmax.f32 %v3064_v25, 0.0  ;;  %v2405_v36 = vadd.f32 %v2353_v46, %v2095_v29  ;;  %v2096_v49 = vadd.f32 %v2046_v17, %v4722_v1  ;;  %5361 = sst [smem:[#allocation42_spill]] %s5068_s9 }
 0x306   : > { %v2663_v33 = vpop.f32.mrf.mxu3  ;;  %5362 = sst [smem:[#allocation43_spill]] %s5070_s22 }
 0x307   : > { %3137 = vst.msk [vmem:[#allocation3 + $0xd8] sm:$0xff] %vm3109_vm2, %v3100_v5  ;;  %v2715_v54 = vadd.f32 %v2663_v33, %v2405_v36  ;;  %s5079_s9 = sld [smem:[#allocation5 + %s3322_s28]]  ;;  %s3354_s28 = sadd.s32 26, %s4940_s18 }
 0x308   : > { %s5086_s22 = sld [smem:[#allocation6 + %s3330_s14]] }
 0x309   : > { %v3025_v37 = vadd.f32 %v2973_v7, %v2715_v54  ;;  %5369 = sst [smem:[#allocation50_spill]] %s5091_s10 }
 0x30a   : > { %5371 = sst [smem:[#allocation52_spill]] %s5096_s23 }
 0x30b   : > { %v3065_v34 = vadd.f32 %v4773_v30, %v3025_v37  ;;  %s5098_s14 = sld [smem:[#allocation6 + %s3346_s29]] }
 0x30c   : > { %v2049_v58 = vpop.f32.mrf.mxu1  ;;  %v2356_v16 = vpop.f32.mrf.mxu2  ;;  %s5102_s10 = sld [smem:[#allocation5 + %s3354_s28]] }
 0x30d   : > { %v2976_v50 = vpop.f32.mrf.mxu0  ;;  %v3101_v3 = vmax.f32 %v3065_v34, 0.0  ;;  %v2406_v43 = vadd.f32 %v2356_v16, %v2096_v49  ;;  %v2097_v48 = vadd.f32 %v2049_v58, %v4729_v9  ;;  %5365 = sst [smem:[#allocation46_spill]] %s5079_s9 }
 0x30e   : > { %v2666_v19 = vpop.f32.mrf.mxu3  ;;  %5368 = sst [smem:[#allocation49_spill]] %s5086_s22 }
 0x30f   : > { %3138 = vst.msk [vmem:[#allocation3 + $0xe0] sm:$0xff] %vm3109_vm2, %v3101_v3  ;;  %v2716_v1 = vadd.f32 %v2666_v19, %v2406_v43  ;;  %s5093_s9 = sld [smem:[#allocation6 + %s3338_s7]] }
 0x310   : > { %s5104_s7 = sld [smem:[#allocation6 + %s3354_s28]] }
 0x311   : > { %v3026_v35 = vadd.f32 %v2976_v50, %v2716_v1  ;;  %5372 = sst [smem:[#allocation53_spill]] %s5098_s14  ;;  %s3378_s14 = sadd.s32 29, %s4940_s18  ;;  %v3151_v1 = vstv %s4949_s21 }
 0x312   : > { %5373 = sst [smem:[#allocation54_spill]] %s5102_s10  ;;  %s3386_s10 = sadd.s32 30, %s4940_s18 }
 0x313   : > { %v3066_v63 = vadd.f32 %v4773_v30, %v3026_v35  ;;  %s5107_s23 = sld [smem:[#allocation5 + %s3362_s20]]  ;;  %v3159_v35 = vstv %s4954_s24 }
 0x314   : > { %v2052_v56 = vpop.f32.mrf.mxu1  ;;  %v2359_v53 = vpop.f32.mrf.mxu2  ;;  %s5109_s29 = sld [smem:[#allocation6 + %s3362_s20]]  ;;  %s5316_s20 = sadd.s32 31, %s4940_s18 }
 0x315   : > { %v2979_v38 = vpop.f32.mrf.mxu0  ;;  %v3102_v40 = vmax.f32 %v3066_v63, 0.0  ;;  %v2407_v23 = vadd.f32 %v2359_v53, %v2097_v48  ;;  %v2098_v39 = vadd.f32 %v2052_v56, %v4736_v11  ;;  %5370 = sst [smem:[#allocation51_spill]] %s5093_s9  ;;  %s3370_s9 = sadd.s32 28, %s4940_s18  ;;  %v3167_v48 = vstv %s4960_s6 }
 0x316   : > { %v2669_v24 = vpop.f32.mrf.mxu3  ;;  %5374 = sst [smem:[#allocation55_spill]] %s5104_s7  ;;  %v3175_v63 = vstv %s4965_s12  ;;  %v3183_v56 = vstv %s4972_s15  ;;  %v3191_v53 = vstv %s4977_s19 }
 0x317   : > { %3139 = vst.msk [vmem:[#allocation3 + $0xe8] sm:$0xff] %vm3109_vm2, %v3102_v40  ;;  %v2717_v9 = vadd.f32 %v2669_v24, %v2407_v23  ;;  %s5113_s22 = sld [smem:[#allocation5 + %s3370_s9]]  ;;  %v3207_v40 = vstv %s4988_s8  ;;  %v3215_v23 = vstv %s4995_s16  ;;  %v3223_v24 = vstv %s5001_s26 }
 0x318   : > { %s5115_s28 = sld [smem:[#allocation6 + %s3370_s9]] }
 0x319   : > { %v3027_v62 = vadd.f32 %v2979_v38, %v2717_v9  ;;  %5375 = sst [smem:[#allocation56_spill]] %s5107_s23  ;;  %v3199_v38 = vstv %s4983_s2  ;;  %v3231_v9 = vstv %s5007_s5 }
 0x31a   : > { %5376 = sst [smem:[#allocation57_spill]] %s5109_s29 }
 0x31b   : > { %v3067_v57 = vadd.f32 %v4773_v30, %v3027_v62  ;;  %s5118_s23 = sld [smem:[#allocation5 + %s3378_s14]]  ;;  %v3239_v62 = vstv %s5012_s13 }
 0x31c   : > { %v2055_v44 = vpop.f32.mrf.mxu1  ;;  %v2362_v60 = vpop.f32.mrf.mxu2  ;;  %s5122_s29 = sld [smem:[#allocation6 + %s3378_s14]] }
 0x31d   : > { %v2982_v42 = vpop.f32.mrf.mxu0  ;;  %v3103_v4 = vmax.f32 %v3067_v57, 0.0  ;;  %v2408_v26 = vadd.f32 %v2362_v60, %v2098_v39  ;;  %v2099_v32 = vadd.f32 %v2055_v44, %v4743_v10  ;;  %5377 = sst [smem:[#allocation58_spill]] %s5113_s22  ;;  %v3247_v39 = vstv %s5024_s1  ;;  %s5391_s22 = sadd.s32 31, %s4940_s18 }
 0x31e   : > { %v2672_v6 = vpop.f32.mrf.mxu3  ;;  %s5131_s9 = sld [smem:[#allocation6 + %s3386_s10]]  ;;  %v3255_v57 = vstv %s5029_s27  ;;  %v3263_v44 = vstv %s5035_s30  ;;  %v3271_v60 = vstv %s5040_s3 }
 0x31f   : > { %3140 = vst.msk [vmem:[#allocation3 + $0xf0] sm:$0xff] %vm3109_vm2, %v3103_v4  ;;  %v2718_v11 = vadd.f32 %v2672_v6, %v2408_v26  ;;  %s5379_s21 = sld [smem:[#allocation43_spill]]  ;;  %v3287_v4 = vstv %s5052_s0  ;;  %v3295_v26 = vstv %s5058_s17  ;;  %v3303_v6 = vstv %s5063_s11 }
 0x320   : > { %s5380_s14 = sld [smem:[#allocation47_spill]] }
 0x321   : > { %v3028_v30 = vadd.f32 %v2982_v42, %v2718_v11  ;;  %5378 = sst [smem:[#allocation59_spill]] %s5118_s23  ;;  %v3279_v42 = vstv %s5047_s4 }
 0x322   : > { %s5381_s24 = sld [smem:[#allocation49_spill]] }
 0x323   : > { %v3068_v0 = vadd.f32 %v5019_v14, %v3028_v30  ;;  %s5139_s23 = sld [smem:[#allocation6 + %s5316_s20]]  ;;  %v3319_v30 = vstv %s5075_s25 }
 0x324   : > { %v2058_v18 = vpop.f32.mrf.mxu1  ;;  %v2365_v12 = vpop.f32.mrf.mxu2  ;;  %s5382_s6 = sld [smem:[#allocation51_spill]] }
 0x325   : > { %v2985_v59 = vpop.f32.mrf.mxu0  ;;  %v3104_v2 = vmax.f32 %v3068_v0, 0.0  ;;  %v2409_v47 = vadd.f32 %v2365_v12, %v2099_v32  ;;  %v2100_v28 = vadd.f32 %v2058_v18, %v4750_v45  ;;  %s5383_s12 = sld [smem:[#allocation53_spill]]  ;;  %v3311_v11 = vstv %s5379_s21 }
 0x326   : > { %v2675_v10 = vpop.f32.mrf.mxu3  ;;  %s5384_s15 = sld [smem:[#allocation57_spill]]  ;;  %v3327_v32 = vstv %s5380_s14  ;;  %v3359_v12 = vstv %s5104_s7 }
 0x327   : > { %3141 = vst.msk [vmem:[#allocation3 + $0xf8] sm:$0xff] %vm3109_vm2, %v3104_v2  ;;  %v2719_v61 = vadd.f32 %v2675_v10, %v2409_v47  ;;  %s5385_s2 = sld [smem:[#allocation20_spill]]  ;;  %v3375_v2 = vstv %s5115_s28 }
 0x328   : > { %s5386_s8 = sld [smem:[#allocation21_spill]] }
 0x329   : > { %v3029_v27 = vadd.f32 %v2985_v59, %v2719_v61  ;;  %s5387_s19 = sld [smem:[#allocation22_spill]] }
 0x32a   : > { %v3343_v0 = vstv %s5382_s6  ;;  %s5388_s5 = sld [smem:[#allocation23_spill]] }
 0x32b   : > { %v3069_v51 = vadd.f32 %v5019_v14, %v3029_v27  ;;  %s5159_s26 = sld [smem:[#allocation5 + %s3386_s10]]  ;;  %v3351_v18 = vstv %s5383_s12  ;;  %v3383_v27 = vstv %s5122_s29 }
 0x32c   : > { %v2368_v41 = vpop.f32.mrf.mxu2  ;;  %v2061_v55 = vpop.f32.mrf.mxu1  ;;  %s5389_s16 = sld [smem:[#allocation24_spill]]  ;;  %v3367_v59 = vstv %s5384_s15 }
 0x32d   : > { %v2988_v20 = vpop.f32.mrf.mxu0  ;;  %v3105_v8 = vmax.f32 %v3069_v51, 0.0  ;;  %v2410_v31 = vadd.f32 %v2368_v41, %v2100_v28  ;;  %v2101_v21 = vadd.f32 %v2061_v55, %v4757_v52  ;;  %s5390_s20 = sld [smem:[#allocation25_spill]]  ;;  %s3149_s11 = scalar_lea.vmem [#allocation3], %s5385_s2 }
 0x32e   : > { %v2678_v13 = vpop.f32.mrf.mxu3  ;;  %s5167_s17 = sld [smem:[#allocation5 + %s5391_s22]]  ;;  %s3157_s25 = scalar_lea.vmem [#allocation3], %s5386_s8 }
 0x32f   : > { %3142 = vst.msk [vmem:[#allocation3 + $0x100] sm:$0xff] %vm3109_vm2, %v3105_v8  ;;  %v2720_v45 = vadd.f32 %v2678_v13, %v2410_v31  ;;  %s3165_s6 = scalar_lea.vmem [#allocation3], %s5387_s19  ;;  %s5393_s14 = sld [smem:[#allocation27_spill]]  ;;  %v3391_v31 = vstv %s5131_s9 }
 0x330   : > { %s5394_s10 = sld [smem:[#allocation28_spill]]  ;;  %s3173_s7 = scalar_lea.vmem [#allocation3], %s5388_s5 }
 0x331   : > { %v3030_v15 = vadd.f32 %v2988_v20, %v2720_v45  ;;  %s5395_s22 = sld [smem:[#allocation29_spill]] }
 0x332   : > { %s3181_s15 = scalar_lea.vmem [#allocation3], %s5389_s16  ;;  %s5398_s19 = sld [smem:[#allocation32_spill]] }
 0x333   : > { %v3070_v29 = vadd.f32 %v5019_v14, %v3030_v15  ;;  %s3189_s18 = scalar_lea.vmem [#allocation3], %s5390_s20  ;;  %s5400_s20 = sld [smem:[#allocation34_spill]] }
 0x334   : > { %v2371_v25 = vpop.f32.mrf.mxu2  ;;  %v2064_v36 = vpop.f32.mrf.mxu1  ;;  %s5402_s16 = sld [smem:[#allocation36_spill]]  ;;  %s3397_s12 = scalar_lea.vmem [#allocation3], %s5167_s17 }
 0x335   : > { %v2991_v17 = vpop.f32.mrf.mxu0  ;;  %v3106_v46 = vmax.f32 %v3070_v29, 0.0  ;;  %v2411_v7 = vadd.f32 %v2371_v25, %v2101_v21  ;;  %v2102_v54 = vadd.f32 %v2064_v36, %v4764_v22  ;;  %s3205_s2 = scalar_lea.vmem [#allocation3], %s5393_s14  ;;  %v3399_v25 = vstv %s5139_s23  ;;  %s5401_s14 = sld [smem:[#allocation35_spill]] }
 0x336   : > { %v2681_v5 = vpop.f32.mrf.mxu3  ;;  %s3213_s8 = scalar_lea.vmem [#allocation3], %s5394_s10  ;;  %s5403_s10 = sld [smem:[#allocation37_spill]] }
 0x337   : > { %3143 = vst.msk [vmem:[#allocation3 + $0x108] sm:$0xff] %vm3109_vm2, %v3106_v46  ;;  %v2721_v52 = vadd.f32 %v2681_v5, %v2411_v7  ;;  %s5408_s13 = sld [smem:[#allocation46_spill]] }
 0x338   : > { %s5427_s17 = sld [smem:[#allocation63_spill]] }
 0x339   : > { %v3031_v33 = vadd.f32 %v2991_v17, %v2721_v52 }
 0x33b   : > { %v3071_v37 = vadd.f32 %v5019_v14, %v3031_v33 }
 0x33c   : > { %v2374_v49 = vpop.f32.mrf.mxu2 }
 0x33d   : > { %v3107_v34 = vmax.f32 %v3071_v37, 0.0  ;;  %v2412_v58 = vadd.f32 %v2374_v49, %v2102_v54  ;;  %v2994_v50 = vpop.f32.mrf.mxu0 }
 0x33e   : > { %v2684_v16 = vpop.f32.mrf.mxu3 }
 0x33f   : > { %3144 = vst.msk [vmem:[#allocation3 + $0x110] sm:$0xff] %vm3109_vm2, %v3107_v34  ;;  %v2722_v22 = vadd.f32 %v2684_v16, %v2412_v58 }
 0x341   : > { %v3032_v3 = vadd.f32 %v2994_v50, %v2722_v22 }
 0x343   : > { %v3072_v43 = vadd.f32 %v5019_v14, %v3032_v3  ;;  %v3335_v14 = vstv %s5381_s24  ;;  %s5392_s24 = sld [smem:[#allocation26_spill]] }
 0x345   : > { %v3108_v19 = vmax.f32 %v3072_v43, 0.0 }
 0x347   : > { %3145 = vst.msk [vmem:[#allocation3 + $0x118] sm:$0xff] %vm3109_vm2, %v3108_v19 }
 0x34e   : > { %v3150_v47 = vld [vmem:[%s3149_s11] sm:$0x1]  ;;  %s5396_s11 = sld [smem:[#allocation30_spill]] }
 0x34f   : > { %v3158_v10 = vld [vmem:[%s3157_s25] sm:$0x1]  ;;  %v3152_v28 = vmul.f32 %v3151_v1, %v3150_v47  ;;  %s5397_s25 = sld [smem:[#allocation31_spill]] }
 0x350   : > { %v3166_v61 = vld [vmem:[%s3165_s6] sm:$0x1]  ;;  %v3160_v51 = vmul.f32 %v3159_v35, %v3158_v10  ;;  %s3197_s6 = scalar_lea.vmem [#allocation3], %s5392_s24 }
 0x351   : > { %v3174_v41 = vld [vmem:[%s3173_s7] sm:$0x1]  ;;  %v3168_v55 = vmul.f32 %v3167_v48, %v3166_v61  ;;  %s5399_s7 = sld [smem:[#allocation33_spill]] }
 0x352   : > { %v3182_v20 = vld [vmem:[%s3181_s15] sm:$0x1]  ;;  %v3161_v17 = vadd.f32 %v3160_v51, %v3152_v28  ;;  %v3176_v46 = vmul.f32 %v3175_v63, %v3174_v41  ;;  %s3221_s15 = scalar_lea.vmem [#allocation3], %s5395_s22  ;;  %s3261_s22 = scalar_lea.vmem [#allocation3], %s5400_s20 }
 0x353   : > { %v3190_v8 = vld [vmem:[%s3189_s18] sm:$0x1]  ;;  %v3184_v13 = vmul.f32 %v3183_v56, %v3182_v20  ;;  %s3245_s18 = scalar_lea.vmem [#allocation3], %s5398_s19  ;;  %s3277_s19 = scalar_lea.vmem [#allocation3], %s5402_s16 }
 0x354   : > { %v3192_v45 = vmul.f32 %v3191_v53, %v3190_v8  ;;  %v3198_v15 = vld [vmem:[%s3197_s6] sm:$0x1]  ;;  %s3229_s5 = scalar_lea.vmem [#allocation3], %s5396_s11  ;;  %s5404_s11 = sld [smem:[#allocation38_spill]]  ;;  %v3169_v22 = vadd.f32 %v3168_v55, %v3161_v17 }
 0x355   : > { %v3206_v21 = vld [vmem:[%s3205_s2] sm:$0x1]  ;;  %v3200_v7 = vmul.f32 %v3199_v38, %v3198_v15  ;;  %s3237_s24 = scalar_lea.vmem [#allocation3], %s5397_s25  ;;  %s5405_s25 = sld [smem:[#allocation40_spill]] }
 0x356   : > { %v3214_v29 = vld [vmem:[%s3213_s8] sm:$0x1]  ;;  %v3193_v54 = vadd.f32 %v3192_v45, %v3184_v13  ;;  %v3208_v37 = vmul.f32 %v3207_v40, %v3206_v21  ;;  %s5406_s2 = sld [smem:[#allocation42_spill]]  ;;  %s3269_s8 = scalar_lea.vmem [#allocation3], %s5401_s14 }
 0x357   : > { %v3216_v5 = vmul.f32 %v3215_v23, %v3214_v29  ;;  %v3222_v52 = vld [vmem:[%s3221_s15] sm:$0x1]  ;;  %s3253_s6 = scalar_lea.vmem [#allocation3], %s5399_s7  ;;  %s3285_s7 = scalar_lea.vmem [#allocation3], %s5403_s10 }
 0x358   : > { %v3230_v36 = vld [vmem:[%s3229_s5] sm:$0x1]  ;;  %v3224_v49 = vmul.f32 %v3223_v24, %v3222_v52  ;;  %s5407_s20 = sld [smem:[#allocation44_spill]]  ;;  %v3201_v63 = vadd.f32 %v3200_v7, %v3193_v54 }
 0x359   : > { %v3238_v33 = vld [vmem:[%s3237_s24] sm:$0x1]  ;;  %v3232_v34 = vmul.f32 %v3231_v9, %v3230_v36  ;;  %s5410_s5 = sld [smem:[#allocation48_spill]]  ;;  %v5203_v9 = vadd.f32 %v3176_v46, %v3169_v22 }
 0x35a   : > { %v3246_v58 = vld [vmem:[%s3245_s18] sm:$0x1]  ;;  %v3240_v3 = vmul.f32 %v3239_v62, %v3238_v33  ;;  %v3225_v56 = vadd.f32 %v3224_v49, %v3216_v5  ;;  %s3293_s1 = scalar_lea.vmem [#allocation3], %s5404_s11  ;;  %s5411_s14 = sld [smem:[#allocation50_spill]]  ;;  %v3209_v47 = vadd.f32 %v3208_v37, %v3201_v63 }
 0x35b   : > { %v3254_v16 = vld [vmem:[%s3253_s6] sm:$0x1]  ;;  %v3248_v43 = vmul.f32 %v3247_v39, %v3246_v58  ;;  %s3301_s15 = scalar_lea.vmem [#allocation3], %s5405_s25  ;;  %s5412_s16 = sld [smem:[#allocation52_spill]] }
 0x35c   : > { %v3262_v50 = vld [vmem:[%s3261_s22] sm:$0x1]  ;;  %v3256_v19 = vmul.f32 %v3255_v57, %v3254_v16  ;;  %s3309_s24 = scalar_lea.vmem [#allocation3], %s5406_s2  ;;  %s3325_s18 = scalar_lea.vmem [#allocation3], %s5408_s13  ;;  %v3233_v10 = vadd.f32 %v3232_v34, %v3225_v56  ;;  %v3403_v58 = vrot.slane %v3209_v47, 7 }
 0x35d   : > { %v3270_v1 = vld [vmem:[%s3269_s8] sm:$0x1]  ;;  %v3264_v53 = vmul.f32 %v3263_v44, %v3262_v50  ;;  %s5415_s6 = sld [smem:[#allocation54_spill]]  ;;  %s4092_s2 = scalar_lea.hbm %s5427_s17, 64 }
 0x35e   : > { %v3278_v35 = vld [vmem:[%s3277_s19] sm:$0x1]  ;;  %v3257_v62 = vadd.f32 %v3256_v19, %v3248_v43  ;;  %v3272_v39 = vmul.f32 %v3271_v60, %v3270_v1  ;;  %s3317_s4 = scalar_lea.vmem [#allocation3], %s5407_s20  ;;  %s5416_s22 = sld [smem:[#allocation58_spill]]  ;;  %v3241_v45 = vadd.f32 %v3240_v3, %v3233_v10 }
 0x35f   : > { %v3286_v48 = vld [vmem:[%s3285_s7] sm:$0x1]  ;;  %v3280_v38 = vmul.f32 %v3279_v42, %v3278_v35  ;;  %s5417_s11 = sld [smem:[#allocation59_spill]]  ;;  %s3333_s25 = scalar_lea.vmem [#allocation3], %s5410_s5 }
 0x360   : > { %v3294_v40 = vld [vmem:[%s3293_s1] sm:$0x1]  ;;  %v3288_v57 = vmul.f32 %v3287_v4, %v3286_v48  ;;  %s3341_s0 = scalar_lea.vmem [#allocation3], %s5411_s14  ;;  %s5420_s19 = sld [smem:[#allocation56_spill]]  ;;  %v3265_v41 = vadd.f32 %v3264_v53, %v3257_v62  ;;  %v3406_v16 = vrot.slane %v3241_v45, 6 }
 0x361   : > { %v3302_v23 = vld [vmem:[%s3301_s15] sm:$0x1]  ;;  %v3296_v61 = vmul.f32 %v3295_v26, %v3294_v40  ;;  %s3349_s8 = scalar_lea.vmem [#allocation3], %s5412_s16  ;;  %s5422_s13 = sld [smem:[#allocation12_spill]] }
 0x362   : > { %v3310_v24 = vld [vmem:[%s3309_s24] sm:$0x1]  ;;  %v3289_v20 = vadd.f32 %v3288_v57, %v3280_v38  ;;  %v3304_v8 = vmul.f32 %v3303_v6, %v3302_v23  ;;  %s5424_s15 = sld [smem:[#allocation15_spill]]  ;;  %s3389_s24 = scalar_lea.vmem [#allocation3], %s5159_s26  ;;  %v3273_v17 = vadd.f32 %v3272_v39, %v3265_v41 }
 0x363   : > { %v3318_v44 = vld [vmem:[%s3317_s4] sm:$0x1]  ;;  %v3312_v28 = vmul.f32 %v3311_v11, %v3310_v24  ;;  %s3357_s21 = scalar_lea.vmem [#allocation3], %s5415_s6 }
 0x364   : > { %v3326_v42 = vld [vmem:[%s3325_s18] sm:$0x1]  ;;  %v3320_v26 = vmul.f32 %v3319_v30, %v3318_v44  ;;  %s3373_s20 = scalar_lea.vmem [#allocation3], %s5416_s22  ;;  %v3297_v46 = vadd.f32 %v3296_v61, %v3289_v20  ;;  %v3409_v22 = vrot.slane %v3273_v17, 5 }
 0x365   : > { %v3334_v51 = vld [vmem:[%s3333_s25] sm:$0x1]  ;;  %s3381_s1 = scalar_lea.vmem [#allocation3], %s5417_s11  ;;  %v3328_v15 = vmul.f32 %v3327_v32, %v3326_v42 }
 0x366   : > { %v3342_v60 = vld [vmem:[%s3341_s0] sm:$0x1]  ;;  %s3365_s5 = scalar_lea.vmem [#allocation3], %s5420_s19  ;;  %v3321_v7 = vadd.f32 %v3320_v26, %v3312_v28  ;;  %v3336_v5 = vmul.f32 %v3335_v14, %v3334_v51  ;;  %v3305_v33 = vadd.f32 %v3304_v8, %v3297_v46 }
 0x367   : > { %v3350_v4 = vld [vmem:[%s3349_s8] sm:$0x1]  ;;  %v3344_v21 = vmul.f32 %v3343_v0, %v3342_v60  ;;  %s5426_s16 = sand.u32 1, %s5422_s13  }
 0x368   : > { %v3358_v55 = vld [vmem:[%s3357_s21] sm:$0x1]  ;;  %v3352_v6 = vmul.f32 %v3351_v18, %v3350_v4  ;;  %s5237_s4 = sshll.u32 %s5426_s16, 3  ;;  %s3893_s26 = sshll.u32 %s5424_s15, 3  ;;  %v3329_v54 = vadd.f32 %v3328_v15, %v3321_v7 }
 0x369   : > { %v3374_v11 = vld [vmem:[%s3373_s20] sm:$0x1]  ;;  %v3360_v0 = vmul.f32 %v3359_v12, %v3358_v55  ;;  %s3448_s30 = scalar_lea.hbm %s5427_s17, %s3893_s26  ;;  %s178_s23 = scalar_lea.vmem [#allocation7], %s5237_s4 }
 0x36a   : > { %v3382_v13 = vld [vmem:[%s3381_s1] sm:$0x1]  ;;  %v3353_v32 = vadd.f32 %v3352_v6, %v3344_v21  ;;  %v3376_v18 = vmul.f32 %v3375_v2, %v3374_v11  ;;  %v3337_v50 = vadd.f32 %v3336_v5, %v3329_v54  ;;  %s3450_s9 = sshll.u32 %s178_s23, 4  ;;  %s3452_s10 = sshll.u32 %s3448_s30, 4  ;;  %s3451_s9 = int_to_ptr.vmem [resolvable:$true] %s3450_s9  ;;  %s3453_s10 = int_to_ptr.hbm [resolvable:$true] %s3452_s10 }
 0x36b   : > { %v3366_v30 = vld [vmem:[%s3365_s5] sm:$0x1]  ;;  %v3384_v52 = vmul.f32 %v3383_v27, %v3382_v13  ;;  %s5429_s6 = smov %s5426_s16  ;;  %s4086_s11 = sshra.s32 %s3453_s10, 4  ;;  %s4087_s11 = int_to_ptr.hbm [resolvable:$true] %s4086_s11 }
 0x36c   : > { %v3390_v29 = vld [vmem:[%s3389_s24] sm:$0x1]  ;;  %v3368_v37 = vmul.f32 %v3367_v59, %v3366_v30  ;;  %v3361_v49 = vadd.f32 %v3360_v0, %v3353_v32  ;;  %v3424_v59 = vsel %vm3423_vm3, %v5203_v9, %v3403_v58  ;;  %v3415_v19 = vrot.slane %v3337_v50, 3  ;;  %s3438_s22 = scalar_lea.sflag [#allocation8], %s5429_s6  ;;  %s4088_s25 = scalar_lea.hbm %s4087_s11, 8 }
 0x36d   : > { %v3398_v36 = vld [vmem:[%s3397_s12] sm:$0x1]  ;;  %v3392_v14 = vmul.f32 %v3391_v31, %v3390_v29  ;;  %v3385_v34 = vadd.f32 %v3384_v52, %v3376_v18  ;;  %v3412_v31 = vrot.slane %v3305_v33, 4  ;;  %v3426_v3 = vsel %vm3425_vm4, %v3424_v59, %v3406_v16  ;;  %p4089_p11 = scmp.ne.s32.totalorder %s4087_s11, %s4088_s25  ;;  %p4093_p0 = scmp.lt.s32.totalorder %s4087_s11, %s5427_s17 }
 0x36e   : > { %v3400_v12 = vmul.f32 %v3399_v25, %v3398_v36  ;;  %v3369_v2 = vadd.f32 %v3368_v37, %v3361_v49  ;;  %v3427_v25 = vsel %vm498_vm0, %v3426_v3, %v3409_v22  ;;  %p4094_p1 = scmp.lt.s32.totalorder %s4092_s2, %s4088_s25 }
 0x36f   : > { %v3393_v27 = vadd.f32 %v3392_v14, %v3385_v34  ;;  %v3429_v35 = vsel %vm3428_vm5, %v3427_v25, %v3412_v31  ;;  %p4090_p12 = pnand %p4089_p11, %p4214_p5 }
 0x370   : > { %v3418_v1 = vrot.slane %v3369_v2, 2  ;;  %v3431_v63 = vsel %vm3430_vm6, %v3429_v35, %v3415_v19  ;;  %p4095_p2 = por %p4094_p1, %p4093_p0 }
 0x371   : > { %v3401_v43 = vadd.f32 %v3400_v12, %v3393_v27  ;;  %p4091_p13 = pneg %p4090_p12 }
 0x372   : > { %v3433_v56 = vsel %vm3432_vm7, %v3431_v63, %v3418_v1 }
 0x373   : > { %v3421_v48 = vrot.slane %v3401_v43, 1  ;;  %p4096_p3 = pnand %p4095_p2, %p4091_p13 }
 0x375   : > { %v3435_v53 = vsel %vm3434_vm8, %v3433_v56, %v3421_v48 }
 0x376   : > { %3436 = vst.msk [vmem:[%s178_s23] sm:$0xff] %vm3109_vm2, %v3435_v53 }
 0x377   : > { %4099 = shalt.err (!%p4096_p3)
}
 0x378   : > { %4004 = dma.vmem_to_hbm [thread:$0]  (%p4214_p5), %s3451_s9, 128, %s3453_s10, %s3438_s22  }
 0x379 PF: > { %s5430_s21 = sld [smem:[#allocation14_spill]] }
 0x37a   : > { %s5431_s7 = sld [smem:[#allocation11_spill]] }
 0x37f   : > { %p4010_p4 = scmp.ge.s32.totalorder %s5430_s21, 2 }
 0x380   : > { %s3464_s13 = sand.u32 1, %s5431_s7  }
 0x381   : > { %p4007_p7 = pnand %p4010_p4, %p4218_p6  ;;  %s3465_s1 = scalar_lea.sflag [#allocation8], %s3464_s13 }
 0x383   : > { %p4008_p8 = pneg %p4007_p7 }
 0x385   : > { %4119 = dma.done.wait (%p4008_p8), %s3465_s1, 128  }
 0x386   : > { %4121 = vsyncadd (%p4008_p8), %s3465_s1, 4294967168  ;;  %s5433_s28 = sld [smem:[#allocation16_spill]] }
 0x387   : > { %s5434_s26 = sld [smem:[#allocation12_spill]] }
 0x388   : > { %s5435_s27 = sld [smem:[#allocation13_spill]] }
 0x389   : > { %s5436_s0 = sld [smem:[#allocation17_spill]] }
 0x38c   : > { %p28_p9 = scmp.ge.s32.totalorder %s5433_s28, 10  }
 0x38e   :  { %30 = sbr.rel (!%p28_p9) target bundleno = 13 (0xd), region = 107 }
 0x393   :  { %3471 = vsyncpa [#allocation8], 1 }
 0x394   :  { %3473 = vsyncpa [#allocation8 + $0x1], 1 }

</bundles_post_ra>
